<compile_context>
chip_gen: v7x
topology: tpu7x:2x2x1
jax: 0.10.0
libtpu: 0.0.40
codegen_flags: <defaults>
</compile_context>

<pallas_src>
import functools

import jax
import jax.numpy as jnp
from jax.experimental import pallas as pl
from jax.experimental.pallas import tpu as pltpu


def _round_up(v, m):
    return ((v + m - 1) // m) * m


def _grafiti_fused_kernel(x_ref, edges_ref, w_ref, b_ref, o_ref,
                          h_cur_ref, acc_ref, *, use_bf16):
    """Fused GrafitiEncoder: for each layer, scatter-add(gather(h)/ea) -> linear -> relu."""
    mm_dtype = jnp.bfloat16 if use_bf16 else jnp.float32

    l_idx = pl.program_id(0)              # layer axis (sequential dependency)
    e_idx = pl.program_id(1)              # edge-block reduction axis
    last_e = pl.num_programs(1) - 1

    n_pad = acc_ref.shape[0]
    tile_e = edges_ref.shape[1]

    # Load the (already-cast) input features into the resident feature scratch once.
    @pl.when((l_idx == 0) & (e_idx == 0))
    def _():
        h_cur_ref[...] = x_ref[...]

    # Zero the aggregation accumulator at the start of each layer's edge sweep.
    @pl.when(e_idx == 0)
    def _():
        acc_ref[...] = jnp.zeros_like(acc_ref)

    # Unpack the packed edge block: row 0 = src, row 1 = dst, row 2 = bits(1/edge_attr).
    src = edges_ref[0:1, :]                                   # [1, tile_e] int32
    dst = edges_ref[1:2, :]                                   # [1, tile_e] int32
    inv_ea = pltpu.bitcast(edges_ref[2:3, :], jnp.float32)    # [1, tile_e] f32 (0 for pad)

    # One node-id iota shared by the gather and scatter one-hots (no per-block offset).
    node_ids = jax.lax.broadcasted_iota(jnp.int32, (n_pad, tile_e), 0)
    gather_t = (node_ids == src).astype(mm_dtype)             # [n_pad, tile_e] (exact 0/1)
    scatter_scaled = jnp.where(node_ids == dst, inv_ea, 0.0).astype(mm_dtype)

    # msg[e, d] = h[src_e, d] : contract the node axis on the MXU.  Computed exactly once
    # per (layer, edge block) -- no node-block redundancy by construction.
    msg = jax.lax.dot_general(gather_t, h_cur_ref[...],
                              (((0,), (0,)), ((), ())),
                              preferred_element_type=mm_dtype)      # [tile_e, d_pad]

    # acc[n, d] += sum_e scatter_scaled[n, e] * msg[e, d]  (scatter-add + /edge_attr fused)
    acc_ref[...] += jnp.dot(scatter_scaled, msg,
                            preferred_element_type=jnp.float32)     # [n_pad, d_pad]

    # Finalize this layer: linear + relu (relu(leaky_relu(z, 0.01)) == relu(z)).
    @pl.when(e_idx == last_e)
    def _():
        z = jnp.dot(acc_ref[...], w_ref[0],
                    preferred_element_type=jnp.float32) + b_ref[0]
        h_next = jnp.maximum(z, 0.0)
        h_cur_ref[...] = h_next.astype(h_cur_ref.dtype)   # becomes next layer's input
        # Output block is resident (constant index map); the final layer's write wins.
        o_ref[...] = h_next


def grafiti_encoder_forward(x, edge_index, edge_attr, params, *,
                            tile_e=512, use_bf16=True):
    """params = [(w1, b1), (w2, b2), ...] with w of shape [out, in] (torch Linear layout)."""
    assert tile_e % 128 == 0
    N, in_dim = x.shape
    E = edge_index.shape[1]
    num_layers = len(params)

    dims = [in_dim] + [d for w, _ in params for d in w.shape]
    d_pad = _round_up(max(dims), 128)          # common lane-dense feature width
    n_pad = _round_up(max(N, 8), 8)
    e_pad = _round_up(max(E, 1), tile_e)

    feat_dtype = jnp.bfloat16 if use_bf16 else jnp.float32

    # Node features: cast to the matmul dtype ONCE here (no per-grid-step in-kernel cast).
    x_pad = jnp.zeros((n_pad, d_pad), feat_dtype).at[:N, :in_dim].set(
        x.astype(feat_dtype))

    # Pack src / dst / bits(1/edge_attr) into one (8, e_pad) int32 slab: one DMA per step.
    src = edge_index[0].astype(jnp.int32)
    dst = edge_index[1].astype(jnp.int32)
    inv_ea = 1.0 / edge_attr.astype(jnp.float32)
    inv_bits = jax.lax.bitcast_convert_type(inv_ea, jnp.int32)
    edges = jnp.zeros((8, e_pad), jnp.int32)
    edges = edges.at[0, :E].set(src).at[1, :E].set(dst).at[2, :E].set(inv_bits)
    # Padded edges: src = dst = 0, scatter weight bits = 0 -> contribute nothing.

    # Weight stack: pre-transposed to [in, out] and zero-padded into a common (d_pad, d_pad).
    w_stack = jnp.zeros((num_layers, d_pad, d_pad), jnp.float32)
    b_stack = jnp.zeros((num_layers, 1, d_pad), jnp.float32)
    for l, (w, b) in enumerate(params):
        d_out_l, d_in_l = w.shape
        w_stack = w_stack.at[l, :d_in_l, :d_out_l].set(w.T.astype(jnp.float32))
        b_stack = b_stack.at[l, 0, :d_out_l].set(b.astype(jnp.float32))

    grid = (num_layers, e_pad // tile_e)
    kernel = functools.partial(_grafiti_fused_kernel, use_bf16=use_bf16)

    out = pl.pallas_call(
        kernel,
        out_shape=jax.ShapeDtypeStruct((n_pad, d_pad), jnp.float32),
        grid_spec=pltpu.PrefetchScalarGridSpec(
            num_scalar_prefetch=0,
            grid=grid,
            in_specs=[
                pl.BlockSpec((n_pad, d_pad), lambda l, e: (0, 0)),        # x, resident
                pl.BlockSpec((8, tile_e), lambda l, e: (0, e)),           # packed edge block
                pl.BlockSpec((1, d_pad, d_pad), lambda l, e: (l, 0, 0)),  # layer weight
                pl.BlockSpec((1, 1, d_pad), lambda l, e: (l, 0, 0)),      # layer bias
            ],
            out_specs=pl.BlockSpec((n_pad, d_pad), lambda l, e: (0, 0)),
            scratch_shapes=[
                pltpu.VMEM((n_pad, d_pad), feat_dtype),    # h_cur: current layer's features
                pltpu.VMEM((n_pad, d_pad), jnp.float32),   # acc: scatter-add accumulator
            ],
        ),
        compiler_params=pltpu.CompilerParams(
            dimension_semantics=("arbitrary", "arbitrary"),
            vmem_limit_bytes=32 * 1024 * 1024),
    )(x_pad, edges, w_stack, b_stack)

    d_out_final = params[-1][0].shape[0]
    return out[:N, :d_out_final]


def _reference(x, edge_index, edge_attr, params):
    """Pure-JAX reference of the PyTorch forward."""
    h = x.astype(jnp.float32)
    src = edge_index[0]
    dst = edge_index[1]
    for w, b in params:
        msg = h[src] / edge_attr[:, None]
        agg = jax.ops.segment_sum(msg, dst, num_segments=h.shape[0])
        z = agg @ w.T + b
        z = jnp.where(z >= 0.0, z, 0.01 * z)   # leaky_relu(0.01)
        h = jnp.maximum(z, 0.0)                # outer .relu()
    return h


if __name__ == "__main__":
    # Small synthetic problem consistent with the module: N nodes with in_dim features,
    # E edges, layers=[10, 10].  Sizes chosen so the grid has multiple edge (reduction)
    # blocks and both fused layers run.
    N, in_dim, E = 200, 8, 600
    layers = [10, 10]

    key = jax.random.PRNGKey(0)
    kx, ke, ka, kw1, kb1, kw2, kb2 = jax.random.split(key, 7)

    x = jax.random.normal(kx, (N, in_dim), dtype=jnp.float32)
    edge_index = jax.random.randint(ke, (2, E), 0, N, dtype=jnp.int32)
    edge_attr = jax.random.uniform(ka, (E,), dtype=jnp.float32,
                                   minval=0.5, maxval=2.5)

    # torch.nn.Linear shapes: weight [out, in], bias [out].
    w1 = jax.random.normal(kw1, (layers[0], in_dim), dtype=jnp.float32) / jnp.sqrt(in_dim)
    b1 = jax.random.normal(kb1, (layers[0],), dtype=jnp.float32) * 0.1
    w2 = jax.random.normal(kw2, (layers[1], layers[0]), dtype=jnp.float32) / jnp.sqrt(layers[0])
    b2 = jax.random.normal(kb2, (layers[1],), dtype=jnp.float32) * 0.1
    params = [(w1, b1), (w2, b2)]

    ref = _reference(x, edge_index, edge_attr, params)

    # f32 one-hot matmul path (exact up to reciprocal / summation-order effects).
    out_f32 = jax.block_until_ready(
        grafiti_encoder_forward(x, edge_index, edge_attr, params, use_bf16=False))
    assert out_f32.shape == (N, layers[-1]), out_f32.shape
    assert jnp.allclose(out_f32, ref, rtol=1e-4, atol=1e-4), (
        f"f32 max abs err {jnp.max(jnp.abs(out_f32 - ref))}")

    # bf16 one-hot matmul path (v6e/v7x MXU fast path, f32 scatter/linear accumulation).
    out_bf16 = jax.block_until_ready(
        grafiti_encoder_forward(x, edge_index, edge_attr, params, use_bf16=True))
    assert out_bf16.shape == (N, layers[-1]), out_bf16.shape
    err = jnp.max(jnp.abs(out_bf16 - ref))
    scale = jnp.max(jnp.abs(ref)) + 1.0
    assert err <= 5e-2 * scale, f"bf16 max abs err {err} (scale {scale})"

    print("KERNEL_OK")
</pallas_src>

<mosaic_0001>
module attributes {stable_mosaic.version = 11 : i64} {
  func.func @_grafiti_fused_kernel(%arg0: i32, %arg1: i32, %arg2: memref<200x128xf32, #tpu.memory_space<vmem>>, %arg3: memref<8x512xi32, #tpu.memory_space<vmem>>, %arg4: memref<1x128x128xf32, #tpu.memory_space<vmem>>, %arg5: memref<1x1x128xf32, #tpu.memory_space<vmem>>, %arg6: memref<200x128xf32, #tpu.memory_space<vmem>>, %arg7: memref<200x128xf32, #tpu.memory_space<vmem>>, %arg8: memref<200x128xf32, #tpu.memory_space<vmem>>) attributes {dimension_semantics = [#tpu.dimension_semantics<arbitrary>, #tpu.dimension_semantics<arbitrary>], iteration_bounds = array<i64: 2, 2>, scalar_prefetch = 0 : i64, scratch_operands = 2 : i64, tpu.core_type = #tpu.core_type<tc>, window_params = [{pipeline_mode = #tpu.pipeline_mode<synchronous>, transform_indices = @transform_0, window_bounds = array<i64: 200, 128>}, {transform_indices = @transform_1, window_bounds = array<i64: 8, 512>}, {transform_indices = @transform_2, window_bounds = array<i64: 1, 128, 128>}, {transform_indices = @transform_3, window_bounds = array<i64: 1, 1, 128>}, {pipeline_mode = #tpu.pipeline_mode<synchronous>, transform_indices = @transform_4, window_bounds = array<i64: 200, 128>}]} {
    %c0_i32 = arith.constant 0 : i32
    %0 = arith.cmpi eq, %arg0, %c0_i32 : i32
    %c0_i32_0 = arith.constant 0 : i32
    %1 = arith.cmpi eq, %arg1, %c0_i32_0 : i32
    %2 = arith.andi %0, %1 : i1
    %3 = arith.extui %2 : i1 to i32
    %c0_i32_1 = arith.constant 0 : i32
    %4 = arith.cmpi ne, %3, %c0_i32_1 : i32
    scf.if %4 {
      %c0_16 = arith.constant 0 : index
      %c0_17 = arith.constant 0 : index
      %32 = vector.load %arg2[%c0_16, %c0_17] : memref<200x128xf32, #tpu.memory_space<vmem>>, vector<200x128xf32>
      %c0_18 = arith.constant 0 : index
      %c0_19 = arith.constant 0 : index
      %33 = vector.load %arg7[%c0_18, %c0_19] : memref<200x128xf32, #tpu.memory_space<vmem>>, vector<200x128xf32>
      tpu.vector_store %arg7[%c0_18, %c0_19], %32 {strides = array<i32>} : memref<200x128xf32, #tpu.memory_space<vmem>>, vector<200x128xf32>,
    } else {
    }
    %c0_i32_2 = arith.constant 0 : i32
    %5 = arith.cmpi eq, %arg1, %c0_i32_2 : i32
    %6 = arith.extui %5 : i1 to i32
    %c0_i32_3 = arith.constant 0 : i32
    %7 = arith.cmpi ne, %6, %c0_i32_3 : i32
    scf.if %7 {
      %cst_16 = arith.constant 0.000000e+00 : f32
      %32 = vector.broadcast %cst_16 : f32 to vector<200x128xf32>
      %c0_17 = arith.constant 0 : index
      %c0_18 = arith.constant 0 : index
      %33 = vector.load %arg8[%c0_17, %c0_18] : memref<200x128xf32, #tpu.memory_space<vmem>>, vector<200x128xf32>
      tpu.vector_store %arg8[%c0_17, %c0_18], %32 {strides = array<i32>} : memref<200x128xf32, #tpu.memory_space<vmem>>, vector<200x128xf32>,
    } else {
    }
    %c0 = arith.constant 0 : index
    %c0_4 = arith.constant 0 : index
    %8 = vector.load %arg3[%c0, %c0_4] : memref<8x512xi32, #tpu.memory_space<vmem>>, vector<1x512xi32>
    %c1 = arith.constant 1 : index
    %c0_5 = arith.constant 0 : index
    %9 = vector.load %arg3[%c1, %c0_5] : memref<8x512xi32, #tpu.memory_space<vmem>>, vector<1x512xi32>
    %c2 = arith.constant 2 : index
    %c0_6 = arith.constant 0 : index
    %10 = vector.load %arg3[%c2, %c0_6] : memref<8x512xi32, #tpu.memory_space<vmem>>, vector<1x512xi32>
    %11 = tpu.bitcast %10 : vector<1x512xi32> -> vector<1x512xf32>
    %12 = tpu.iota {dimensions = array<i32: 0>} : vector<200x512xi32>
    %13 = vector.broadcast %8 : vector<1x512xi32> to vector<200x512xi32>
    %14 = arith.cmpi eq, %12, %13 : vector<200x512xi32>
    %15 = arith.extui %14 : vector<200x512xi1> to vector<200x512xi32>
    %16 = arith.sitofp %15 : vector<200x512xi32> to vector<200x512xf32>
    %17 = vector.broadcast %9 : vector<1x512xi32> to vector<200x512xi32>
    %18 = arith.cmpi eq, %12, %17 : vector<200x512xi32>
    %cst = arith.constant 0.000000e+00 : f32
    %19 = vector.shape_cast %11 : vector<1x512xf32> to vector<1x512xf32>
    %20 = vector.broadcast %19 : vector<1x512xf32> to vector<200x512xf32>
    %21 = vector.broadcast %cst : f32 to vector<200x512xf32>
    %22 = arith.select %18, %20, %21 : vector<200x512xi1>, vector<200x512xf32>
    %c0_7 = arith.constant 0 : index
    %c0_8 = arith.constant 0 : index
    %23 = vector.load %arg7[%c0_7, %c0_8] : memref<200x128xf32, #tpu.memory_space<vmem>>, vector<200x128xf32>
    %cst_9 = arith.constant dense<0.000000e+00> : vector<512x128xf32>
    %24 = tpu.matmul %16, %23, %cst_9 {dimension_numbers = #tpu.dot_dimension_numbers<[0], [0], [1], [1], [0, 1, 1, 1], [], []>} : vector<200x512xf32>, vector<200x128xf32>, vector<512x128xf32> -> vector<512x128xf32>
    %c0_10 = arith.constant 0 : index
    %c0_11 = arith.constant 0 : index
    %25 = vector.load %arg8[%c0_10, %c0_11] : memref<200x128xf32, #tpu.memory_space<vmem>>, vector<200x128xf32>
    %cst_12 = arith.constant dense<0.000000e+00> : vector<200x128xf32>
    %26 = tpu.matmul %22, %24, %cst_12 {dimension_numbers = #tpu.dot_dimension_numbers<[1], [0], [0], [1], [0, 0, 1, 1], [], []>} : vector<200x512xf32>, vector<512x128xf32>, vector<200x128xf32> -> vector<200x128xf32>
    %27 = arith.addf %25, %26 : vector<200x128xf32>
    %c0_13 = arith.constant 0 : index
    %c0_14 = arith.constant 0 : index
    %28 = vector.load %arg8[%c0_13, %c0_14] : memref<200x128xf32, #tpu.memory_space<vmem>>, vector<200x128xf32>
    tpu.vector_store %arg8[%c0_13, %c0_14], %27 {strides = array<i32>} : memref<200x128xf32, #tpu.memory_space<vmem>>, vector<200x128xf32>,
    %c1_i32 = arith.constant 1 : i32
    %29 = arith.cmpi eq, %arg1, %c1_i32 : i32
    %30 = arith.extui %29 : i1 to i32
    %c0_i32_15 = arith.constant 0 : i32
    %31 = arith.cmpi ne, %30, %c0_i32_15 : i32
    scf.if %31 {
      %c0_16 = arith.constant 0 : index
      %c0_17 = arith.constant 0 : index
      %32 = vector.load %arg8[%c0_16, %c0_17] : memref<200x128xf32, #tpu.memory_space<vmem>>, vector<200x128xf32>
      %c0_18 = arith.constant 0 : index
      %c0_19 = arith.constant 0 : index
      %c0_20 = arith.constant 0 : index
      %33 = vector.load %arg4[%c0_18, %c0_19, %c0_20] : memref<1x128x128xf32, #tpu.memory_space<vmem>>, vector<1x128x128xf32>
      %34 = vector.shape_cast %33 : vector<1x128x128xf32> to vector<128x128xf32>
      %cst_21 = arith.constant dense<0.000000e+00> : vector<200x128xf32>
      %35 = tpu.matmul %32, %34, %cst_21 {dimension_numbers = #tpu.dot_dimension_numbers<[1], [0], [0], [1], [0, 0, 1, 1], [], []>} : vector<200x128xf32>, vector<128x128xf32>, vector<200x128xf32> -> vector<200x128xf32>
      %c0_22 = arith.constant 0 : index
      %c0_23 = arith.constant 0 : index
      %c0_24 = arith.constant 0 : index
      %36 = vector.load %arg5[%c0_22, %c0_23, %c0_24] : memref<1x1x128xf32, #tpu.memory_space<vmem>>, vector<1x1x128xf32>
      %37 = vector.shape_cast %36 : vector<1x1x128xf32> to vector<1x128xf32>
      %38 = vector.broadcast %37 : vector<1x128xf32> to vector<200x128xf32>
      %39 = arith.addf %35, %38 : vector<200x128xf32>
      %cst_25 = arith.constant 0.000000e+00 : f32
      %40 = vector.broadcast %cst_25 : f32 to vector<200x128xf32>
      %41 = arith.maximumf %39, %40 : vector<200x128xf32>
      %c0_26 = arith.constant 0 : index
      %c0_27 = arith.constant 0 : index
      %42 = vector.load %arg7[%c0_26, %c0_27] : memref<200x128xf32, #tpu.memory_space<vmem>>, vector<200x128xf32>
      tpu.vector_store %arg7[%c0_26, %c0_27], %41 {strides = array<i32>} : memref<200x128xf32, #tpu.memory_space<vmem>>, vector<200x128xf32>,
      %c0_28 = arith.constant 0 : index
      %c0_29 = arith.constant 0 : index
      %43 = vector.load %arg6[%c0_28, %c0_29] : memref<200x128xf32, #tpu.memory_space<vmem>>, vector<200x128xf32>
      tpu.vector_store %arg6[%c0_28, %c0_29], %41 {strides = array<i32>} : memref<200x128xf32, #tpu.memory_space<vmem>>, vector<200x128xf32>,
    } else {
    }
    return
  }
  func.func @transform_0(%arg0: i32, %arg1: i32) -> (i32, i32) {
    %c0_i32 = arith.constant 0 : i32
    %c0_i32_0 = arith.constant 0 : i32
    %c0_i32_1 = arith.constant 0 : i32
    return %c0_i32, %c0_i32_0 : i32, i32
  }
  func.func @transform_1(%arg0: i32, %arg1: i32) -> (i32, i32) {
    %c0_i32 = arith.constant 0 : i32
    %c0_i32_0 = arith.constant 0 : i32
    return %c0_i32, %arg1 : i32, i32
  }
  func.func @transform_2(%arg0: i32, %arg1: i32) -> (i32, i32, i32) {
    %c0_i32 = arith.constant 0 : i32
    %c0_i32_0 = arith.constant 0 : i32
    %c0_i32_1 = arith.constant 0 : i32
    return %arg0, %c0_i32, %c0_i32_0 : i32, i32, i32
  }
  func.func @transform_3(%arg0: i32, %arg1: i32) -> (i32, i32, i32) {
    %c0_i32 = arith.constant 0 : i32
    %c0_i32_0 = arith.constant 0 : i32
    %c0_i32_1 = arith.constant 0 : i32
    return %arg0, %c0_i32, %c0_i32_0 : i32, i32, i32
  }
  func.func @transform_4(%arg0: i32, %arg1: i32) -> (i32, i32) {
    %c0_i32 = arith.constant 0 : i32
    %c0_i32_0 = arith.constant 0 : i32
    %c0_i32_1 = arith.constant 0 : i32
    return %c0_i32, %c0_i32_0 : i32, i32
  }
}

</mosaic_0001>

<bundles_post_ra>
// kernel: tpu_custom_call.1
= control target key start
LH: loop header
LB: loop body
LE: loop exit
PB: predicated region body
PF: predicated region fallthrough
CT: control target
= control target key end

     0   :  { %s5059_s0 = inlined_call_operand.hbm [shape: f32[200,128], index: 0, kind: input, shape index: {}]   ;;  %s5060_s1 = inlined_call_operand.hbm [shape: s32[8,1024], index: 1, kind: input, shape index: {}]   ;;  %s5061_s2 = inlined_call_operand.hbm [shape: f32[2,128,128], index: 2, kind: input, shape index: {}]   ;;  %s5062_s3 = inlined_call_operand.vmem [shape: f32[2,1,128], index: 3, kind: input, shape index: {}]   ;;  %s5063_s4 = inlined_call_operand.hbm [shape: f32[200,128], index: 4, kind: output, shape index: {}]  }
   0x1   :  { %5075 = sst [smem:[#allocation23_spill]] %s5060_s1 }
   0x2   :  { %9 = vsyncpa [#allocation5], 0 }
   0x3   :  { %10 = vsyncpa [#allocation8], 0 }
   0x4   :  { %12 = vsyncpa [#allocation8 + $0x1], 0 }
   0x5   :  { %13 = vsyncpa [#allocation6], 0  ;;  %s3701_s15 = smov 0   ;;  %s3703_s16 = smov 0  }
   0x6   :  { %s3705_s17 = smov 0   ;;  %s3707_s18 = smov 0  }
   0x7   :  { %s3709_s19 = smov 0   ;;  %s3711_s20 = smov 0  }
   0x8   :  { %s3713_s21 = smov 0   ;;  %s3715_s22 = smov 0  }
   0x9   :  { %s3717_s23 = smov 0   ;;  %s3719_s24 = smov 0  }
   0xa   :  { %s3721_s25 = smov 0  }
   0xb LB: > { %5076 = sst [smem:[#allocation15_spill]] %s3628_s17  ;;  %s28_s26 = sadd.s32 1, %s3652_s23  ;;  %s3660_s25 = sphi %s3721_s25, %s19_s25   ;;  %s3656_s24 = sphi %s3719_s24, %s5107_s24   ;;  %s3652_s23 = sphi %s3717_s23, %s5106_s23   ;;  %s3648_s22 = sphi %s3715_s22, %s5105_s22   ;;  %s3644_s21 = sphi %s3713_s21, %s5104_s21   ;;  %s3640_s20 = sphi %s3711_s20, %s5103_s20   ;;  %s3636_s19 = sphi %s3709_s19, %s5111_s19   ;;  %s3632_s18 = sphi %s3707_s18, %s5110_s18   ;;  %s3628_s17 = sphi %s3705_s17, %s5101_s17   ;;  %s3624_s16 = sphi %s3703_s16, %s5109_s16   ;;  %s3620_s15 = sphi %s3701_s15, %s5108_s15  }
   0xc   : > { %5077 = sst [smem:[#allocation16_spill]] %s3640_s20  ;;  %s31_s27 = sadd.s32 1, %s3656_s24 }
   0xd   : > { %5078 = sst [smem:[#allocation17_spill]] %s3652_s23  ;;  %p29_p0 = scmp.ge.s32.totalorder %s28_s26, 2 }
   0xe   : > { %5079 = sst [smem:[#allocation18_spill]] %s3656_s24  ;;  %s59_s28 = sadd.s32 1, %s3640_s20 }
   0xf   : > { %p66_p1 = scmp.ne.s32.totalorder %s3640_s20, %s3636_s19  ;;  %p67_p2 = scmp.eq.s32.totalorder %s3660_s25, 0 }
  0x10   : > { %s5113_s26 = smov (%p29_p0, %s28_s26), 0  ;;  %s5115_s27 = smov (!%p29_p0, %s31_s27), %s3656_s24 }
  0x11   : > { %5080 = sst [smem:[#allocation19_spill]] %s5113_s26  ;;  %s56_s29 = ssub.s32 %s3652_s23, %s5113_s26 }
  0x12   : > { %p3769_p3 = por %p67_p2, %p66_p1  ;;  %p33_p4 = scmp.ge.s32.totalorder %s5115_s27, 2 }
  0x13   : > { %p57_p5 = scmp.eq.s32.totalorder %s56_s29, 0  ;;  %s85_s5 = sadd.s32 1, %s3628_s17 }
  0x14   : > { %s5117_s27 = smov (%p33_p4, %s5115_s27), 0  ;;  %p92_p7 = scmp.ne.s32.totalorder %s3628_s17, %s3624_s16 }
  0x15   : > { %5082 = sst [smem:[#allocation20_spill]] %s5117_s27  ;;  %s82_s7 = ssub.s32 %s3656_s24, %s5117_s27 }
  0x16   : > { %s3779_s6 = scalar_select %p57_p5, %s3640_s20, %s59_s28  }
  0x17   : > { %p83_p8 = scmp.eq.s32.totalorder %s82_s7, 0  ;;  %p94_p10 = por %p92_p7, %p67_p2 }
  0x18   : > { %5083 = sst [smem:[#allocation21_spill]] %s3779_s6  ;;  %p3340_p11 = scmp.lt.s32.totalorder %s3660_s25, 4 }
  0x19   : > { %s3790_s8 = scalar_select %p83_p8, %s3628_s17, %s85_s5  }
  0x1a   : > { %s182_s9 = sand.u32 1, %s3660_s25   ;;  %s184_s10 = sand.u32 1, %s3640_s20  }
  0x1b   : > { %5084 = sst [smem:[#allocation22_spill]] %s3790_s8  ;;  %s2711_s11 = sshll.u32 %s184_s10, 5 }
  0x1c   : > { %s2994_s12 = sshll.u32 %s3652_s23, 9  ;;  %s5085_s1 = sld [smem:[#allocation23_spill]] }
  0x1d   : > { %s186_s28 = scalar_lea.vmem [#allocation7], %s2711_s11  ;;  %p3803_p12 = pnand %p3340_p11, %p3769_p3 }
  0x1e   : > { %s194_s7 = sshll.u32 %s186_s28, 4  ;;  %p3809_p13 = pnand %p3340_p11, %p94_p10  ;;  %s3807_s7 = int_to_ptr.vmem [resolvable:$true] %s194_s7 }
  0x1f   : > { %p3446_p1 = pneg %p3803_p12 }
  0x20   : > { %s5087_s10 = scalar_select %p3809_p13, 1, 0 }
  0x22   : > { %s3799_s29 = scalar_lea.hbm %s5085_s1, %s2994_s12  ;;  %s3813_s12 = scalar_lea.sflag [#allocation8], %s182_s9 }
  0x23   : > { %s3444_s13 = scalar_lea.hbm %s3799_s29, 512  ;;  %s3449_s14 = scalar_lea.hbm %s5085_s1, 1024 }
  0x24   : > { %p3445_p0 = scmp.ne.s32.totalorder %s3799_s29, %s3444_s13  ;;  %p3450_p4 = scmp.lt.u32.totalorder %s3799_s29, %s5085_s1 }
  0x25   : > { %p3451_p5 = scmp.lt.u32.totalorder %s3449_s14, %s3444_s13  ;;  %p3453_p8 = scmp.lt.u32.totalorder %s3444_s13, %s3799_s29 }
  0x26   : > { %p3447_p2 = pnand %p3446_p1, %p3445_p0 }
  0x27   : > { %p3452_p7 = por %p3451_p5, %p3450_p4 }
  0x28   : > { %p3448_p3 = pneg %p3447_p2 }
  0x29   : > { %p3454_p10 = por %p3453_p8, %p3452_p7 }
  0x2b   : > { %p3455_p11 = pnand %p3454_p10, %p3448_p3 }
  0x2d   : > { %3458 = shalt.err (!%p3455_p11)
}
  0x2e   : > { %s3459_s9 = scalar_lea.vmem %s3807_s7, 512  ;;  %s3662_s30 = smov [#allocation7]  }
  0x2f   : > { %p3460_p0 = scmp.ne.s32.totalorder %s3807_s7, %s3459_s9  ;;  %s3464_s11 = sshll.u32 %s3662_s30, 4  ;;  %s3465_s11 = int_to_ptr.vmem [resolvable:$false] %s3464_s11 }
  0x30   : > { %s3466_s27 = scalar_lea.vmem %s3465_s11, 1024  ;;  %p3467_p6 = scmp.lt.s32.totalorder %s3807_s7, %s3465_s11 }
  0x31   : > { %p3462_p2 = pnand %p3460_p0, %p3446_p1  ;;  %p3468_p4 = scmp.lt.s32.totalorder %s3466_s27, %s3459_s9 }
  0x33   : > { %p3463_p9 = pneg %p3462_p2  ;;  %p3469_p5 = por %p3468_p4, %p3467_p6 }
  0x35   : > { %p3470_p7 = pnand %p3469_p5, %p3463_p9 }
  0x37   : > { %3473 = shalt.err (!%p3470_p7)
}
  0x38   : > { %3335 = dma.hbm_to_vmem [thread:$0]  (!%p3803_p12), %s3799_s29, 512, %s3807_s7, %s3813_s12  }
  0x39   : > { %s3842_s13 = sadd.s32 4294967295, %s3660_s25   ;;  %p2708_p6 = scmp.ge.s32.totalorder %s3660_s25, 1 }
  0x3a   : > { %p5070_p9 = scmp.eq.s32.totalorder %s3842_s13, 0  ;;  %p156_p1 = scmp.lt.s32.totalorder %s3660_s25, 5 }
  0x3b   : > { %p5088_p3 = scmp.ne.s32.totalorder %s3636_s19, %s3632_s18  ;;  %p5090_p10 = scmp.ne.s32.totalorder %s3624_s16, %s3620_s15 }
  0x3c   : > { %p3865_p12 = pnand %p2708_p6, %p156_p1  ;;  %s3663_s7 = smov [#allocation4]  }
  0x3d   : > { %p3852_p8 = por %p5070_p9, %p5088_p3  ;;  %p3861_p11 = por %p5090_p10, %p5070_p9 }
  0x3e   : > { %s5092_s29 = scalar_select %p3865_p12, 1, 0 }
  0x3f   : > { %s5089_s5 = scalar_select %p3852_p8, 1, 0 }
  0x40   : > { %s5091_s14 = scalar_select %p3861_p11, 1, 0 }
  0x41   : > { %s168_s28 = sshll.u32 %s3663_s7, 4  ;;  %p3328_p0 = pneg %p3865_p12  ;;  %s3869_s28 = int_to_ptr.vmem [resolvable:$true] %s168_s28 }
  0x42   : > { %s203_s18 = sand.u32 1, %s3628_s17   ;;  %s2995_s9 = sshll.u32 %s3656_s24, 11 }
  0x43   : > { %p3877_p2 = pnand %p3328_p0, %p5070_p9  ;;  %s2714_s30 = sshll.u32 %s203_s18, 7 }
  0x44   : > { %s3884_s1 = scalar_lea.hbm %s5061_s2, %s2995_s9  ;;  %s205_s26 = scalar_lea.vmem [#allocation9], %s2714_s30 }
  0x45   : > { %s212_s7 = sshll.u32 %s205_s26, 4  ;;  %s3474_s20 = scalar_lea.hbm %s5059_s0, 3200  ;;  %s3910_s7 = int_to_ptr.vmem [resolvable:$true] %s212_s7 }
  0x46   : > { %p3475_p4 = scmp.ne.s32.totalorder %s5059_s0, %s3474_s20  ;;  %p3476_p5 = pneg %p3877_p2 }
  0x47   : > { %p3481_p1 = scmp.lt.u32.totalorder %s3474_s20, %s5059_s0 }
  0x48   : > { %p3477_p7 = pnand %p3476_p5, %p3475_p4 }
  0x4a   : > { %p3478_p6 = pneg %p3477_p7 }
  0x4c   : > { %p3483_p3 = pnand %p3481_p1, %p3478_p6 }
  0x4e   : > { %3486 = shalt.err (!%p3483_p3)
}
  0x4f   : > { %s3487_s26 = scalar_lea.vmem %s3869_s28, 3200  ;;  %p3495_p11 = scmp.lt.s32.totalorder %s3869_s28, %s3869_s28 }
  0x50   : > { %p3488_p10 = scmp.ne.s32.totalorder %s3869_s28, %s3487_s26  ;;  %p3496_p8 = scmp.lt.s32.totalorder %s3487_s26, %s3487_s26 }
  0x52   : > { %p3490_p0 = pnand %p3488_p10, %p3476_p5  ;;  %p3497_p12 = por %p3496_p8, %p3495_p11 }
  0x54   : > { %p3491_p9 = pneg %p3490_p0 }
  0x56   : > { %p3498_p13 = pnand %p3497_p12, %p3491_p9 }
  0x58   : > { %3501 = shalt.err (!%p3498_p13)
}
  0x59   : > { %s3664_s23 = smov 128   ;;  %s3665_s17 = smov 8  }
  0x5a   : > { %3331 = dma.hbm_to_vmem [thread:$0]  (!%p3877_p2), %s5059_s0, 3200, %s3869_s28, [#allocation5], %s3664_s23, %s3664_s23, %s3665_s17  }
  0x5b   : > { %s3502_s6 = scalar_lea.hbm %s3884_s1, 2048  ;;  %p5094_p9 = scmp.ne.s32.totalorder %s5087_s10, 0 }
  0x5c   : > { %p3503_p13 = scmp.ne.s32.totalorder %s3884_s1, %s3502_s6  ;;  %s3507_s15 = scalar_lea.hbm %s5061_s2, 4096 }
  0x5d   : > { %p3504_p8 = pneg %p5094_p9  ;;  %p3508_p4 = scmp.lt.u32.totalorder %s3884_s1, %s5061_s2 }
  0x5e   : > { %p3509_p5 = scmp.lt.u32.totalorder %s3507_s15, %s3502_s6  ;;  %p3511_p7 = scmp.lt.u32.totalorder %s3502_s6, %s3884_s1 }
  0x5f   : > { %p3505_p11 = pnand %p3504_p8, %p3503_p13 }
  0x60   : > { %p3510_p2 = por %p3509_p5, %p3508_p4 }
  0x61   : > { %p3506_p12 = pneg %p3505_p11 }
  0x62   : > { %p3512_p6 = por %p3511_p7, %p3510_p2 }
  0x64   : > { %p3513_p1 = pnand %p3512_p6, %p3506_p12 }
  0x66   : > { %3516 = shalt.err (!%p3513_p1)
}
  0x67   : > { %s3517_s28 = scalar_lea.vmem %s3910_s7, 2048  ;;  %s3666_s27 = smov [#allocation9]  }
  0x68   : > { %p3518_p3 = scmp.ne.s32.totalorder %s3910_s7, %s3517_s28  ;;  %s3522_s18 = sshll.u32 %s3666_s27, 4  ;;  %s3523_s18 = int_to_ptr.vmem [resolvable:$false] %s3522_s18 }
  0x69   : > { %s3524_s26 = scalar_lea.vmem %s3523_s18, 4096  ;;  %p3525_p13 = scmp.lt.s32.totalorder %s3910_s7, %s3523_s18 }
  0x6a   : > { %p3520_p10 = pnand %p3518_p3, %p3504_p8  ;;  %p3526_p11 = scmp.lt.s32.totalorder %s3524_s26, %s3517_s28 }
  0x6c   : > { %p3521_p0 = pneg %p3520_p10  ;;  %p3527_p4 = por %p3526_p11, %p3525_p13 }
  0x6e   : > { %p3528_p5 = pnand %p3527_p4, %p3521_p0 }
  0x70   : > { %3531 = shalt.err (!%p3528_p5)
}
  0x71   : > { %3338 = dma.hbm_to_vmem [thread:$0]  (!%p5094_p9), %s3884_s1, 2048, %s3910_s7, %s3813_s12, %s3664_s23, %s3664_s23, %s3665_s17  }
  0x72   : > { %p5095_p8 = scmp.ne.s32.totalorder %s5092_s29, 0 }
  0x73   : > { %p5096_p12 = scmp.eq.s32.totalorder (!%p5095_p8), %s3842_s13, 0 }
  0x74   : > { %230 = sbr.rel (%p5095_p8) target bundleno = 1404 (0x57c), region = 36 }
  0x7b   : > { %3603 = dma.done.wait (%p5096_p12), [#allocation5], 3200   ;;  %p5097_p2 = pmov %p5096_p12 }
  0x7c   : > { %s236_s10 = sand.u32 1, %s3842_s13   ;;  %s238_s20 = sand.u32 1, %s3636_s19  }
  0x7d   : > { %3605 = vsyncadd (%p5097_p2), [#allocation5], 4294964096  ;;  %s2719_s24 = sshll.u32 %s238_s20, 5  ;;  %s237_s6 = scalar_lea.sflag [#allocation8], %s236_s10 }
  0x7e   : > { %s3949_s8 = scalar_lea.vmem [#allocation7], %s2719_s24  ;;  %p5098_p7 = scmp.ne.s32.totalorder %s5089_s5, 0 }
  0x80   : > { %3607 = dma.done.wait (%p5098_p7), %s237_s6, 512  }
  0x81   : > { %3609 = vsyncadd (%p5098_p7), %s237_s6, 4294966784  ;;  %s247_s1 = sand.u32 1, %s3624_s16   ;;  %p5099_p9 = scmp.ne.s32.totalorder %s5091_s14, 0 }
  0x82   : > { %s2720_s12 = sshll.u32 %s247_s1, 7 }
  0x83   : > { %s3956_s29 = scalar_lea.vmem [#allocation9], %s2720_s12 }
  0x84   : > { %3611 = dma.done.wait (%p5099_p9), %s237_s6, 2048  }
  0x85   : > { %3613 = vsyncadd (%p5099_p9), %s237_s6, 4294965248  ;;  %p278_p6 = scmp.lt.s32.totalorder %s3648_s22, 1  ;;  %p281_p1 = scmp.eq.s32.totalorder %s3648_s22, 0 }
  0x86   : > { %p282_p3 = scmp.eq.s32.totalorder %s3644_s21, 0 }
  0x87   : > { %s5119_s22 = smov (!%p278_p6, %s3648_s22), 1 }
  0x88   : > { %p283_p10 = pnand %p282_p3, %p281_p1  ;;  %s280_s23 = scalar_lea.vmem %s5062_s3, %s5119_s22 }
  0x89   : > { %v287_v0 = vld [vmem:[#allocation4] sm:$0xff] (!%p283_p10)  ;;  %v288_v1 = vld [vmem:[#allocation4 + $0x8] sm:$0xff] (!%p283_p10)  ;;  %v289_v2 = vld [vmem:[#allocation4 + $0x10] sm:$0xff] (!%p283_p10) }
  0x8a   : > { %286 = sbr.rel (%p283_p10) target bundleno = 151 (0x97), region = 52  ;;  %312 = vst [vmem:[#allocation2] sm:$0xff] (!%p283_p10), %v287_v0  ;;  %313 = vst [vmem:[#allocation2 + $0x8] sm:$0xff] (!%p283_p10), %v288_v1  ;;  %v290_v3 = vld [vmem:[#allocation4 + $0x18] sm:$0xff] (!%p283_p10)  ;;  %v291_v4 = vld [vmem:[#allocation4 + $0x20] sm:$0xff] (!%p283_p10) }
  0x8b   : > { %314 = vst [vmem:[#allocation2 + $0x10] sm:$0xff] (!%p283_p10), %v289_v2  ;;  %v292_v5 = vld [vmem:[#allocation4 + $0x28] sm:$0xff] (!%p283_p10)  ;;  %315 = vst [vmem:[#allocation2 + $0x18] sm:$0xff] (!%p283_p10), %v290_v3  ;;  %v293_v6 = vld [vmem:[#allocation4 + $0x30] sm:$0xff] (!%p283_p10) }
  0x8c   : > { %316 = vst [vmem:[#allocation2 + $0x20] sm:$0xff] (!%p283_p10), %v291_v4  ;;  %317 = vst [vmem:[#allocation2 + $0x28] sm:$0xff] (!%p283_p10), %v292_v5  ;;  %v294_v7 = vld [vmem:[#allocation4 + $0x38] sm:$0xff] (!%p283_p10)  ;;  %v295_v8 = vld [vmem:[#allocation4 + $0x40] sm:$0xff] (!%p283_p10) }
  0x8d   : > { %318 = vst [vmem:[#allocation2 + $0x30] sm:$0xff] (!%p283_p10), %v293_v6  ;;  %319 = vst [vmem:[#allocation2 + $0x38] sm:$0xff] (!%p283_p10), %v294_v7  ;;  %v296_v9 = vld [vmem:[#allocation4 + $0x48] sm:$0xff] (!%p283_p10)  ;;  %v297_v10 = vld [vmem:[#allocation4 + $0x50] sm:$0xff] (!%p283_p10) }
  0x8e   : > { %320 = vst [vmem:[#allocation2 + $0x40] sm:$0xff] (!%p283_p10), %v295_v8  ;;  %v298_v11 = vld [vmem:[#allocation4 + $0x58] sm:$0xff] (!%p283_p10)  ;;  %321 = vst [vmem:[#allocation2 + $0x48] sm:$0xff] (!%p283_p10), %v296_v9  ;;  %v299_v12 = vld [vmem:[#allocation4 + $0x60] sm:$0xff] (!%p283_p10) }
  0x8f   : > { %322 = vst [vmem:[#allocation2 + $0x50] sm:$0xff] (!%p283_p10), %v297_v10  ;;  %323 = vst [vmem:[#allocation2 + $0x58] sm:$0xff] (!%p283_p10), %v298_v11  ;;  %v300_v13 = vld [vmem:[#allocation4 + $0x68] sm:$0xff] (!%p283_p10)  ;;  %v301_v14 = vld [vmem:[#allocation4 + $0x70] sm:$0xff] (!%p283_p10) }
  0x90   : > { %324 = vst [vmem:[#allocation2 + $0x60] sm:$0xff] (!%p283_p10), %v299_v12  ;;  %325 = vst [vmem:[#allocation2 + $0x68] sm:$0xff] (!%p283_p10), %v300_v13  ;;  %v302_v15 = vld [vmem:[#allocation4 + $0x78] sm:$0xff] (!%p283_p10)  ;;  %v303_v16 = vld [vmem:[#allocation4 + $0x80] sm:$0xff] (!%p283_p10) }
  0x91   : > { %326 = vst [vmem:[#allocation2 + $0x70] sm:$0xff] %v301_v14  ;;  %v304_v17 = vld [vmem:[#allocation4 + $0x88] sm:$0xff]  ;;  %327 = vst [vmem:[#allocation2 + $0x78] sm:$0xff] %v302_v15  ;;  %v305_v18 = vld [vmem:[#allocation4 + $0x90] sm:$0xff] }
  0x92   : > { %328 = vst [vmem:[#allocation2 + $0x80] sm:$0xff] %v303_v16  ;;  %329 = vst [vmem:[#allocation2 + $0x88] sm:$0xff] %v304_v17  ;;  %v306_v19 = vld [vmem:[#allocation4 + $0x98] sm:$0xff]  ;;  %v307_v20 = vld [vmem:[#allocation4 + $0xa0] sm:$0xff] }
  0x93   : > { %330 = vst [vmem:[#allocation2 + $0x90] sm:$0xff] %v305_v18  ;;  %331 = vst [vmem:[#allocation2 + $0x98] sm:$0xff] %v306_v19  ;;  %v308_v21 = vld [vmem:[#allocation4 + $0xa8] sm:$0xff]  ;;  %v309_v22 = vld [vmem:[#allocation4 + $0xb0] sm:$0xff] }
  0x94   : > { %332 = vst [vmem:[#allocation2 + $0xa0] sm:$0xff] %v307_v20  ;;  %v310_v23 = vld [vmem:[#allocation4 + $0xb8] sm:$0xff]  ;;  %333 = vst [vmem:[#allocation2 + $0xa8] sm:$0xff] %v308_v21  ;;  %v311_v24 = vld [vmem:[#allocation4 + $0xc0] sm:$0xff] }
  0x95   : > { %334 = vst [vmem:[#allocation2 + $0xb0] sm:$0xff] %v309_v22  ;;  %335 = vst [vmem:[#allocation2 + $0xb8] sm:$0xff] %v310_v23 }
  0x96   : > { %336 = vst [vmem:[#allocation2 + $0xc0] sm:$0xff] %v311_v24 }
  0x97 PF: > { %p2721_p0 = scmp.ne.s32.totalorder %s3644_s21, 0 }
  0x98   : > { %v3667_v25 = vmov (!%p2721_p0), 0.0  }
  0x99   : > { %339 = sbr.rel (%p2721_p0) target bundleno = 166 (0xa6), region = 56  ;;  %340 = vst [vmem:[#allocation3] sm:$0xff] (!%p2721_p0), %v3667_v25  ;;  %341 = vst [vmem:[#allocation3 + $0x8] sm:$0xff] (!%p2721_p0), %v3667_v25 }
  0x9a   : > { %342 = vst [vmem:[#allocation3 + $0x10] sm:$0xff] (!%p2721_p0), %v3667_v25  ;;  %343 = vst [vmem:[#allocation3 + $0x18] sm:$0xff] (!%p2721_p0), %v3667_v25 }
  0x9b   : > { %344 = vst [vmem:[#allocation3 + $0x20] sm:$0xff] (!%p2721_p0), %v3667_v25  ;;  %345 = vst [vmem:[#allocation3 + $0x28] sm:$0xff] (!%p2721_p0), %v3667_v25 }
  0x9c   : > { %346 = vst [vmem:[#allocation3 + $0x30] sm:$0xff] (!%p2721_p0), %v3667_v25  ;;  %347 = vst [vmem:[#allocation3 + $0x38] sm:$0xff] (!%p2721_p0), %v3667_v25 }
  0x9d   : > { %348 = vst [vmem:[#allocation3 + $0x40] sm:$0xff] (!%p2721_p0), %v3667_v25  ;;  %349 = vst [vmem:[#allocation3 + $0x48] sm:$0xff] (!%p2721_p0), %v3667_v25 }
  0x9e   : > { %350 = vst [vmem:[#allocation3 + $0x50] sm:$0xff] (!%p2721_p0), %v3667_v25  ;;  %351 = vst [vmem:[#allocation3 + $0x58] sm:$0xff] (!%p2721_p0), %v3667_v25 }
  0x9f   : > { %352 = vst [vmem:[#allocation3 + $0x60] sm:$0xff] (!%p2721_p0), %v3667_v25  ;;  %353 = vst [vmem:[#allocation3 + $0x68] sm:$0xff] (!%p2721_p0), %v3667_v25 }
  0xa0   : > { %354 = vst [vmem:[#allocation3 + $0x70] sm:$0xff] %v3667_v25  ;;  %355 = vst [vmem:[#allocation3 + $0x78] sm:$0xff] %v3667_v25 }
  0xa1   : > { %356 = vst [vmem:[#allocation3 + $0x80] sm:$0xff] %v3667_v25  ;;  %357 = vst [vmem:[#allocation3 + $0x88] sm:$0xff] %v3667_v25 }
  0xa2   : > { %358 = vst [vmem:[#allocation3 + $0x90] sm:$0xff] %v3667_v25  ;;  %359 = vst [vmem:[#allocation3 + $0x98] sm:$0xff] %v3667_v25 }
  0xa3   : > { %360 = vst [vmem:[#allocation3 + $0xa0] sm:$0xff] %v3667_v25  ;;  %361 = vst [vmem:[#allocation3 + $0xa8] sm:$0xff] %v3667_v25 }
  0xa4   : > { %362 = vst [vmem:[#allocation3 + $0xb0] sm:$0xff] %v3667_v25  ;;  %363 = vst [vmem:[#allocation3 + $0xb8] sm:$0xff] %v3667_v25 }
  0xa5   : > { %364 = vst [vmem:[#allocation3 + $0xc0] sm:$0xff] %v3667_v25 }
  0xa6 PF: > { %v370_v26 = vlaneseq  ;;  %v964_v27 = vld [vmem:[#allocation2] sm:$0xff]  ;;  %v3668_v28 = vmov 0.0|0.0   ;;  %v965_v29 = vld [vmem:[#allocation2 + $0x8] sm:$0xff]  ;;  %v966_v30 = vld [vmem:[#allocation2 + $0x10] sm:$0xff]  ;;  %v3669_v46 = vmov 0.0   ;;  %p2988_p13 = scmp.ne.s32.totalorder %s3644_s21, 1 }
  0xa7   : > { %3144 = vmatprep.subr.bf16.mxu0 %v3668_v28  ;;  %v967_v31 = vld [vmem:[#allocation2 + $0x18] sm:$0xff]  ;;  %3180 = vmatprep.subr.bf16.mxu1 %v3668_v28  ;;  %v3145_v33 = vpack.c.bf16 %v965_v29, %v964_v27  ;;  %v968_v40 = vld [vmem:[#allocation2 + $0x20] sm:$0xff]  ;;  %v969_v41 = vld [vmem:[#allocation2 + $0x28] sm:$0xff] }
  0xa8   : > { %v3975_v32 = vshrl.u32 %v370_v26, 7  ;;  %v3978_v34 = vld [vmem:[%s3949_s8] ss:$8 sm:$0xf]  ;;  %v3148_v35 = vpack.c.bf16 %v967_v31, %v966_v30  ;;  %v3151_v45 = vpack.c.bf16 %v969_v41, %v968_v40 }
  0xa9   : > { %3146 = vmatpush1.bf16.msra.mxu0 %v3145_v33  ;;  %v970_v59 = vld [vmem:[#allocation2 + $0x30] sm:$0xff]  ;;  %v971_v60 = vld [vmem:[#allocation2 + $0x38] sm:$0xff]  ;;  %v972_v63 = vld [vmem:[#allocation2 + $0x40] sm:$0xff] }
  0xaa   : > { %v3981_v36 = vsub.s32 0, %v3975_v32  ;;  %v3984_v37 = vadd.s32 128, %v3975_v32  ;;  %v3987_v38 = vadd.s32 136, %v3975_v32  ;;  %v3990_v39 = vadd.s32 8, %v3975_v32  ;;  %3147 = vmatprep.subr.bf16.mxu0 %v3668_v28  ;;  %v973_v0 = vld [vmem:[#allocation2 + $0x48] sm:$0xff]  ;;  %v974_v7 = vld [vmem:[#allocation2 + $0x50] sm:$0xff] }
  0xab   : > { %v3998_v43 = vadd.s32 144, %v3975_v32  ;;  %v4001_v44 = vadd.s32 16, %v3975_v32  ;;  %v4021_v51 = vadd.s32 152, %v3975_v32  ;;  %v4024_v52 = vadd.s32 24, %v3975_v32  ;;  %v975_v8 = vld [vmem:[#allocation2 + $0x58] sm:$0xff]  ;;  %v976_v14 = vld [vmem:[#allocation2 + $0x60] sm:$0xff] }
  0xac   : > { %v3995_v42 = vrot.slane %v3978_v34, %v3981_v36  ;;  %v4034_v55 = vadd.s32 160, %v3975_v32  ;;  %v4037_v56 = vadd.s32 32, %v3975_v32  ;;  %v4046_v61 = vadd.s32 168, %v3975_v32  ;;  %v977_v15 = vld [vmem:[#allocation2 + $0x68] sm:$0xff]  ;;  %v978_v21 = vld [vmem:[#allocation2 + $0x70] sm:$0xff]  ;;  %v979_v22 = vld [vmem:[#allocation2 + $0x78] sm:$0xff] }
  0xad   : > { %3149 = vmatpush1.bf16.msra.mxu0 %v3148_v35  ;;  %v4049_v62 = vadd.s32 40, %v3975_v32  ;;  %v3154_v1 = vpack.c.bf16 %v971_v60, %v970_v59  ;;  %v4054_v4 = vadd.s32 176, %v3975_v32  ;;  %v4061_v5 = vadd.s32 48, %v3975_v32  ;;  %v980_v27 = vld [vmem:[#allocation2 + $0x80] sm:$0xff]  ;;  %v981_v29 = vld [vmem:[#allocation2 + $0x88] sm:$0xff]  ;;  %v982_v40 = vld [vmem:[#allocation2 + $0x90] sm:$0xff] }
  0xae   : > { %vm496_vm0 = vcmp.eq.s32.totalorder %v3984_v37, %v3995_v42  ;;  %vm432_vm1 = vcmp.eq.s32.totalorder %v3975_v32, %v3995_v42  ;;  %vm500_vm2 = vcmp.eq.s32.totalorder %v3987_v38, %v3995_v42  ;;  %vm436_vm3 = vcmp.eq.s32.totalorder %v3990_v39, %v3995_v42  ;;  %3150 = vmatprep.subr.bf16.mxu0 %v3668_v28  ;;  %v983_v41 = vld [vmem:[#allocation2 + $0x98] sm:$0xff] }
  0xaf   : > { %v2788_v47 = vsel %vm496_vm0, 1.0, %v3669_v46  ;;  %v2724_v48 = vsel %vm432_vm1, 1.0, %v3669_v46  ;;  %v2792_v49 = vsel %vm500_vm2, 1.0, %v3669_v46  ;;  %v2728_v50 = vsel %vm436_vm3, 1.0, %v3669_v46  ;;  %v987_v59 = vld [vmem:[#allocation2 + $0xb8] sm:$0xff] }
  0xb0   : > { %1117 = vxpose.xlu0.b32.start [1/9] (short) %v2788_v47, 128  ;;  %989 = vxpose.xlu1.b32.start [1/16] %v2724_v48, 128  ;;  %vm504_vm4 = vcmp.eq.s32.totalorder %v3998_v43, %v3995_v42  ;;  %vm440_vm5 = vcmp.eq.s32.totalorder %v4001_v44, %v3995_v42  ;;  %vm508_vm6 = vcmp.eq.s32.totalorder %v4021_v51, %v3995_v42  ;;  %v4067_v11 = vadd.s32 184, %v3975_v32 }
  0xb1   : > { %3152 = vmatpush1.bf16.msra.mxu0 %v3151_v45  ;;  %v2796_v53 = vsel %vm504_vm4, 1.0, %v3669_v46  ;;  %v2732_v54 = vsel %vm440_vm5, 1.0, %v3669_v46  ;;  %vm444_vm7 = vcmp.eq.s32.totalorder %v4024_v52, %v3995_v42  ;;  %v2800_v57 = vsel %vm508_vm6, 1.0, %v3669_v46 }
  0xb2   : > { %3153 = vmatprep.subr.bf16.mxu0 %v3668_v28  ;;  %v2736_v58 = vsel %vm444_vm7, 1.0, %v3669_v46  ;;  %vm512_vm8 = vcmp.eq.s32.totalorder %v4034_v55, %v3995_v42  ;;  %vm448_vm9 = vcmp.eq.s32.totalorder %v4037_v56, %v3995_v42  ;;  %vm516_vm10 = vcmp.eq.s32.totalorder %v4046_v61, %v3995_v42 }
  0xb3   : > { %v2804_v2 = vsel %vm512_vm8, 1.0, %v3669_v46  ;;  %v2740_v3 = vsel %vm448_vm9, 1.0, %v3669_v46  ;;  %vm452_vm11 = vcmp.eq.s32.totalorder %v4049_v62, %v3995_v42  ;;  %v3157_v6 = vpack.c.bf16 %v973_v0, %v972_v63 }
  0xb4   : > { %1118 = vxpose.xlu0.b32.cont [2/9] (short) %v2792_v49, 128  ;;  %990 = vxpose.xlu1.b32.cont [2/16] %v2728_v50, 128  ;;  %v2808_v9 = vsel %vm516_vm10, 1.0, %v3669_v46  ;;  %v2744_v10 = vsel %vm452_vm11, 1.0, %v3669_v46  ;;  %vm520_vm12 = vcmp.eq.s32.totalorder %v4054_v4, %v3995_v42  ;;  %vm456_vm13 = vcmp.eq.s32.totalorder %v4061_v5, %v3995_v42  ;;  %v984_v49 = vld [vmem:[#allocation2 + $0xa0] sm:$0xff]  ;;  %v985_v50 = vld [vmem:[#allocation2 + $0xa8] sm:$0xff] }
  0xb5   : > { %3155 = vmatpush1.bf16.msra.mxu0 %v3154_v1  ;;  %v4074_v12 = vadd.s32 56, %v3975_v32  ;;  %v3160_v13 = vpack.c.bf16 %v975_v8, %v974_v7  ;;  %v2812_v16 = vsel %vm520_vm12, 1.0, %v3669_v46  ;;  %v2748_v17 = vsel %vm456_vm13, 1.0, %v3669_v46 }
  0xb6   : > { %3156 = vmatprep.subr.bf16.mxu0 %v3668_v28  ;;  %vm524_vm14 = vcmp.eq.s32.totalorder %v4067_v11, %v3995_v42  ;;  %v4084_v18 = vadd.s32 192, %v3975_v32  ;;  %v4087_v19 = vadd.s32 64, %v3975_v32  ;;  %v3163_v20 = vpack.c.bf16 %v977_v15, %v976_v14 }
  0xb7   : > { %vm460_vm15 = vcmp.eq.s32.totalorder %v4074_v12, %v3995_v42  ;;  %v2816_v23 = vsel %vm524_vm14, 1.0, %v3669_v46  ;;  %v4097_v25 = vadd.s32 72, %v3975_v32  ;;  %v3166_v26 = vpack.c.bf16 %v979_v22, %v978_v21 }
  0xb8   : > { %1119 = vxpose.xlu0.b32.cont [3/9] (short) %v2796_v53, 128  ;;  %991 = vxpose.xlu1.b32.cont [3/16] %v2732_v54, 128  ;;  %v2752_v24 = vsel %vm460_vm15, 1.0, %v3669_v46  ;;  %vm528_vm0 = vcmp.eq.s32.totalorder %v4084_v18, %v3995_v42  ;;  %vm464_vm1 = vcmp.eq.s32.totalorder %v4087_v19, %v3995_v42  ;;  %v4105_v33 = vadd.s32 80, %v3975_v32 }
  0xb9   : > { %3158 = vmatpush1.bf16.msra.mxu0 %v3157_v6  ;;  %v2820_v30 = vsel %vm528_vm0, 1.0, %v3669_v46  ;;  %v2756_v31 = vsel %vm464_vm1, 1.0, %v3669_v46  ;;  %vm468_vm2 = vcmp.eq.s32.totalorder %v4097_v25, %v3995_v42  ;;  %v3169_v35 = vpack.c.bf16 %v981_v29, %v980_v27  ;;  %v988_v6 = vld [vmem:[#allocation2 + $0xc0] sm:$0xff] }
  0xba   : > { %3159 = vmatprep.subr.bf16.mxu0 %v3668_v28  ;;  %v2760_v45 = vsel %vm468_vm2, 1.0, %v3669_v46  ;;  %vm472_vm3 = vcmp.eq.s32.totalorder %v4105_v33, %v3995_v42  ;;  %v4112_v47 = vadd.s32 88, %v3975_v32  ;;  %v3172_v48 = vpack.c.bf16 %v983_v41, %v982_v40 }
  0xbb   : > { %v2764_v53 = vsel %vm472_vm3, 1.0, %v3669_v46  ;;  %v4119_v54 = vadd.s32 96, %v3975_v32  ;;  %v4126_v63 = vadd.s32 104, %v3975_v32  ;;  %v4143_v8 = vadd.s32 120, %v3975_v32 }
  0xbc   : > { %1120 = vxpose.xlu0.b32.cont [4/9] (short) %v2800_v57, 128  ;;  %992 = vxpose.xlu1.b32.cont [4/16] %v2736_v58, 128  ;;  %vm476_vm4 = vcmp.eq.s32.totalorder %v4112_v47, %v3995_v42  ;;  %v3175_v57 = vpack.c.bf16 %v985_v50, %v984_v49  ;;  %v986_v58 = vld [vmem:[#allocation2 + $0xb0] sm:$0xff]  ;;  %v4219_v50 = vsub.s32 2, %v3975_v32 }
  0xbd   : > { %3161 = vmatpush1.bf16.msra.mxu0 %v3160_v13  ;;  %v2768_v60 = vsel %vm476_vm4, 1.0, %v3669_v46  ;;  %vm480_vm5 = vcmp.eq.s32.totalorder %v4119_v54, %v3995_v42  ;;  %v3178_v0 = vpack.c.bf16 %v987_v59, %v986_v58  ;;  %vm484_vm6 = vcmp.eq.s32.totalorder %v4126_v63, %v3995_v42 }
  0xbe   : > { %3162 = vmatprep.subr.bf16.mxu0 %v3668_v28  ;;  %v2772_v1 = vsel %vm480_vm5, 1.0, %v3669_v46  ;;  %v2776_v7 = vsel %vm484_vm6, 1.0, %v3669_v46  ;;  %vm492_vm8 = vcmp.eq.s32.totalorder %v4143_v8, %v3995_v42 }
  0xbf   : > { %v2784_v13 = vsel %vm492_vm8, 1.0, %v3669_v46 }
  0xc0   : > { %1121 = vxpose.xlu0.b32.cont [5/9] (short) %v2804_v2, 128  ;;  %993 = vxpose.xlu1.b32.cont [5/16] %v2740_v3, 128  ;;  %v4133_v2 = vadd.s32 112, %v3975_v32  ;;  %v4136_v3 = vsub.s32 1, %v3975_v32 }
  0xc1   : > { %3164 = vmatpush1.bf16.msra.mxu0 %v3163_v20 }
  0xc2   : > { %3165 = vmatprep.subr.bf16.mxu0 %v3668_v28  ;;  %vm488_vm7 = vcmp.eq.s32.totalorder %v4133_v2, %v3995_v42 }
  0xc4   : > { %1122 = vxpose.xlu0.b32.cont [6/9] (short) %v2808_v9, 128  ;;  %994 = vxpose.xlu1.b32.cont [6/16] %v2744_v10, 128  ;;  %v4147_v9 = vrot.slane %v3978_v34, %v4136_v3  ;;  %v2780_v10 = vsel %vm488_vm7, 1.0, %v3669_v46 }
  0xc5   : > { %3167 = vmatpush1.bf16.msra.mxu0 %v3166_v26 }
  0xc6   : > { %3168 = vmatprep.subr.bf16.mxu0 %v3668_v28  ;;  %vm497_vm9 = vcmp.eq.s32.totalorder %v3984_v37, %v4147_v9  ;;  %vm433_vm10 = vcmp.eq.s32.totalorder %v3975_v32, %v4147_v9  ;;  %vm501_vm11 = vcmp.eq.s32.totalorder %v3987_v38, %v4147_v9  ;;  %vm437_vm12 = vcmp.eq.s32.totalorder %v3990_v39, %v4147_v9 }
  0xc7   : > { %v2789_v14 = vsel %vm497_vm9, 1.0, %v3669_v46  ;;  %v2725_v15 = vsel %vm433_vm10, 1.0, %v3669_v46  ;;  %v2793_v42 = vsel %vm501_vm11, 1.0, %v3669_v46  ;;  %vm505_vm13 = vcmp.eq.s32.totalorder %v3998_v43, %v4147_v9 }
  0xc8   : > { %1123 = vxpose.xlu0.b32.cont [7/9] (short) %v2812_v16, 128  ;;  %995 = vxpose.xlu1.b32.cont [7/16] %v2748_v17, 128  ;;  %v2729_v16 = vsel %vm437_vm12, 1.0, %v3669_v46  ;;  %v2797_v17 = vsel %vm505_vm13, 1.0, %v3669_v46  ;;  %vm441_vm14 = vcmp.eq.s32.totalorder %v4001_v44, %v4147_v9  ;;  %vm509_vm15 = vcmp.eq.s32.totalorder %v4021_v51, %v4147_v9 }
  0xc9   : > { %3170 = vmatpush1.bf16.msra.mxu0 %v3169_v35  ;;  %v2733_v20 = vsel %vm441_vm14, 1.0, %v3669_v46  ;;  %v2801_v21 = vsel %vm509_vm15, 1.0, %v3669_v46  ;;  %vm445_vm0 = vcmp.eq.s32.totalorder %v4024_v52, %v4147_v9  ;;  %vm513_vm1 = vcmp.eq.s32.totalorder %v4034_v55, %v4147_v9 }
  0xca   : > { %3171 = vmatprep.subr.bf16.mxu0 %v3668_v28  ;;  %v2737_v22 = vsel %vm445_vm0, 1.0, %v3669_v46  ;;  %vm449_vm2 = vcmp.eq.s32.totalorder %v4037_v56, %v4147_v9  ;;  %vm517_vm3 = vcmp.eq.s32.totalorder %v4046_v61, %v4147_v9  ;;  %vm453_vm4 = vcmp.eq.s32.totalorder %v4049_v62, %v4147_v9 }
  0xcb   : > { %v2809_v26 = vsel %vm517_vm3, 1.0, %v3669_v46  ;;  %vm521_vm5 = vcmp.eq.s32.totalorder %v4054_v4, %v4147_v9  ;;  %v2745_v27 = vsel %vm453_vm4, 1.0, %v3669_v46  ;;  %vm457_vm6 = vcmp.eq.s32.totalorder %v4061_v5, %v4147_v9 }
  0xcc   : > { %1124 = vxpose.xlu0.b32.cont [8/9] (short) %v2816_v23, 128  ;;  %996 = vxpose.xlu1.b32.cont [8/16] %v2752_v24, 128  ;;  %v2805_v23 = vsel %vm513_vm1, 1.0, %v3669_v46  ;;  %v2741_v24 = vsel %vm449_vm2, 1.0, %v3669_v46  ;;  %v2813_v29 = vsel %vm521_vm5, 1.0, %v3669_v46  ;;  %vm525_vm7 = vcmp.eq.s32.totalorder %v4067_v11, %v4147_v9 }
  0xcd   : > { %3173 = vmatpush1.bf16.msra.mxu0 %v3172_v48  ;;  %vm461_vm8 = vcmp.eq.s32.totalorder %v4074_v12, %v4147_v9  ;;  %vm529_vm9 = vcmp.eq.s32.totalorder %v4084_v18, %v4147_v9  ;;  %vm465_vm10 = vcmp.eq.s32.totalorder %v4087_v19, %v4147_v9  ;;  %vm469_vm11 = vcmp.eq.s32.totalorder %v4097_v25, %v4147_v9 }
  0xce   : > { %3174 = vmatprep.subr.bf16.mxu0 %v3668_v28  ;;  %v2753_v35 = vsel %vm461_vm8, 1.0, %v3669_v46  ;;  %v2821_v40 = vsel %vm529_vm9, 1.0, %v3669_v46  ;;  %v2757_v41 = vsel %vm465_vm10, 1.0, %v3669_v46  ;;  %vm473_vm12 = vcmp.eq.s32.totalorder %v4105_v33, %v4147_v9 }
  0xcf   : > { %v2765_v48 = vsel %vm473_vm12, 1.0, %v3669_v46  ;;  %vm477_vm13 = vcmp.eq.s32.totalorder %v4112_v47, %v4147_v9  ;;  %vm481_vm14 = vcmp.eq.s32.totalorder %v4119_v54, %v4147_v9  ;;  %vm485_vm15 = vcmp.eq.s32.totalorder %v4126_v63, %v4147_v9 }
  0xd0   : > { %1125 = vxpose.xlu0.b32.end [9/9] (short) %v2820_v30, 128  ;;  %997 = vxpose.xlu1.b32.cont [9/16] %v2756_v31, 128  ;;  %v2749_v30 = vsel %vm457_vm6, 1.0, %v3669_v46  ;;  %v2817_v31 = vsel %vm525_vm7, 1.0, %v3669_v46  ;;  %v2769_v49 = vsel %vm477_vm13, 1.0, %v3669_v46  ;;  %v2777_v58 = vsel %vm485_vm15, 1.0, %v3669_v46 }
  0xd1   : > { %3176 = vmatpush1.bf16.msra.mxu0 %v3175_v57  ;;  %v4226_v57 = vrot.slane %v3978_v34, %v4219_v50  ;;  %vm489_vm0 = vcmp.eq.s32.totalorder %v4133_v2, %v4147_v9  ;;  %vm493_vm2 = vcmp.eq.s32.totalorder %v4143_v8, %v4147_v9  ;;  %vm1245_vm6 = vcmask 588800  }
  0xd2   : > { %3177 = vmatprep.subr.bf16.mxu0 %v3668_v28  ;;  %v2781_v59 = vsel %vm489_vm0, 1.0, %v3669_v46 }
  0xd3   : > { %vm498_vm1 = vcmp.eq.s32.totalorder %v3984_v37, %v4226_v57  ;;  %vm502_vm3 = vcmp.eq.s32.totalorder %v3987_v38, %v4226_v57  ;;  %vm434_vm4 = vcmp.eq.s32.totalorder %v3975_v32, %v4226_v57  ;;  %vm506_vm5 = vcmp.eq.s32.totalorder %v3998_v43, %v4226_v57 }
  0xd4   : > { %998 = vxpose.xlu1.b32.cont [10/16] %v2760_v45, 128  ;;  %v2761_v45 = vsel %vm469_vm11, 1.0, %v3669_v46  ;;  %vm438_vm7 = vcmp.eq.s32.totalorder %v3990_v39, %v4226_v57  ;;  %vm510_vm8 = vcmp.eq.s32.totalorder %v4021_v51, %v4226_v57  ;;  %vm442_vm9 = vcmp.eq.s32.totalorder %v4001_v44, %v4226_v57 }
  0xd5   : > { %3179 = vmatpush1.bf16.msra.mxu0 %v3178_v0  ;;  %v2785_v0 = vsel %vm493_vm2, 1.0, %v3669_v46  ;;  %vm514_vm10 = vcmp.eq.s32.totalorder %v4034_v55, %v4226_v57  ;;  %vm446_vm11 = vcmp.eq.s32.totalorder %v4024_v52, %v4226_v57  ;;  %vm518_vm12 = vcmp.eq.s32.totalorder %v4046_v61, %v4226_v57 }
  0xd6   : > { %1486 = vmatprep.subr.mxu0 %v3669_v46  ;;  %vm450_vm13 = vcmp.eq.s32.totalorder %v4037_v56, %v4226_v57  ;;  %vm454_vm15 = vcmp.eq.s32.totalorder %v4049_v62, %v4226_v57  ;;  %vm526_vm0 = vcmp.eq.s32.totalorder %v4067_v11, %v4226_v57  ;;  %vm530_vm2 = vcmp.eq.s32.totalorder %v4084_v18, %v4226_v57 }
  0xd8   : > { %999 = vxpose.xlu1.b32.cont [11/16] %v2764_v53, 128  ;;  %v2773_v53 = vsel %vm481_vm14, 1.0, %v3669_v46  ;;  %vm522_vm14 = vcmp.eq.s32.totalorder %v4054_v4, %v4226_v57 }
  0xd9   : > { %1487 = vmatpush1.msra.mxu0 %v988_v6  ;;  %v2726_v6 = vsel %vm434_vm4, 1.0, %v3669_v46  ;;  %vm466_vm4 = vcmp.eq.s32.totalorder %v4087_v19, %v4226_v57 }
  0xdc   : > { %1000 = vxpose.xlu1.b32.cont [12/16] %v2768_v60, 128  ;;  %v2790_v60 = vsel %vm498_vm1, 1.0, %v3669_v46  ;;  %vm458_vm1 = vcmp.eq.s32.totalorder %v4061_v5, %v4226_v57 }
  0xe0   : > { %1001 = vxpose.xlu1.b32.cont [13/16] %v2772_v1, 128  ;;  %v2794_v1 = vsel %vm502_vm3, 1.0, %v3669_v46  ;;  %vm462_vm3 = vcmp.eq.s32.totalorder %v4074_v12, %v4226_v57 }
  0xe4   : > { %1002 = vxpose.xlu1.b32.cont [14/16] %v2776_v7, 128  ;;  %v2798_v7 = vsel %vm506_vm5, 1.0, %v3669_v46  ;;  %vm470_vm5 = vcmp.eq.s32.totalorder %v4097_v25, %v4226_v57 }
  0xe8   : > { %1003 = vxpose.xlu1.b32.cont [15/16] %v2780_v10, 128 }
  0xec   : > { %1004 = vxpose.xlu1.b32.end [16/16] %v2784_v13, 128  ;;  %v2730_v13 = vsel %vm438_vm7, 1.0, %v3669_v46  ;;  %vm474_vm7 = vcmp.eq.s32.totalorder %v4105_v33, %v4226_v57 }
  0xed   : > { %1149 = vxpose.xlu0.b32.start [1/9] (short) %v2789_v14, 128  ;;  %v2802_v14 = vsel %vm510_vm8, 1.0, %v3669_v46  ;;  %vm478_vm8 = vcmp.eq.s32.totalorder %v4112_v47, %v4226_v57 }
  0xf0   : > { %1021 = vxpose.xlu1.b32.start [1/16] %v2725_v15, 128 }
  0xf1   : > { %1150 = vxpose.xlu0.b32.cont [2/9] (short) %v2793_v42, 128 }
  0xf4   : > { %1022 = vxpose.xlu1.b32.cont [2/16] %v2729_v16, 128  ;;  %v2734_v16 = vsel %vm442_vm9, 1.0, %v3669_v46  ;;  %vm482_vm9 = vcmp.eq.s32.totalorder %v4119_v54, %v4226_v57 }
  0xf5   : > { %1151 = vxpose.xlu0.b32.cont [3/9] (short) %v2797_v17, 128  ;;  %v2806_v17 = vsel %vm514_vm10, 1.0, %v3669_v46  ;;  %vm486_vm10 = vcmp.eq.s32.totalorder %v4126_v63, %v4226_v57 }
  0xf8   : > { %1023 = vxpose.xlu1.b32.cont [3/16] %v2733_v20, 128 }
  0xf9   : > { %1152 = vxpose.xlu0.b32.cont [4/9] (short) %v2801_v21, 128 }
  0xfc   : > { %1024 = vxpose.xlu1.b32.cont [4/16] %v2737_v22, 128  ;;  %v2738_v22 = vsel %vm446_vm11, 1.0, %v3669_v46  ;;  %vm490_vm11 = vcmp.eq.s32.totalorder %v4133_v2, %v4226_v57 }
  0xfd   : > { %1153 = vxpose.xlu0.b32.cont [5/9] (short) %v2805_v23, 128  ;;  %v2810_v23 = vsel %vm518_vm12, 1.0, %v3669_v46 }
 0x100   : > { %1025 = vxpose.xlu1.b32.cont [5/16] %v2741_v24, 128 }
 0x101   : > { %1154 = vxpose.xlu0.b32.cont [6/9] (short) %v2809_v26, 128 }
 0x104   : > { %1026 = vxpose.xlu1.b32.cont [6/16] %v2745_v27, 128  ;;  %v2742_v27 = vsel %vm450_vm13, 1.0, %v3669_v46  ;;  %vm494_vm13 = vcmp.eq.s32.totalorder %v4143_v8, %v4226_v57 }
 0x105   : > { %1155 = vxpose.xlu0.b32.cont [7/9] (short) %v2813_v29, 128  ;;  %v2814_v29 = vsel %vm522_vm14, 1.0, %v3669_v46 }
 0x108   : > { %1027 = vxpose.xlu1.b32.cont [7/16] %v2749_v30, 128 }
 0x109   : > { %1156 = vxpose.xlu0.b32.cont [8/9] (short) %v2817_v31, 128 }
 0x10c   : > { %1028 = vxpose.xlu1.b32.cont [8/16] %v2753_v35, 128  ;;  %v2746_v35 = vsel %vm454_vm15, 1.0, %v3669_v46 }
 0x10d   : > { %1157 = vxpose.xlu0.b32.end [9/9] (short) %v2821_v40, 128  ;;  %v2818_v40 = vsel %vm526_vm0, 1.0, %v3669_v46 }
 0x110   : > { %1029 = vxpose.xlu1.b32.cont [9/16] %v2757_v41, 128 }
 0x114   : > { %1030 = vxpose.xlu1.b32.cont [10/16] %v2761_v45, 128 }
 0x118   : > { %1031 = vxpose.xlu1.b32.cont [11/16] %v2765_v48, 128  ;;  %v2750_v48 = vsel %vm458_vm1, 1.0, %v3669_v46 }
 0x11c   : > { %1032 = vxpose.xlu1.b32.cont [12/16] %v2769_v49, 128  ;;  %v2822_v49 = vsel %vm530_vm2, 1.0, %v3669_v46 }
 0x120   : > { %1033 = vxpose.xlu1.b32.cont [13/16] %v2773_v53, 128 }
 0x124   : > { %1034 = vxpose.xlu1.b32.cont [14/16] %v2777_v58, 128 }
 0x128   : > { %1035 = vxpose.xlu1.b32.cont [15/16] %v2781_v59, 128  ;;  %v2754_v59 = vsel %vm462_vm3, 1.0, %v3669_v46 }
 0x12a   : > { %1181 = vxpose.xlu0.b32.start [1/9] (short) %v2790_v60, 128 }
 0x12c   : > { %1036 = vxpose.xlu1.b32.end [16/16] %v2785_v0, 128 }
 0x12e   : > { %1182 = vxpose.xlu0.b32.cont [2/9] (short) %v2794_v1, 128  ;;  %v2758_v1 = vsel %vm466_vm4, 1.0, %v3669_v46 }
 0x130   : > { %v1133_v9 = vpop.trf.xlu0  ;;  %1053 = vxpose.xlu1.b32.start [1/16] %v2726_v6, 128  ;;  %v1005_v10 = vpop.trf.xlu1 }
 0x131   : > { %2824 = vmatprep.mubr.msk.f32.mxu0 %vm1245_vm6, %v1133_v9  ;;  %v2762_v9 = vsel %vm470_vm5, 1.0, %v3669_v46 }
 0x132   : > { %1503 = vmatmul.mubr.f32.vlgmr.msra.gmra.mrb[0].mxu0 %v1005_v10  ;;  %1183 = vxpose.xlu0.b32.cont [3/9] (short) %v2798_v7, 128 }
 0x134   : > { %v1134_v15 = vpop.trf.xlu0  ;;  %1054 = vxpose.xlu1.b32.cont [2/16] %v2730_v13, 128  ;;  %v1006_v42 = vpop.trf.xlu1 }
 0x135   : > { %2825 = vmatprep.mubr.msk.f32.mxu0 %vm1245_vm6, %v1134_v15 }
 0x136   : > { %1508 = vmatmul.mubr.f32.gmra.mrb[2].mxu0 %v1006_v42  ;;  %1184 = vxpose.xlu0.b32.cont [4/9] (short) %v2802_v14, 128  ;;  %v2766_v14 = vsel %vm474_vm7, 1.0, %v3669_v46 }
 0x138   : > { %v1135_v20 = vpop.trf.xlu0  ;;  %1055 = vxpose.xlu1.b32.cont [3/16] %v2734_v16, 128  ;;  %v1007_v21 = vpop.trf.xlu1  ;;  %v2770_v16 = vsel %vm478_vm8, 1.0, %v3669_v46 }
 0x139   : > { %2826 = vmatprep.mubr.msk.f32.mxu0 %vm1245_vm6, %v1135_v20 }
 0x13a   : > { %1513 = vmatmul.mubr.f32.gmra.mrb[4].mxu0 %v1007_v21  ;;  %1185 = vxpose.xlu0.b32.cont [5/9] (short) %v2806_v17, 128  ;;  %v4312_v17 = vsub.s32 3, %v3975_v32 }
 0x13c   : > { %v1136_v24 = vpop.trf.xlu0  ;;  %1056 = vxpose.xlu1.b32.cont [4/16] %v2738_v22, 128  ;;  %v1008_v26 = vpop.trf.xlu1  ;;  %v2774_v22 = vsel %vm482_vm9, 1.0, %v3669_v46 }
 0x13d   : > { %2827 = vmatprep.mubr.msk.f32.mxu0 %vm1245_vm6, %v1136_v24 }
 0x13e   : > { %1518 = vmatmul.mubr.f32.gmra.mrb[6].mxu0 %v1008_v26  ;;  %1186 = vxpose.xlu0.b32.cont [6/9] (short) %v2810_v23, 128  ;;  %v4320_v23 = vrot.slane %v3978_v34, %v4312_v17  ;;  %v2782_v34 = vsel %vm490_vm11, 1.0, %v3669_v46 }
 0x140   : > { %v1137_v30 = vpop.trf.xlu0  ;;  %1057 = vxpose.xlu1.b32.cont [5/16] %v2742_v27, 128  ;;  %v1009_v31 = vpop.trf.xlu1  ;;  %v2778_v27 = vsel %vm486_vm10, 1.0, %v3669_v46  ;;  %vm499_vm12 = vcmp.eq.s32.totalorder %v3984_v37, %v4320_v23  ;;  %vm503_vm14 = vcmp.eq.s32.totalorder %v3987_v38, %v4320_v23  ;;  %vm435_vm15 = vcmp.eq.s32.totalorder %v3975_v32, %v4320_v23 }
 0x141   : > { %2828 = vmatprep.mubr.msk.f32.mxu0 %vm1245_vm6, %v1137_v30  ;;  %vm507_vm0 = vcmp.eq.s32.totalorder %v3998_v43, %v4320_v23  ;;  %vm439_vm1 = vcmp.eq.s32.totalorder %v3990_v39, %v4320_v23  ;;  %vm511_vm2 = vcmp.eq.s32.totalorder %v4021_v51, %v4320_v23  ;;  %vm443_vm3 = vcmp.eq.s32.totalorder %v4001_v44, %v4320_v23 }
 0x142   : > { %1523 = vmatmul.mubr.f32.gmra.mrb[8].mxu0 %v1009_v31  ;;  %1187 = vxpose.xlu0.b32.cont [7/9] (short) %v2814_v29, 128  ;;  %v2791_v31 = vsel %vm499_vm12, 1.0, %v3669_v46  ;;  %vm515_vm4 = vcmp.eq.s32.totalorder %v4034_v55, %v4320_v23  ;;  %vm447_vm5 = vcmp.eq.s32.totalorder %v4024_v52, %v4320_v23  ;;  %vm519_vm7 = vcmp.eq.s32.totalorder %v4046_v61, %v4320_v23 }
 0x143   : > { %vm451_vm8 = vcmp.eq.s32.totalorder %v4037_v56, %v4320_v23  ;;  %vm523_vm9 = vcmp.eq.s32.totalorder %v4054_v4, %v4320_v23  ;;  %vm455_vm10 = vcmp.eq.s32.totalorder %v4049_v62, %v4320_v23  ;;  %vm527_vm11 = vcmp.eq.s32.totalorder %v4067_v11, %v4320_v23 }
 0x144   : > { %v1138_v41 = vpop.trf.xlu0  ;;  %1058 = vxpose.xlu1.b32.cont [6/16] %v2746_v35, 128  ;;  %v1010_v45 = vpop.trf.xlu1  ;;  %vm459_vm12 = vcmp.eq.s32.totalorder %v4061_v5, %v4320_v23 }
 0x145   : > { %2829 = vmatprep.mubr.msk.f32.mxu0 %vm1245_vm6, %v1138_v41  ;;  %v2786_v41 = vsel %vm494_vm13, 1.0, %v3669_v46  ;;  %vm531_vm13 = vcmp.eq.s32.totalorder %v4084_v18, %v4320_v23 }
 0x146   : > { %1528 = vmatmul.mubr.f32.gmra.mrb[10].mxu0 %v1010_v45  ;;  %1188 = vxpose.xlu0.b32.cont [8/9] (short) %v2818_v40, 128  ;;  %v2795_v45 = vsel %vm503_vm14, 1.0, %v3669_v46  ;;  %vm463_vm14 = vcmp.eq.s32.totalorder %v4074_v12, %v4320_v23 }
 0x148   : > { %v1139_v53 = vpop.trf.xlu0  ;;  %1059 = vxpose.xlu1.b32.cont [7/16] %v2750_v48, 128  ;;  %v1011_v58 = vpop.trf.xlu1 }
 0x149   : > { %2830 = vmatprep.mubr.msk.f32.mxu0 %vm1245_vm6, %v1139_v53  ;;  %v2799_v53 = vsel %vm507_vm0, 1.0, %v3669_v46  ;;  %vm471_vm0 = vcmp.eq.s32.totalorder %v4097_v25, %v4320_v23 }
 0x14a   : > { %1533 = vmatmul.mubr.f32.gmra.mrb[12].mxu0 %v1011_v58  ;;  %1189 = vxpose.xlu0.b32.end [9/9] (short) %v2822_v49, 128  ;;  %v2727_v49 = vsel %vm435_vm15, 1.0, %v3669_v46  ;;  %vm467_vm15 = vcmp.eq.s32.totalorder %v4087_v19, %v4320_v23 }
 0x14c   : > { %v1140_v60 = vpop.trf.xlu0  ;;  %1060 = vxpose.xlu1.b32.cont [8/16] %v2754_v59, 128  ;;  %v1012_v0 = vpop.trf.xlu1 }
 0x14d   : > { %2831 = vmatprep.mubr.msk.f32.mxu0 %vm1245_vm6, %v1140_v60  ;;  %v2731_v60 = vsel %vm439_vm1, 1.0, %v3669_v46  ;;  %vm475_vm1 = vcmp.eq.s32.totalorder %v4105_v33, %v4320_v23 }
 0x14e   : > { %1538 = vmatmul.mubr.f32.gmra.mrb[14].mxu0 %v1012_v0  ;;  %v2803_v0 = vsel %vm511_vm2, 1.0, %v3669_v46  ;;  %vm479_vm2 = vcmp.eq.s32.totalorder %v4112_v47, %v4320_v23 }
 0x150   : > { %v1141_v6 = vpop.trf.xlu0  ;;  %1061 = vxpose.xlu1.b32.cont [9/16] %v2758_v1, 128  ;;  %v1013_v7 = vpop.trf.xlu1 }
 0x151   : > { %2832 = vmatprep.mubr.msk.f32.mxu0 %vm1245_vm6, %v1141_v6 }
 0x152   : > { %1543 = vmatmul.mubr.f32.gmra.mrb[16].mxu0 %v1013_v7  ;;  %v2735_v7 = vsel %vm443_vm3, 1.0, %v3669_v46  ;;  %vm483_vm3 = vcmp.eq.s32.totalorder %v4119_v54, %v4320_v23 }
 0x154   : > { %v1142_v10 = vpop.trf.xlu0  ;;  %1062 = vxpose.xlu1.b32.cont [10/16] %v2762_v9, 128  ;;  %v1014_v13 = vpop.trf.xlu1  ;;  %v2807_v9 = vsel %vm515_vm4, 1.0, %v3669_v46  ;;  %vm487_vm4 = vcmp.eq.s32.totalorder %v4126_v63, %v4320_v23 }
 0x155   : > { %2833 = vmatprep.mubr.msk.f32.mxu0 %vm1245_vm6, %v1142_v10 }
 0x156   : > { %1548 = vmatmul.mubr.f32.gmra.mrb[18].mxu0 %v1014_v13 }
 0x158   : > { %v1143_v15 = vpop.trf.xlu0  ;;  %1063 = vxpose.xlu1.b32.cont [11/16] %v2766_v14, 128  ;;  %v1015_v42 = vpop.trf.xlu1  ;;  %v2739_v14 = vsel %vm447_vm5, 1.0, %v3669_v46  ;;  %vm491_vm5 = vcmp.eq.s32.totalorder %v4133_v2, %v4320_v23 }
 0x159   : > { %2834 = vmatprep.mubr.msk.f32.mxu0 %vm1245_vm6, %v1143_v15  ;;  %v2811_v15 = vsel %vm519_vm7, 1.0, %v3669_v46  ;;  %vm495_vm7 = vcmp.eq.s32.totalorder %v4143_v8, %v4320_v23 }
 0x15a   : > { %1553 = vmatmul.mubr.f32.gmra.mrb[20].mxu0 %v1015_v42 }
 0x15c   : > { %v1144_v20 = vpop.trf.xlu0  ;;  %1064 = vxpose.xlu1.b32.cont [12/16] %v2770_v16, 128  ;;  %v1016_v21 = vpop.trf.xlu1 }
 0x15d   : > { %2835 = vmatprep.mubr.msk.f32.mxu0 %vm1245_vm6, %v1144_v20  ;;  %v2743_v20 = vsel %vm451_vm8, 1.0, %v3669_v46 }
 0x15e   : > { %1558 = vmatmul.mubr.f32.gmra.mrb[22].mxu0 %v1016_v21  ;;  %v2815_v21 = vsel %vm523_vm9, 1.0, %v3669_v46 }
 0x160   : > { %v1145_v24 = vpop.trf.xlu0  ;;  %1065 = vxpose.xlu1.b32.cont [13/16] %v2774_v22, 128  ;;  %v1017_v26 = vpop.trf.xlu1 }
 0x161   : > { %2836 = vmatprep.mubr.msk.f32.mxu0 %vm1245_vm6, %v1145_v24 }
 0x162   : > { %1563 = vmatmul.mubr.f32.gmra.mrb[24].mxu0 %v1017_v26  ;;  %v2747_v26 = vsel %vm455_vm10, 1.0, %v3669_v46 }
 0x164   : > { %v1146_v29 = vpop.trf.xlu0  ;;  %1066 = vxpose.xlu1.b32.cont [14/16] %v2778_v27, 128  ;;  %v1018_v30 = vpop.trf.xlu1  ;;  %v2819_v27 = vsel %vm527_vm11, 1.0, %v3669_v46 }
 0x165   : > { %2837 = vmatprep.mubr.msk.f32.mxu0 %vm1245_vm6, %v1146_v29 }
 0x166   : > { %1568 = vmatmul.mubr.f32.gmra.mrb[26].mxu0 %v1018_v30 }
 0x168   : > { %v1147_v35 = vpop.trf.xlu0  ;;  %1067 = vxpose.xlu1.b32.cont [15/16] %v2782_v34, 128  ;;  %v1019_v40 = vpop.trf.xlu1  ;;  %1213 = vxpose.xlu0.b32.start [1/9] (short) %v2791_v31, 128  ;;  %v2751_v34 = vsel %vm459_vm12, 1.0, %v3669_v46  ;;  %v2823_v31 = vsel %vm531_vm13, 1.0, %v3669_v46 }
 0x169   : > { %2838 = vmatprep.mubr.msk.f32.mxu0 %vm1245_vm6, %v1147_v35 }
 0x16a   : > { %1573 = vmatmul.mubr.f32.gmra.mrb[28].mxu0 %v1019_v40 }
 0x16c   : > { %v1148_v57 = vpop.trf.xlu0  ;;  %1068 = vxpose.xlu1.b32.end [16/16] %v2786_v41, 128  ;;  %v1020_v48 = vpop.trf.xlu1  ;;  %1214 = vxpose.xlu0.b32.cont [2/9] (short) %v2795_v45, 128  ;;  %v2755_v41 = vsel %vm463_vm14, 1.0, %v3669_v46 }
 0x16d   : > { %2839 = vmatprep.mubr.msk.f32.mxu0 %vm1245_vm6, %v1148_v57 }
 0x16e   : > { %1578 = vmatmul.mubr.f32.gmra.mrb[30].mxu0 %v1020_v48  ;;  %v2759_v48 = vsel %vm467_vm15, 1.0, %v3669_v46 }
 0x170   : > { %v1165_v58 = vpop.trf.xlu0  ;;  %1085 = vxpose.xlu1.b32.start [1/16] %v2727_v49, 128  ;;  %v1037_v59 = vpop.trf.xlu1  ;;  %1215 = vxpose.xlu0.b32.cont [3/9] (short) %v2799_v53, 128 }
 0x171   : > { %2840 = vmatprep.mubr.msk.f32.mxu0 %vm1245_vm6, %v1165_v58  ;;  %v2763_v58 = vsel %vm471_vm0, 1.0, %v3669_v46 }
 0x172   : > { %1583 = vmatmul.mubr.f32.gmra.mrb[32].mxu0 %v1037_v59 }
 0x174   : > { %v1166_v1 = vpop.trf.xlu0  ;;  %1086 = vxpose.xlu1.b32.cont [2/16] %v2731_v60, 128  ;;  %v1038_v6 = vpop.trf.xlu1  ;;  %1216 = vxpose.xlu0.b32.cont [4/9] (short) %v2803_v0, 128  ;;  %v2767_v0 = vsel %vm475_vm1, 1.0, %v3669_v46 }
 0x175   : > { %2841 = vmatprep.mubr.msk.f32.mxu0 %vm1245_vm6, %v1166_v1 }
 0x176   : > { %1588 = vmatmul.mubr.f32.gmra.mrb[34].mxu0 %v1038_v6 }
 0x178   : > { %v1167_v10 = vpop.trf.xlu0  ;;  %1087 = vxpose.xlu1.b32.cont [3/16] %v2735_v7, 128  ;;  %v1039_v13 = vpop.trf.xlu1  ;;  %1217 = vxpose.xlu0.b32.cont [5/9] (short) %v2807_v9, 128  ;;  %v2771_v7 = vsel %vm479_vm2, 1.0, %v3669_v46 }
 0x179   : > { %2842 = vmatprep.mubr.msk.f32.mxu0 %vm1245_vm6, %v1167_v10 }
 0x17a   : > { %1593 = vmatmul.mubr.f32.gmra.mrb[36].mxu0 %v1039_v13  ;;  %v2775_v13 = vsel %vm483_vm3, 1.0, %v3669_v46 }
 0x17c   : > { %v1168_v42 = vpop.trf.xlu0  ;;  %1088 = vxpose.xlu1.b32.cont [4/16] %v2739_v14, 128  ;;  %v1040_v16 = vpop.trf.xlu1  ;;  %1218 = vxpose.xlu0.b32.cont [6/9] (short) %v2811_v15, 128 }
 0x17d   : > { %2843 = vmatprep.mubr.msk.f32.mxu0 %vm1245_vm6, %v1168_v42  ;;  %v2779_v42 = vsel %vm487_vm4, 1.0, %v3669_v46 }
 0x17e   : > { %1598 = vmatmul.mubr.f32.gmra.mrb[38].mxu0 %v1040_v16 }
 0x180   : > { %v1169_v22 = vpop.trf.xlu0  ;;  %1089 = vxpose.xlu1.b32.cont [5/16] %v2743_v20, 128  ;;  %v1041_v24 = vpop.trf.xlu1  ;;  %1219 = vxpose.xlu0.b32.cont [7/9] (short) %v2815_v21, 128  ;;  %v2783_v21 = vsel %vm491_vm5, 1.0, %v3669_v46 }
 0x181   : > { %2844 = vmatprep.mubr.msk.f32.mxu0 %vm1245_vm6, %v1169_v22 }
 0x182   : > { %1603 = vmatmul.mubr.f32.gmra.mrb[40].mxu0 %v1041_v24 }
 0x184   : > { %v1170_v29 = vpop.trf.xlu0  ;;  %1090 = vxpose.xlu1.b32.cont [6/16] %v2747_v26, 128  ;;  %v1042_v30 = vpop.trf.xlu1  ;;  %1220 = vxpose.xlu0.b32.cont [8/9] (short) %v2819_v27, 128  ;;  %v2787_v26 = vsel %vm495_vm7, 1.0, %v3669_v46 }
 0x185   : > { %2845 = vmatprep.mubr.msk.f32.mxu0 %vm1245_vm6, %v1170_v29 }
 0x186   : > { %1608 = vmatmul.mubr.f32.gmra.mrb[42].mxu0 %v1042_v30 }
 0x188   : > { %v1171_v35 = vpop.trf.xlu0  ;;  %1091 = vxpose.xlu1.b32.cont [7/16] %v2751_v34, 128  ;;  %v1043_v40 = vpop.trf.xlu1  ;;  %1221 = vxpose.xlu0.b32.end [9/9] (short) %v2823_v31, 128 }
 0x189   : > { %2846 = vmatprep.mubr.msk.f32.mxu0 %vm1245_vm6, %v1171_v35 }
 0x18a   : > { %1613 = vmatmul.mubr.f32.gmra.mrb[44].mxu0 %v1043_v40 }
 0x18c   : > { %v1172_v45 = vpop.trf.xlu0  ;;  %1092 = vxpose.xlu1.b32.cont [8/16] %v2755_v41, 128  ;;  %v1044_v57 = vpop.trf.xlu1 }
 0x18d   : > { %2847 = vmatprep.mubr.msk.f32.mxu0 %vm1245_vm6, %v1172_v45 }
 0x18e   : > { %1618 = vmatmul.mubr.f32.gmra.mrb[46].mxu0 %v1044_v57 }
 0x190   : > { %v1173_v49 = vpop.trf.xlu0  ;;  %1093 = vxpose.xlu1.b32.cont [9/16] %v2759_v48, 128  ;;  %v1045_v53 = vpop.trf.xlu1 }
 0x191   : > { %2848 = vmatprep.mubr.msk.f32.mxu0 %vm1245_vm6, %v1173_v49 }
 0x192   : > { %1623 = vmatmul.mubr.f32.gmra.mrb[48].mxu0 %v1045_v53 }
 0x194   : > { %v1174_v59 = vpop.trf.xlu0  ;;  %1094 = vxpose.xlu1.b32.cont [10/16] %v2763_v58, 128  ;;  %v1046_v60 = vpop.trf.xlu1 }
 0x195   : > { %2849 = vmatprep.mubr.msk.f32.mxu0 %vm1245_vm6, %v1174_v59 }
 0x196   : > { %1628 = vmatmul.mubr.f32.gmra.mrb[50].mxu0 %v1046_v60 }
 0x198   : > { %v1175_v1 = vpop.trf.xlu0  ;;  %1095 = vxpose.xlu1.b32.cont [11/16] %v2767_v0, 128  ;;  %v1047_v6 = vpop.trf.xlu1 }
 0x199   : > { %2850 = vmatprep.mubr.msk.f32.mxu0 %vm1245_vm6, %v1175_v1 }
 0x19a   : > { %1633 = vmatmul.mubr.f32.gmra.mrb[52].mxu0 %v1047_v6 }
 0x19c   : > { %v1176_v9 = vpop.trf.xlu0  ;;  %1096 = vxpose.xlu1.b32.cont [12/16] %v2771_v7, 128  ;;  %v1048_v10 = vpop.trf.xlu1 }
 0x19d   : > { %2851 = vmatprep.mubr.msk.f32.mxu0 %vm1245_vm6, %v1176_v9 }
 0x19e   : > { %1638 = vmatmul.mubr.f32.gmra.mrb[54].mxu0 %v1048_v10 }
 0x1a0   : > { %v1177_v14 = vpop.trf.xlu0  ;;  %1097 = vxpose.xlu1.b32.cont [13/16] %v2775_v13, 128  ;;  %v1049_v15 = vpop.trf.xlu1 }
 0x1a1   : > { %2852 = vmatprep.mubr.msk.f32.mxu0 %vm1245_vm6, %v1177_v14 }
 0x1a2   : > { %1643 = vmatmul.mubr.f32.gmra.mrb[56].mxu0 %v1049_v15 }
 0x1a4   : > { %v1178_v16 = vpop.trf.xlu0  ;;  %1098 = vxpose.xlu1.b32.cont [14/16] %v2779_v42, 128  ;;  %v1050_v20 = vpop.trf.xlu1 }
 0x1a5   : > { %2853 = vmatprep.mubr.msk.f32.mxu0 %vm1245_vm6, %v1178_v16 }
 0x1a6   : > { %1648 = vmatmul.mubr.f32.gmra.mrb[58].mxu0 %v1050_v20 }
 0x1a8   : > { %v1179_v22 = vpop.trf.xlu0  ;;  %1099 = vxpose.xlu1.b32.cont [15/16] %v2783_v21, 128  ;;  %v1051_v24 = vpop.trf.xlu1 }
 0x1a9   : > { %2854 = vmatprep.mubr.msk.f32.mxu0 %vm1245_vm6, %v1179_v22 }
 0x1aa   : > { %1653 = vmatmul.mubr.f32.gmra.mrb[60].mxu0 %v1051_v24 }
 0x1ac   : > { %v1180_v27 = vpop.trf.xlu0  ;;  %1100 = vxpose.xlu1.b32.end [16/16] %v2787_v26, 128  ;;  %v1052_v29 = vpop.trf.xlu1 }
 0x1ad   : > { %2855 = vmatprep.mubr.msk.f32.mxu0 %vm1245_vm6, %v1180_v27 }
 0x1ae   : > { %1658 = vmatmul.mubr.f32.gmra.mrb[62].mxu0 %v1052_v29 }
 0x1b0   : > { %v1197_v30 = vpop.trf.xlu0  ;;  %v1069_v34 = vpop.trf.xlu1 }
 0x1b1   : > { %2856 = vmatprep.mubr.msk.f32.mxu0 %vm1245_vm6, %v1197_v30 }
 0x1b2   : > { %1663 = vmatmul.mubr.f32.gmra.mrb[64].mxu0 %v1069_v34 }
 0x1b4   : > { %v1198_v23 = vpop.trf.xlu0  ;;  %v1070_v31 = vpop.trf.xlu1 }
 0x1b5   : > { %2857 = vmatprep.mubr.msk.f32.mxu0 %vm1245_vm6, %v1198_v23 }
 0x1b6   : > { %1668 = vmatmul.mubr.f32.gmra.mrb[66].mxu0 %v1070_v31 }
 0x1b8   : > { %v1199_v35 = vpop.trf.xlu0  ;;  %v1071_v40 = vpop.trf.xlu1 }
 0x1b9   : > { %2858 = vmatprep.mubr.msk.f32.mxu0 %vm1245_vm6, %v1199_v35 }
 0x1ba   : > { %1673 = vmatmul.mubr.f32.gmra.mrb[68].mxu0 %v1071_v40 }
 0x1bc   : > { %v1200_v46 = vpop.trf.xlu0  ;;  %v1072_v41 = vpop.trf.xlu1 }
 0x1bd   : > { %2859 = vmatprep.mubr.msk.f32.mxu0 %vm1245_vm6, %v1200_v46 }
 0x1be   : > { %1678 = vmatmul.mubr.f32.gmra.mrb[70].mxu0 %v1072_v41 }
 0x1c0   : > { %v1201_v45 = vpop.trf.xlu0  ;;  %v1073_v57 = vpop.trf.xlu1 }
 0x1c1   : > { %2860 = vmatprep.mubr.msk.f32.mxu0 %vm1245_vm6, %v1201_v45 }
 0x1c2   : > { %1683 = vmatmul.mubr.f32.gmra.mrb[72].mxu0 %v1073_v57 }
 0x1c4   : > { %v1202_v48 = vpop.trf.xlu0  ;;  %v1074_v49 = vpop.trf.xlu1 }
 0x1c5   : > { %2861 = vmatprep.mubr.msk.f32.mxu0 %vm1245_vm6, %v1202_v48 }
 0x1c6   : > { %1688 = vmatmul.mubr.f32.gmra.mrb[74].mxu0 %v1074_v49 }
 0x1c8   : > { %v1203_v53 = vpop.trf.xlu0  ;;  %v1075_v58 = vpop.trf.xlu1 }
 0x1c9   : > { %2862 = vmatprep.mubr.msk.f32.mxu0 %vm1245_vm6, %v1203_v53  ;;  %v4447_v53 = vld [vmem:[%s3949_s8 + $0x2] ss:$8 sm:$0xf] }
 0x1ca   : > { %1693 = vmatmul.mubr.f32.gmra.mrb[76].mxu0 %v1075_v58  ;;  %v4450_v58 = vld [vmem:[%s3949_s8 + $0x1] ss:$8 sm:$0xf] }
 0x1cc   : > { %v1204_v59 = vpop.trf.xlu0  ;;  %v1076_v60 = vpop.trf.xlu1 }
 0x1cd   : > { %2863 = vmatprep.mubr.msk.f32.mxu0 %vm1245_vm6, %v1204_v59  ;;  %v377_v59 = vrot.slane %v4447_v53, %v4136_v3 }
 0x1ce   : > { %1698 = vmatmul.mubr.f32.gmra.mrb[78].mxu0 %v1076_v60 }
 0x1d0   : > { %v1205_v0 = vpop.trf.xlu0  ;;  %v1077_v1 = vpop.trf.xlu1 }
 0x1d1   : > { %2864 = vmatprep.mubr.msk.f32.mxu0 %vm1245_vm6, %v1205_v0 }
 0x1d2   : > { %1703 = vmatmul.mubr.f32.gmra.mrb[80].mxu0 %v1077_v1  ;;  %v4456_v1 = vrot.slane %v4450_v58, %v4136_v3 }
 0x1d4   : > { %v1206_v6 = vpop.trf.xlu0  ;;  %v1078_v7 = vpop.trf.xlu1  ;;  %vm749_vm8 = vcmp.eq.s32.totalorder %v3975_v32, %v4456_v1  ;;  %vm753_vm9 = vcmp.eq.s32.totalorder %v3990_v39, %v4456_v1  ;;  %vm757_vm11 = vcmp.eq.s32.totalorder %v4001_v44, %v4456_v1  ;;  %vm761_vm13 = vcmp.eq.s32.totalorder %v4024_v52, %v4456_v1 }
 0x1d5   : > { %2865 = vmatprep.mubr.msk.f32.mxu0 %vm1245_vm6, %v1206_v6  ;;  %vm765_vm15 = vcmp.eq.s32.totalorder %v4037_v56, %v4456_v1  ;;  %vm769_vm1 = vcmp.eq.s32.totalorder %v4049_v62, %v4456_v1  ;;  %vm773_vm3 = vcmp.eq.s32.totalorder %v4061_v5, %v4456_v1  ;;  %vm777_vm5 = vcmp.eq.s32.totalorder %v4074_v12, %v4456_v1 }
 0x1d6   : > { %1708 = vmatmul.mubr.f32.gmra.mrb[82].mxu0 %v1078_v7  ;;  %v4460_v7 = vrot.slane %v377_v59, %v3981_v36 }
 0x1d8   : > { %v1207_v9 = vpop.trf.xlu0  ;;  %v1079_v10 = vpop.trf.xlu1  ;;  %2888 = vmatprep.mubr.msk.f32.mxu1 %vm749_vm8, %v4460_v7  ;;  %vm781_vm8 = vcmp.eq.s32.totalorder %v4087_v19, %v4456_v1 }
 0x1d9   : > { %2866 = vmatprep.mubr.msk.f32.mxu0 %vm1245_vm6, %v1207_v9 }
 0x1da   : > { %1713 = vmatmul.mubr.f32.gmra.mrb[84].mxu0 %v1079_v10 }
 0x1dc   : > { %v1208_v13 = vpop.trf.xlu0  ;;  %v1080_v14 = vpop.trf.xlu1 }
 0x1dd   : > { %2867 = vmatprep.mubr.msk.f32.mxu0 %vm1245_vm6, %v1208_v13 }
 0x1de   : > { %1718 = vmatmul.mubr.f32.gmra.mrb[86].mxu0 %v1080_v14 }
 0x1e0   : > { %v1209_v15 = vpop.trf.xlu0  ;;  %v1081_v42 = vpop.trf.xlu1 }
 0x1e1   : > { %2868 = vmatprep.mubr.msk.f32.mxu0 %vm1245_vm6, %v1209_v15 }
 0x1e2   : > { %1723 = vmatmul.mubr.f32.gmra.mrb[88].mxu0 %v1081_v42 }
 0x1e4   : > { %v1210_v16 = vpop.trf.xlu0  ;;  %v1082_v20 = vpop.trf.xlu1 }
 0x1e5   : > { %2869 = vmatprep.mubr.msk.f32.mxu0 %vm1245_vm6, %v1210_v16 }
 0x1e6   : > { %1728 = vmatmul.mubr.f32.gmra.mrb[90].mxu0 %v1082_v20 }
 0x1e8   : > { %v1211_v21 = vpop.trf.xlu0  ;;  %v1083_v22 = vpop.trf.xlu1 }
 0x1e9   : > { %2870 = vmatprep.mubr.msk.f32.mxu0 %vm1245_vm6, %v1211_v21 }
 0x1ea   : > { %1733 = vmatmul.mubr.f32.gmra.mrb[92].mxu0 %v1083_v22 }
 0x1ec   : > { %v1212_v24 = vpop.trf.xlu0  ;;  %v1084_v26 = vpop.trf.xlu1 }
 0x1ed   : > { %2871 = vmatprep.mubr.msk.f32.mxu0 %vm1245_vm6, %v1212_v24 }
 0x1ee   : > { %1738 = vmatmul.mubr.f32.gmra.mrb[94].mxu0 %v1084_v26 }
 0x1f0   : > { %v1229_v27 = vpop.trf.xlu0  ;;  %v1101_v29 = vpop.trf.xlu1 }
 0x1f1   : > { %2872 = vmatprep.mubr.msk.f32.mxu0 %vm1245_vm6, %v1229_v27 }
 0x1f2   : > { %1743 = vmatmul.mubr.f32.gmra.mrb[96].mxu0 %v1101_v29 }
 0x1f4   : > { %v1230_v30 = vpop.trf.xlu0  ;;  %v1102_v34 = vpop.trf.xlu1 }
 0x1f5   : > { %2873 = vmatprep.mubr.msk.f32.mxu0 %vm1245_vm6, %v1230_v30 }
 0x1f6   : > { %1748 = vmatmul.mubr.f32.gmra.mrb[98].mxu0 %v1102_v34 }
 0x1f8   : > { %v1231_v23 = vpop.trf.xlu0  ;;  %v1103_v31 = vpop.trf.xlu1 }
 0x1f9   : > { %2874 = vmatprep.mubr.msk.f32.mxu0 %vm1245_vm6, %v1231_v23 }
 0x1fa   : > { %1753 = vmatmul.mubr.f32.gmra.mrb[100].mxu0 %v1103_v31 }
 0x1fc   : > { %v1232_v35 = vpop.trf.xlu0  ;;  %v1104_v40 = vpop.trf.xlu1 }
 0x1fd   : > { %2875 = vmatprep.mubr.msk.f32.mxu0 %vm1245_vm6, %v1232_v35 }
 0x1fe   : > { %1758 = vmatmul.mubr.f32.gmra.mrb[102].mxu0 %v1104_v40 }
 0x200   : > { %v1233_v46 = vpop.trf.xlu0  ;;  %v1105_v41 = vpop.trf.xlu1 }
 0x201   : > { %2876 = vmatprep.mubr.msk.f32.mxu0 %vm1245_vm6, %v1233_v46 }
 0x202   : > { %1763 = vmatmul.mubr.f32.gmra.mrb[104].mxu0 %v1105_v41 }
 0x204   : > { %v1234_v45 = vpop.trf.xlu0  ;;  %v1106_v57 = vpop.trf.xlu1 }
 0x205   : > { %v1504_v48 = vpop.f32.mrb[0].mxu0  ;;  %2877 = vmatprep.mubr.msk.f32.mxu0 %vm1245_vm6, %v1234_v45 }
 0x206   : > { %v1506_v49 = vpop.f32.mrb[1].mxu0  ;;  %1768 = vmatmul.mubr.f32.gmra.mrb[106].mxu0 %v1106_v57 }
 0x208   : > { %v1235_v60 = vpop.trf.xlu0  ;;  %v1107_v0 = vpop.trf.xlu1 }
 0x209   : > { %v1509_v6 = vpop.f32.mrb[2].mxu0  ;;  %2878 = vmatprep.mubr.msk.f32.mxu0 %vm1245_vm6, %v1235_v60 }
 0x20a   : > { %v3181_v9 = vpack.c.bf16 %v1509_v6, %v1504_v48  ;;  %v1511_v10 = vpop.f32.mrb[3].mxu0  ;;  %1773 = vmatmul.mubr.f32.gmra.mrb[108].mxu0 %v1107_v0 }
 0x20c   : > { %v1236_v13 = vpop.trf.xlu0  ;;  %3182 = vmatpush1.bf16.msra.mxu1 %v3181_v9  ;;  %v1108_v14 = vpop.trf.xlu1 }
 0x20d   : > { %v1514_v15 = vpop.f32.mrb[4].mxu0  ;;  %2879 = vmatprep.mubr.msk.f32.mxu0 %vm1245_vm6, %v1236_v13  ;;  %3183 = vmatprep.subr.bf16.mxu1 %v3668_v28 }
 0x20e   : > { %v1516_v3 = vpop.f32.mrb[5].mxu0  ;;  %1778 = vmatmul.mubr.f32.gmra.mrb[110].mxu0 %v1108_v14 }
 0x210   : > { %v1237_v42 = vpop.trf.xlu0  ;;  %v1109_v16 = vpop.trf.xlu1 }
 0x211   : > { %v1519_v20 = vpop.f32.mrb[6].mxu0  ;;  %2880 = vmatprep.mubr.msk.f32.mxu0 %vm1245_vm6, %v1237_v42 }
 0x212   : > { %v3184_v21 = vpack.c.bf16 %v1519_v20, %v1514_v15  ;;  %v1521_v22 = vpop.f32.mrb[7].mxu0  ;;  %1783 = vmatmul.mubr.f32.gmra.mrb[112].mxu0 %v1109_v16 }
 0x214   : > { %v1238_v24 = vpop.trf.xlu0  ;;  %3185 = vmatpush1.bf16.msra.mxu1 %v3184_v21  ;;  %v1110_v26 = vpop.trf.xlu1 }
 0x215   : > { %v1524_v27 = vpop.f32.mrb[8].mxu0  ;;  %2881 = vmatprep.mubr.msk.f32.mxu0 %vm1245_vm6, %v1238_v24  ;;  %3186 = vmatprep.subr.bf16.mxu1 %v3668_v28 }
 0x216   : > { %v1526_v29 = vpop.f32.mrb[9].mxu0  ;;  %1788 = vmatmul.mubr.f32.gmra.mrb[114].mxu0 %v1110_v26 }
 0x218   : > { %v1239_v30 = vpop.trf.xlu0  ;;  %v1111_v34 = vpop.trf.xlu1 }
 0x219   : > { %v1529_v23 = vpop.f32.mrb[10].mxu0  ;;  %2882 = vmatprep.mubr.msk.f32.mxu0 %vm1245_vm6, %v1239_v30 }
 0x21a   : > { %v3187_v31 = vpack.c.bf16 %v1529_v23, %v1524_v27  ;;  %v1531_v35 = vpop.f32.mrb[11].mxu0  ;;  %1793 = vmatmul.mubr.f32.gmra.mrb[116].mxu0 %v1111_v34 }
 0x21c   : > { %v1240_v40 = vpop.trf.xlu0  ;;  %3188 = vmatpush1.bf16.msra.mxu1 %v3187_v31  ;;  %v1112_v46 = vpop.trf.xlu1 }
 0x21d   : > { %v1534_v41 = vpop.f32.mrb[12].mxu0  ;;  %2883 = vmatprep.mubr.msk.f32.mxu0 %vm1245_vm6, %v1240_v40  ;;  %3189 = vmatprep.subr.bf16.mxu1 %v3668_v28 }
 0x21e   : > { %v1536_v45 = vpop.f32.mrb[13].mxu0  ;;  %1798 = vmatmul.mubr.f32.gmra.mrb[118].mxu0 %v1112_v46 }
 0x220   : > { %v1241_v57 = vpop.trf.xlu0  ;;  %v1113_v48 = vpop.trf.xlu1 }
 0x221   : > { %v1539_v49 = vpop.f32.mrb[14].mxu0  ;;  %2884 = vmatprep.mubr.msk.f32.mxu0 %vm1245_vm6, %v1241_v57 }
 0x222   : > { %v3190_v59 = vpack.c.bf16 %v1539_v49, %v1534_v41  ;;  %v1541_v60 = vpop.f32.mrb[15].mxu0  ;;  %1803 = vmatmul.mubr.f32.gmra.mrb[120].mxu0 %v1113_v48 }
 0x224   : > { %v1242_v0 = vpop.trf.xlu0  ;;  %3191 = vmatpush1.bf16.msra.mxu1 %v3190_v59  ;;  %v1114_v6 = vpop.trf.xlu1 }
 0x225   : > { %v1544_v9 = vpop.f32.mrb[16].mxu0  ;;  %2885 = vmatprep.mubr.msk.f32.mxu0 %vm1245_vm6, %v1242_v0  ;;  %3192 = vmatprep.subr.bf16.mxu1 %v3668_v28 }
 0x226   : > { %v1546_v10 = vpop.f32.mrb[17].mxu0  ;;  %1808 = vmatmul.mubr.f32.gmra.mrb[122].mxu0 %v1114_v6 }
 0x228   : > { %v1243_v13 = vpop.trf.xlu0  ;;  %v1115_v14 = vpop.trf.xlu1 }
 0x229   : > { %v1549_v15 = vpop.f32.mrb[18].mxu0  ;;  %2886 = vmatprep.mubr.msk.f32.mxu0 %vm1245_vm6, %v1243_v13 }
 0x22a   : > { %v3193_v3 = vpack.c.bf16 %v1549_v15, %v1544_v9  ;;  %v1551_v42 = vpop.f32.mrb[19].mxu0  ;;  %1813 = vmatmul.mubr.f32.gmra.mrb[124].mxu0 %v1115_v14 }
 0x22c   : > { %v1244_v16 = vpop.trf.xlu0  ;;  %3194 = vmatpush1.bf16.msra.mxu1 %v3193_v3  ;;  %v1116_v20 = vpop.trf.xlu1 }
 0x22d   : > { %v1554_v21 = vpop.f32.mrb[20].mxu0  ;;  %2887 = vmatprep.mubr.msk.f32.mxu0 %vm1245_vm6, %v1244_v16  ;;  %3195 = vmatprep.subr.bf16.mxu1 %v3668_v28 }
 0x22e   : > { %v1556_v22 = vpop.f32.mrb[21].mxu0  ;;  %1818 = vmatmul.mubr.f32.gmra.mrb[126].mxu0 %v1116_v20 }
 0x231   : > { %v1559_v24 = vpop.f32.mrb[22].mxu0 }
 0x232   : > { %v3196_v26 = vpack.c.bf16 %v1559_v24, %v1554_v21  ;;  %v1561_v27 = vpop.f32.mrb[23].mxu0 }
 0x234   : > { %3197 = vmatpush1.bf16.msra.mxu1 %v3196_v26 }
 0x235   : > { %v1564_v29 = vpop.f32.mrb[24].mxu0  ;;  %3198 = vmatprep.subr.bf16.mxu1 %v3668_v28 }
 0x236   : > { %v1566_v30 = vpop.f32.mrb[25].mxu0 }
 0x239   : > { %v1569_v34 = vpop.f32.mrb[26].mxu0 }
 0x23a   : > { %v3199_v23 = vpack.c.bf16 %v1569_v34, %v1564_v29  ;;  %v1571_v31 = vpop.f32.mrb[27].mxu0 }
 0x23c   : > { %3200 = vmatpush1.bf16.msra.mxu1 %v3199_v23 }
 0x23d   : > { %v1574_v35 = vpop.f32.mrb[28].mxu0  ;;  %3201 = vmatprep.subr.bf16.mxu1 %v3668_v28 }
 0x23e   : > { %v1576_v40 = vpop.f32.mrb[29].mxu0 }
 0x241   : > { %v1579_v46 = vpop.f32.mrb[30].mxu0 }
 0x242   : > { %v3202_v41 = vpack.c.bf16 %v1579_v46, %v1574_v35  ;;  %v1581_v45 = vpop.f32.mrb[31].mxu0 }
 0x244   : > { %3203 = vmatpush1.bf16.msra.mxu1 %v3202_v41 }
 0x245   : > { %v1584_v57 = vpop.f32.mrb[32].mxu0  ;;  %3204 = vmatprep.subr.bf16.mxu1 %v3668_v28 }
 0x246   : > { %v1586_v48 = vpop.f32.mrb[33].mxu0 }
 0x249   : > { %v1589_v49 = vpop.f32.mrb[34].mxu0 }
 0x24a   : > { %v3205_v59 = vpack.c.bf16 %v1589_v49, %v1584_v57  ;;  %v1591_v60 = vpop.f32.mrb[35].mxu0 }
 0x24c   : > { %3206 = vmatpush1.bf16.msra.mxu1 %v3205_v59 }
 0x24d   : > { %v1594_v0 = vpop.f32.mrb[36].mxu0  ;;  %3207 = vmatprep.subr.bf16.mxu1 %v3668_v28 }
 0x24e   : > { %v1596_v6 = vpop.f32.mrb[37].mxu0 }
 0x24f   : > { %v373_v6 = vrot.slane %v4447_v53, %v3981_v36 }
 0x251   : > { %v1599_v9 = vpop.f32.mrb[38].mxu0 }
 0x252   : > { %v3208_v10 = vpack.c.bf16 %v1599_v9, %v1594_v0  ;;  %v1601_v13 = vpop.f32.mrb[39].mxu0  ;;  %v4493_v9 = vrot.slane %v4450_v58, %v3981_v36 }
 0x254   : > { %3209 = vmatpush1.bf16.msra.mxu1 %v3208_v10  ;;  %vm748_vm6 = vcmp.eq.s32.totalorder %v3975_v32, %v4493_v9  ;;  %vm752_vm10 = vcmp.eq.s32.totalorder %v3990_v39, %v4493_v9  ;;  %vm756_vm12 = vcmp.eq.s32.totalorder %v4001_v44, %v4493_v9  ;;  %vm760_vm14 = vcmp.eq.s32.totalorder %v4024_v52, %v4493_v9 }
 0x255   : > { %v1604_v14 = vpop.f32.mrb[40].mxu0  ;;  %3210 = vmatprep.subr.bf16.mxu1 %v3668_v28  ;;  %vm764_vm0 = vcmp.eq.s32.totalorder %v4037_v56, %v4493_v9  ;;  %vm768_vm2 = vcmp.eq.s32.totalorder %v4049_v62, %v4493_v9  ;;  %vm772_vm4 = vcmp.eq.s32.totalorder %v4061_v5, %v4493_v9  ;;  %vm776_vm7 = vcmp.eq.s32.totalorder %v4074_v12, %v4493_v9 }
 0x256   : > { %v1606_v15 = vpop.f32.mrb[41].mxu0 }
 0x257   : > { %v4496_v15 = vrot.slane %v373_v6, %v3981_v36 }
 0x259   : > { %v1609_v3 = vpop.f32.mrb[42].mxu0 }
 0x25a   : > { %v3211_v42 = vpack.c.bf16 %v1609_v3, %v1604_v14  ;;  %v1611_v16 = vpop.f32.mrb[43].mxu0 }
 0x25c   : > { %3212 = vmatpush1.bf16.msra.mxu1 %v3211_v42 }
 0x25d   : > { %v1614_v20 = vpop.f32.mrb[44].mxu0  ;;  %3213 = vmatprep.subr.bf16.mxu1 %v3668_v28 }
 0x25e   : > { %v1616_v21 = vpop.f32.mrb[45].mxu0 }
 0x261   : > { %v1619_v22 = vpop.f32.mrb[46].mxu0 }
 0x262   : > { %v3214_v24 = vpack.c.bf16 %v1619_v22, %v1614_v20  ;;  %v1621_v26 = vpop.f32.mrb[47].mxu0 }
 0x264   : > { %3215 = vmatpush1.bf16.msra.mxu1 %v3214_v24 }
 0x265   : > { %v1624_v27 = vpop.f32.mrb[48].mxu0  ;;  %3216 = vmatprep.subr.bf16.mxu1 %v3668_v28 }
 0x266   : > { %v1626_v29 = vpop.f32.mrb[49].mxu0 }
 0x269   : > { %v1629_v30 = vpop.f32.mrb[50].mxu0 }
 0x26a   : > { %v3217_v34 = vpack.c.bf16 %v1629_v30, %v1624_v27  ;;  %v1631_v23 = vpop.f32.mrb[51].mxu0 }
 0x26c   : > { %3218 = vmatpush1.bf16.msra.mxu1 %v3217_v34 }
 0x26d   : > { %v1634_v31 = vpop.f32.mrb[52].mxu0  ;;  %3219 = vmatprep.subr.bf16.mxu1 %v3668_v28 }
 0x26e   : > { %v1636_v35 = vpop.f32.mrb[53].mxu0 }
 0x271   : > { %v1639_v40 = vpop.f32.mrb[54].mxu0 }
 0x272   : > { %v3220_v46 = vpack.c.bf16 %v1639_v40, %v1634_v31  ;;  %v1641_v41 = vpop.f32.mrb[55].mxu0 }
 0x274   : > { %3221 = vmatpush1.bf16.msra.mxu1 %v3220_v46 }
 0x275   : > { %v1644_v45 = vpop.f32.mrb[56].mxu0  ;;  %3222 = vmatprep.subr.bf16.mxu1 %v3668_v28 }
 0x276   : > { %v1646_v57 = vpop.f32.mrb[57].mxu0 }
 0x279   : > { %v1649_v48 = vpop.f32.mrb[58].mxu0 }
 0x27a   : > { %v3223_v49 = vpack.c.bf16 %v1649_v48, %v1644_v45  ;;  %v1651_v59 = vpop.f32.mrb[59].mxu0 }
 0x27c   : > { %3224 = vmatpush1.bf16.msra.mxu1 %v3223_v49 }
 0x27d   : > { %v1654_v60 = vpop.f32.mrb[60].mxu0  ;;  %3225 = vmatprep.subr.bf16.mxu1 %v3668_v28 }
 0x27e   : > { %v1656_v0 = vpop.f32.mrb[61].mxu0 }
 0x281   : > { %v1659_v10 = vpop.f32.mrb[62].mxu0 }
 0x282   : > { %v3226_v13 = vpack.c.bf16 %v1659_v10, %v1654_v60  ;;  %v1661_v14 = vpop.f32.mrb[63].mxu0 }
 0x284   : > { %3227 = vmatpush1.bf16.msra.mxu1 %v3226_v13 }
 0x285   : > { %v1664_v3 = vpop.f32.mrb[64].mxu0  ;;  %3228 = vmatprep.subr.bf16.mxu1 %v3668_v28 }
 0x286   : > { %v1666_v42 = vpop.f32.mrb[65].mxu0 }
 0x287   : > { %2889 = vmatmul.mubr.msk.f32.vlgmr.msra.gmra.mrb[0].mxu1 %vm748_vm6, %v4496_v15  ;;  %vm780_vm6 = vcmp.eq.s32.totalorder %v4087_v19, %v4493_v9 }
 0x288   : > { %2890 = vmatprep.mubr.msk.f32.mxu1 %vm753_vm9, %v4460_v7  ;;  %vm785_vm9 = vcmp.eq.s32.totalorder %v4097_v25, %v4456_v1 }
 0x289   : > { %v1669_v16 = vpop.f32.mrb[66].mxu0 }
 0x28a   : > { %v3229_v20 = vpack.c.bf16 %v1669_v16, %v1664_v3  ;;  %v1671_v21 = vpop.f32.mrb[67].mxu0 }
 0x28b   : > { %2891 = vmatmul.mubr.msk.f32.gmra.mrb[2].mxu1 %vm752_vm10, %v4496_v15  ;;  %vm784_vm10 = vcmp.eq.s32.totalorder %v4097_v25, %v4493_v9 }
 0x28c   : > { %3230 = vmatpush1.bf16.msra.mxu1 %v3229_v20  ;;  %2892 = vmatprep.mubr.msk.f32.mxu1 %vm757_vm11, %v4460_v7  ;;  %vm789_vm11 = vcmp.eq.s32.totalorder %v4105_v33, %v4456_v1 }
 0x28d   : > { %v1674_v22 = vpop.f32.mrb[68].mxu0  ;;  %3231 = vmatprep.subr.bf16.mxu1 %v3668_v28 }
 0x28e   : > { %v1676_v24 = vpop.f32.mrb[69].mxu0 }
 0x28f   : > { %2893 = vmatmul.mubr.msk.f32.gmra.mrb[4].mxu1 %vm756_vm12, %v4496_v15  ;;  %vm788_vm12 = vcmp.eq.s32.totalorder %v4105_v33, %v4493_v9 }
 0x290   : > { %2894 = vmatprep.mubr.msk.f32.mxu1 %vm761_vm13, %v4460_v7  ;;  %vm793_vm13 = vcmp.eq.s32.totalorder %v4112_v47, %v4456_v1 }
 0x291   : > { %v1679_v26 = vpop.f32.mrb[70].mxu0 }
 0x292   : > { %v3232_v27 = vpack.c.bf16 %v1679_v26, %v1674_v22  ;;  %v1681_v29 = vpop.f32.mrb[71].mxu0 }
 0x293   : > { %2895 = vmatmul.mubr.msk.f32.gmra.mrb[6].mxu1 %vm760_vm14, %v4496_v15  ;;  %vm792_vm14 = vcmp.eq.s32.totalorder %v4112_v47, %v4493_v9 }
 0x294   : > { %3233 = vmatpush1.bf16.msra.mxu1 %v3232_v27  ;;  %2896 = vmatprep.mubr.msk.f32.mxu1 %vm765_vm15, %v4460_v7  ;;  %vm797_vm15 = vcmp.eq.s32.totalorder %v4119_v54, %v4456_v1 }
 0x295   : > { %v1684_v30 = vpop.f32.mrb[72].mxu0  ;;  %3234 = vmatprep.subr.bf16.mxu1 %v3668_v28 }
 0x296   : > { %v1686_v34 = vpop.f32.mrb[73].mxu0 }
 0x297   : > { %2897 = vmatmul.mubr.msk.f32.gmra.mrb[8].mxu1 %vm764_vm0, %v4496_v15  ;;  %vm796_vm0 = vcmp.eq.s32.totalorder %v4119_v54, %v4493_v9 }
 0x298   : > { %2898 = vmatprep.mubr.msk.f32.mxu1 %vm769_vm1, %v4460_v7  ;;  %vm801_vm1 = vcmp.eq.s32.totalorder %v4126_v63, %v4456_v1 }
 0x299   : > { %v1689_v23 = vpop.f32.mrb[74].mxu0 }
 0x29a   : > { %v3235_v31 = vpack.c.bf16 %v1689_v23, %v1684_v30  ;;  %v1691_v35 = vpop.f32.mrb[75].mxu0 }
 0x29b   : > { %2899 = vmatmul.mubr.msk.f32.gmra.mrb[10].mxu1 %vm768_vm2, %v4496_v15  ;;  %vm800_vm2 = vcmp.eq.s32.totalorder %v4126_v63, %v4493_v9 }
 0x29c   : > { %3236 = vmatpush1.bf16.msra.mxu1 %v3235_v31  ;;  %2900 = vmatprep.mubr.msk.f32.mxu1 %vm773_vm3, %v4460_v7  ;;  %vm805_vm3 = vcmp.eq.s32.totalorder %v4133_v2, %v4456_v1 }
 0x29d   : > { %v1694_v40 = vpop.f32.mrb[76].mxu0  ;;  %3237 = vmatprep.subr.bf16.mxu1 %v3668_v28 }
 0x29e   : > { %v1696_v46 = vpop.f32.mrb[77].mxu0 }
 0x29f   : > { %2901 = vmatmul.mubr.msk.f32.gmra.mrb[12].mxu1 %vm772_vm4, %v4496_v15  ;;  %vm804_vm4 = vcmp.eq.s32.totalorder %v4133_v2, %v4493_v9 }
 0x2a0   : > { %2902 = vmatprep.mubr.msk.f32.mxu1 %vm777_vm5, %v4460_v7  ;;  %vm809_vm5 = vcmp.eq.s32.totalorder %v4143_v8, %v4456_v1 }
 0x2a1   : > { %v1699_v41 = vpop.f32.mrb[78].mxu0 }
 0x2a2   : > { %v3238_v45 = vpack.c.bf16 %v1699_v41, %v1694_v40  ;;  %v1701_v57 = vpop.f32.mrb[79].mxu0 }
 0x2a3   : > { %2903 = vmatmul.mubr.msk.f32.gmra.mrb[14].mxu1 %vm776_vm7, %v4496_v15  ;;  %vm808_vm7 = vcmp.eq.s32.totalorder %v4143_v8, %v4493_v9 }
 0x2a4   : > { %3239 = vmatpush1.bf16.msra.mxu1 %v3238_v45  ;;  %2904 = vmatprep.mubr.msk.f32.mxu1 %vm781_vm8, %v4460_v7  ;;  %vm813_vm8 = vcmp.eq.s32.totalorder %v3984_v37, %v4456_v1 }
 0x2a5   : > { %v1704_v48 = vpop.f32.mrb[80].mxu0  ;;  %3240 = vmatprep.subr.bf16.mxu1 %v3668_v28 }
 0x2a6   : > { %v1706_v49 = vpop.f32.mrb[81].mxu0 }
 0x2a7   : > { %2905 = vmatmul.mubr.msk.f32.gmra.mrb[16].mxu1 %vm780_vm6, %v4496_v15  ;;  %vm812_vm6 = vcmp.eq.s32.totalorder %v3984_v37, %v4493_v9 }
 0x2a8   : > { %2906 = vmatprep.mubr.msk.f32.mxu1 %vm785_vm9, %v4460_v7  ;;  %vm817_vm9 = vcmp.eq.s32.totalorder %v3987_v38, %v4456_v1 }
 0x2a9   : > { %v1709_v59 = vpop.f32.mrb[82].mxu0 }
 0x2aa   : > { %v3241_v60 = vpack.c.bf16 %v1709_v59, %v1704_v48  ;;  %v1711_v0 = vpop.f32.mrb[83].mxu0 }
 0x2ab   : > { %2907 = vmatmul.mubr.msk.f32.gmra.mrb[18].mxu1 %vm784_vm10, %v4496_v15  ;;  %vm816_vm10 = vcmp.eq.s32.totalorder %v3987_v38, %v4493_v9 }
 0x2ac   : > { %3242 = vmatpush1.bf16.msra.mxu1 %v3241_v60  ;;  %2908 = vmatprep.mubr.msk.f32.mxu1 %vm789_vm11, %v4460_v7  ;;  %vm821_vm11 = vcmp.eq.s32.totalorder %v3998_v43, %v4456_v1 }
 0x2ad   : > { %v1714_v6 = vpop.f32.mrb[84].mxu0  ;;  %3243 = vmatprep.subr.bf16.mxu1 %v3668_v28 }
 0x2ae   : > { %v1716_v10 = vpop.f32.mrb[85].mxu0 }
 0x2af   : > { %2909 = vmatmul.mubr.msk.f32.gmra.mrb[20].mxu1 %vm788_vm12, %v4496_v15  ;;  %vm820_vm12 = vcmp.eq.s32.totalorder %v3998_v43, %v4493_v9 }
 0x2b0   : > { %2910 = vmatprep.mubr.msk.f32.mxu1 %vm793_vm13, %v4460_v7  ;;  %vm825_vm13 = vcmp.eq.s32.totalorder %v4021_v51, %v4456_v1 }
 0x2b1   : > { %v1719_v13 = vpop.f32.mrb[86].mxu0 }
 0x2b2   : > { %v3244_v14 = vpack.c.bf16 %v1719_v13, %v1714_v6  ;;  %v1721_v3 = vpop.f32.mrb[87].mxu0 }
 0x2b3   : > { %2911 = vmatmul.mubr.msk.f32.gmra.mrb[22].mxu1 %vm792_vm14, %v4496_v15  ;;  %vm824_vm14 = vcmp.eq.s32.totalorder %v4021_v51, %v4493_v9 }
 0x2b4   : > { %3245 = vmatpush1.bf16.msra.mxu1 %v3244_v14  ;;  %2912 = vmatprep.mubr.msk.f32.mxu1 %vm797_vm15, %v4460_v7  ;;  %vm829_vm15 = vcmp.eq.s32.totalorder %v4034_v55, %v4456_v1  ;;  %v385_v14 = vrot.slane %v4447_v53, %v4312_v17 }
 0x2b5   : > { %v1724_v42 = vpop.f32.mrb[88].mxu0  ;;  %3246 = vmatprep.subr.bf16.mxu1 %v3668_v28 }
 0x2b6   : > { %v1726_v16 = vpop.f32.mrb[89].mxu0 }
 0x2b7   : > { %2913 = vmatmul.mubr.msk.f32.gmra.mrb[24].mxu1 %vm796_vm0, %v4496_v15  ;;  %vm828_vm0 = vcmp.eq.s32.totalorder %v4034_v55, %v4493_v9 }
 0x2b8   : > { %2914 = vmatprep.mubr.msk.f32.mxu1 %vm801_vm1, %v4460_v7  ;;  %vm833_vm1 = vcmp.eq.s32.totalorder %v4046_v61, %v4456_v1 }
 0x2b9   : > { %v1729_v20 = vpop.f32.mrb[90].mxu0 }
 0x2ba   : > { %v3247_v21 = vpack.c.bf16 %v1729_v20, %v1724_v42  ;;  %v1731_v22 = vpop.f32.mrb[91].mxu0  ;;  %v4656_v42 = vrot.slane %v4450_v58, %v4312_v17 }
 0x2bb   : > { %2915 = vmatmul.mubr.msk.f32.gmra.mrb[26].mxu1 %vm800_vm2, %v4496_v15  ;;  %vm832_vm2 = vcmp.eq.s32.totalorder %v4046_v61, %v4493_v9 }
 0x2bc   : > { %3248 = vmatpush1.bf16.msra.mxu1 %v3247_v21  ;;  %2916 = vmatprep.mubr.msk.f32.mxu1 %vm805_vm3, %v4460_v7  ;;  %vm837_vm3 = vcmp.eq.s32.totalorder %v4054_v4, %v4456_v1  ;;  %v4663_v21 = vrot.slane %v385_v14, %v3981_v36 }
 0x2bd   : > { %v1734_v24 = vpop.f32.mrb[92].mxu0  ;;  %3249 = vmatprep.subr.bf16.mxu1 %v3668_v28 }
 0x2be   : > { %v1736_v26 = vpop.f32.mrb[93].mxu0 }
 0x2bf   : > { %2917 = vmatmul.mubr.msk.f32.gmra.mrb[28].mxu1 %vm804_vm4, %v4496_v15  ;;  %vm836_vm4 = vcmp.eq.s32.totalorder %v4054_v4, %v4493_v9 }
 0x2c0   : > { %2918 = vmatprep.mubr.msk.f32.mxu1 %vm809_vm5, %v4460_v7  ;;  %vm841_vm5 = vcmp.eq.s32.totalorder %v4067_v11, %v4456_v1 }
 0x2c1   : > { %v1739_v27 = vpop.f32.mrb[94].mxu0 }
 0x2c2   : > { %v3250_v29 = vpack.c.bf16 %v1739_v27, %v1734_v24  ;;  %v1741_v30 = vpop.f32.mrb[95].mxu0 }
 0x2c3   : > { %2919 = vmatmul.mubr.msk.f32.gmra.mrb[30].mxu1 %vm808_vm7, %v4496_v15  ;;  %vm840_vm7 = vcmp.eq.s32.totalorder %v4067_v11, %v4493_v9 }
 0x2c4   : > { %3251 = vmatpush1.bf16.msra.mxu1 %v3250_v29  ;;  %2920 = vmatprep.mubr.msk.f32.mxu1 %vm813_vm8, %v4460_v7  ;;  %vm845_vm8 = vcmp.eq.s32.totalorder %v4084_v18, %v4456_v1 }
 0x2c5   : > { %v1744_v34 = vpop.f32.mrb[96].mxu0  ;;  %3252 = vmatprep.subr.bf16.mxu1 %v3668_v28 }
 0x2c6   : > { %v1746_v23 = vpop.f32.mrb[97].mxu0 }
 0x2c7   : > { %2921 = vmatmul.mubr.msk.f32.gmra.mrb[32].mxu1 %vm812_vm6, %v4496_v15  ;;  %vm844_vm6 = vcmp.eq.s32.totalorder %v4084_v18, %v4493_v9 }
 0x2c8   : > { %2922 = vmatprep.mubr.msk.f32.mxu1 %vm817_vm9, %v4460_v7  ;;  %vm751_vm9 = vcmp.eq.s32.totalorder %v3975_v32, %v4656_v42 }
 0x2c9   : > { %v1749_v31 = vpop.f32.mrb[98].mxu0 }
 0x2ca   : > { %v3253_v35 = vpack.c.bf16 %v1749_v31, %v1744_v34  ;;  %v1751_v40 = vpop.f32.mrb[99].mxu0 }
 0x2cb   : > { %2923 = vmatmul.mubr.msk.f32.gmra.mrb[34].mxu1 %vm816_vm10, %v4496_v15 }
 0x2cc   : > { %3254 = vmatpush1.bf16.msra.mxu1 %v3253_v35  ;;  %2924 = vmatprep.mubr.msk.f32.mxu1 %vm821_vm11, %v4460_v7  ;;  %vm755_vm11 = vcmp.eq.s32.totalorder %v3990_v39, %v4656_v42 }
 0x2cd   : > { %v1754_v46 = vpop.f32.mrb[100].mxu0  ;;  %3255 = vmatprep.subr.bf16.mxu1 %v3668_v28 }
 0x2ce   : > { %v1756_v41 = vpop.f32.mrb[101].mxu0 }
 0x2cf   : > { %2925 = vmatmul.mubr.msk.f32.gmra.mrb[36].mxu1 %vm820_vm12, %v4496_v15  ;;  %v381_v41 = vrot.slane %v4447_v53, %v4219_v50 }
 0x2d0   : > { %2926 = vmatprep.mubr.msk.f32.mxu1 %vm825_vm13, %v4460_v7  ;;  %vm759_vm13 = vcmp.eq.s32.totalorder %v4001_v44, %v4656_v42 }
 0x2d1   : > { %v1759_v45 = vpop.f32.mrb[102].mxu0 }
 0x2d2   : > { %v3256_v57 = vpack.c.bf16 %v1759_v45, %v1754_v46  ;;  %v1761_v48 = vpop.f32.mrb[103].mxu0  ;;  %v4677_v45 = vrot.slane %v4450_v58, %v4219_v50 }
 0x2d3   : > { %2927 = vmatmul.mubr.msk.f32.gmra.mrb[38].mxu1 %vm824_vm14, %v4496_v15 }
 0x2d4   : > { %3257 = vmatpush1.bf16.msra.mxu1 %v3256_v57  ;;  %2928 = vmatprep.mubr.msk.f32.mxu1 %vm829_vm15, %v4460_v7  ;;  %vm750_vm10 = vcmp.eq.s32.totalorder %v3975_v32, %v4677_v45  ;;  %vm754_vm12 = vcmp.eq.s32.totalorder %v3990_v39, %v4677_v45  ;;  %vm758_vm14 = vcmp.eq.s32.totalorder %v4001_v44, %v4677_v45 }
 0x2d5   : > { %v1764_v49 = vpop.f32.mrb[104].mxu0  ;;  %3258 = vmatprep.subr.bf16.mxu1 %v3668_v28  ;;  %vm763_vm15 = vcmp.eq.s32.totalorder %v4024_v52, %v4656_v42 }
 0x2d6   : > { %v1766_v59 = vpop.f32.mrb[105].mxu0 }
 0x2d7   : > { %2929 = vmatmul.mubr.msk.f32.gmra.mrb[40].mxu1 %vm828_vm0, %v4496_v15  ;;  %v4680_v59 = vrot.slane %v381_v41, %v3981_v36  ;;  %vm762_vm0 = vcmp.eq.s32.totalorder %v4024_v52, %v4677_v45 }
 0x2d8   : > { %2930 = vmatprep.mubr.msk.f32.mxu1 %vm833_vm1, %v4460_v7  ;;  %vm767_vm1 = vcmp.eq.s32.totalorder %v4037_v56, %v4656_v42 }
 0x2d9   : > { %v1769_v60 = vpop.f32.mrb[106].mxu0 }
 0x2da   : > { %v3259_v0 = vpack.c.bf16 %v1769_v60, %v1764_v49  ;;  %v1771_v6 = vpop.f32.mrb[107].mxu0 }
 0x2db   : > { %2931 = vmatmul.mubr.msk.f32.gmra.mrb[42].mxu1 %vm832_vm2, %v4496_v15  ;;  %vm766_vm2 = vcmp.eq.s32.totalorder %v4037_v56, %v4677_v45 }
 0x2dc   : > { %3260 = vmatpush1.bf16.msra.mxu1 %v3259_v0  ;;  %2932 = vmatprep.mubr.msk.f32.mxu1 %vm837_vm3, %v4460_v7  ;;  %vm771_vm3 = vcmp.eq.s32.totalorder %v4049_v62, %v4656_v42 }
 0x2dd   : > { %v1774_v10 = vpop.f32.mrb[108].mxu0  ;;  %3261 = vmatprep.subr.bf16.mxu1 %v3668_v28 }
 0x2de   : > { %v1776_v13 = vpop.f32.mrb[109].mxu0 }
 0x2df   : > { %2933 = vmatmul.mubr.msk.f32.gmra.mrb[44].mxu1 %vm836_vm4, %v4496_v15  ;;  %vm770_vm4 = vcmp.eq.s32.totalorder %v4049_v62, %v4677_v45 }
 0x2e0   : > { %2934 = vmatprep.mubr.msk.f32.mxu1 %vm841_vm5, %v4460_v7  ;;  %vm775_vm5 = vcmp.eq.s32.totalorder %v4061_v5, %v4656_v42 }
 0x2e1   : > { %v1779_v3 = vpop.f32.mrb[110].mxu0 }
 0x2e2   : > { %v3262_v16 = vpack.c.bf16 %v1779_v3, %v1774_v10  ;;  %v1781_v20 = vpop.f32.mrb[111].mxu0 }
 0x2e3   : > { %2935 = vmatmul.mubr.msk.f32.gmra.mrb[46].mxu1 %vm840_vm7, %v4496_v15  ;;  %vm774_vm7 = vcmp.eq.s32.totalorder %v4061_v5, %v4677_v45 }
 0x2e4   : > { %3263 = vmatpush1.bf16.msra.mxu1 %v3262_v16  ;;  %2936 = vmatprep.mubr.msk.f32.mxu1 %vm845_vm8, %v4460_v7  ;;  %vm779_vm8 = vcmp.eq.s32.totalorder %v4074_v12, %v4656_v42 }
 0x2e5   : > { %v1784_v22 = vpop.f32.mrb[112].mxu0  ;;  %3264 = vmatprep.subr.bf16.mxu1 %v3668_v28 }
 0x2e6   : > { %v1786_v17 = vpop.f32.mrb[113].mxu0 }
 0x2e7   : > { %2937 = vmatmul.mubr.msk.f32.gmra.mrb[48].mxu1 %vm844_vm6, %v4496_v15  ;;  %vm778_vm6 = vcmp.eq.s32.totalorder %v4074_v12, %v4677_v45 }
 0x2e8   : > { %2938 = vmatprep.mubr.msk.f32.mxu1 %vm751_vm9, %v4663_v21  ;;  %vm783_vm9 = vcmp.eq.s32.totalorder %v4087_v19, %v4656_v42 }
 0x2e9   : > { %v1789_v1 = vpop.f32.mrb[114].mxu0 }
 0x2ea   : > { %v3265_v24 = vpack.c.bf16 %v1789_v1, %v1784_v22  ;;  %v1791_v7 = vpop.f32.mrb[115].mxu0 }
 0x2ec   : > { %3266 = vmatpush1.bf16.msra.mxu1 %v3265_v24 }
 0x2ed   : > { %v1794_v26 = vpop.f32.mrb[116].mxu0  ;;  %3267 = vmatprep.subr.bf16.mxu1 %v3668_v28 }
 0x2ee   : > { %v1796_v9 = vpop.f32.mrb[117].mxu0 }
 0x2f1   : > { %v1799_v27 = vpop.f32.mrb[118].mxu0 }
 0x2f2   : > { %v3268_v29 = vpack.c.bf16 %v1799_v27, %v1794_v26  ;;  %v1801_v30 = vpop.f32.mrb[119].mxu0 }
 0x2f3   : > { %v1823_v30 = vld [vmem:[#allocation3] sm:$0xff] }
 0x2f4   : > { %3269 = vmatpush1.bf16.msra.mxu1 %v3268_v29 }
 0x2f5   : > { %v1804_v34 = vpop.f32.mrb[120].mxu0  ;;  %3270 = vmatprep.subr.bf16.mxu1 %v3668_v28 }
 0x2f6   : > { %v1806_v23 = vpop.f32.mrb[121].mxu0 }
 0x2f9   : > { %v1809_v31 = vpop.f32.mrb[122].mxu0 }
 0x2fa   : > { %v3271_v15 = vpack.c.bf16 %v1809_v31, %v1804_v34  ;;  %v1811_v35 = vpop.f32.mrb[123].mxu0 }
 0x2fb   : > { %v1824_v35 = vld [vmem:[#allocation3 + $0x8] sm:$0xff] }
 0x2fc   : > { %3272 = vmatpush1.bf16.msra.mxu1 %v3271_v15 }
 0x2fd   : > { %v1814_v40 = vpop.f32.mrb[124].mxu0  ;;  %3273 = vmatprep.subr.bf16.mxu1 %v3668_v28 }
 0x2fe   : > { %v1816_v46 = vpop.f32.mrb[125].mxu0 }
 0x301   : > { %v1819_v57 = vpop.f32.mrb[126].mxu0 }
 0x302   : > { %v3274_v48 = vpack.c.bf16 %v1819_v57, %v1814_v40  ;;  %v1821_v49 = vpop.f32.mrb[127].mxu0  ;;  %v1825_v57 = vld [vmem:[#allocation3 + $0x10] sm:$0xff] }
 0x304   : > { %3275 = vmatpush1.bf16.msra.mxu1 %v3274_v48 }
 0x307   : > { %2939 = vmatmul.mubr.msk.f32.vlgmr.msra.gmra.mrb[50].mxu1 %vm750_vm10, %v4680_v59  ;;  %vm782_vm10 = vcmp.eq.s32.totalorder %v4087_v19, %v4677_v45 }
 0x308   : > { %2940 = vmatprep.mubr.msk.f32.mxu1 %vm755_vm11, %v4663_v21  ;;  %vm787_vm11 = vcmp.eq.s32.totalorder %v4097_v25, %v4656_v42 }
 0x30b   : > { %2941 = vmatmul.mubr.msk.f32.gmra.mrb[52].mxu1 %vm754_vm12, %v4680_v59  ;;  %vm786_vm12 = vcmp.eq.s32.totalorder %v4097_v25, %v4677_v45 }
 0x30c   : > { %2942 = vmatprep.mubr.msk.f32.mxu1 %vm759_vm13, %v4663_v21  ;;  %vm791_vm13 = vcmp.eq.s32.totalorder %v4105_v33, %v4656_v42 }
 0x30f   : > { %2943 = vmatmul.mubr.msk.f32.gmra.mrb[54].mxu1 %vm758_vm14, %v4680_v59  ;;  %vm790_vm14 = vcmp.eq.s32.totalorder %v4105_v33, %v4677_v45 }
 0x310   : > { %2944 = vmatprep.mubr.msk.f32.mxu1 %vm763_vm15, %v4663_v21  ;;  %vm795_vm15 = vcmp.eq.s32.totalorder %v4112_v47, %v4656_v42 }
 0x313   : > { %2945 = vmatmul.mubr.msk.f32.gmra.mrb[56].mxu1 %vm762_vm0, %v4680_v59  ;;  %vm794_vm0 = vcmp.eq.s32.totalorder %v4112_v47, %v4677_v45 }
 0x314   : > { %2946 = vmatprep.mubr.msk.f32.mxu1 %vm767_vm1, %v4663_v21  ;;  %vm799_vm1 = vcmp.eq.s32.totalorder %v4119_v54, %v4656_v42 }
 0x317   : > { %2947 = vmatmul.mubr.msk.f32.gmra.mrb[58].mxu1 %vm766_vm2, %v4680_v59  ;;  %vm798_vm2 = vcmp.eq.s32.totalorder %v4119_v54, %v4677_v45 }
 0x318   : > { %2948 = vmatprep.mubr.msk.f32.mxu1 %vm771_vm3, %v4663_v21  ;;  %vm803_vm3 = vcmp.eq.s32.totalorder %v4126_v63, %v4656_v42 }
 0x31b   : > { %2949 = vmatmul.mubr.msk.f32.gmra.mrb[60].mxu1 %vm770_vm4, %v4680_v59  ;;  %vm802_vm4 = vcmp.eq.s32.totalorder %v4126_v63, %v4677_v45 }
 0x31c   : > { %2950 = vmatprep.mubr.msk.f32.mxu1 %vm775_vm5, %v4663_v21  ;;  %vm807_vm5 = vcmp.eq.s32.totalorder %v4133_v2, %v4656_v42 }
 0x31f   : > { %2951 = vmatmul.mubr.msk.f32.gmra.mrb[62].mxu1 %vm774_vm7, %v4680_v59  ;;  %vm806_vm7 = vcmp.eq.s32.totalorder %v4133_v2, %v4677_v45 }
 0x320   : > { %2952 = vmatprep.mubr.msk.f32.mxu1 %vm779_vm8, %v4663_v21  ;;  %vm811_vm8 = vcmp.eq.s32.totalorder %v4143_v8, %v4656_v42 }
 0x323   : > { %2953 = vmatmul.mubr.msk.f32.gmra.mrb[64].mxu1 %vm778_vm6, %v4680_v59  ;;  %vm810_vm6 = vcmp.eq.s32.totalorder %v4143_v8, %v4677_v45 }
 0x324   : > { %2954 = vmatprep.mubr.msk.f32.mxu1 %vm783_vm9, %v4663_v21  ;;  %vm815_vm9 = vcmp.eq.s32.totalorder %v3984_v37, %v4656_v42 }
 0x327   : > { %2955 = vmatmul.mubr.msk.f32.gmra.mrb[66].mxu1 %vm782_vm10, %v4680_v59  ;;  %vm814_vm10 = vcmp.eq.s32.totalorder %v3984_v37, %v4677_v45 }
 0x328   : > { %2956 = vmatprep.mubr.msk.f32.mxu1 %vm787_vm11, %v4663_v21  ;;  %vm819_vm11 = vcmp.eq.s32.totalorder %v3987_v38, %v4656_v42 }
 0x32b   : > { %2957 = vmatmul.mubr.msk.f32.gmra.mrb[68].mxu1 %vm786_vm12, %v4680_v59  ;;  %vm818_vm12 = vcmp.eq.s32.totalorder %v3987_v38, %v4677_v45 }
 0x32c   : > { %2958 = vmatprep.mubr.msk.f32.mxu1 %vm791_vm13, %v4663_v21  ;;  %vm823_vm13 = vcmp.eq.s32.totalorder %v3998_v43, %v4656_v42 }
 0x32f   : > { %2959 = vmatmul.mubr.msk.f32.gmra.mrb[70].mxu1 %vm790_vm14, %v4680_v59  ;;  %vm822_vm14 = vcmp.eq.s32.totalorder %v3998_v43, %v4677_v45 }
 0x330   : > { %2960 = vmatprep.mubr.msk.f32.mxu1 %vm795_vm15, %v4663_v21  ;;  %vm827_vm15 = vcmp.eq.s32.totalorder %v4021_v51, %v4656_v42 }
 0x333   : > { %2961 = vmatmul.mubr.msk.f32.gmra.mrb[72].mxu1 %vm794_vm0, %v4680_v59  ;;  %vm826_vm0 = vcmp.eq.s32.totalorder %v4021_v51, %v4677_v45 }
 0x334   : > { %2962 = vmatprep.mubr.msk.f32.mxu1 %vm799_vm1, %v4663_v21  ;;  %vm831_vm1 = vcmp.eq.s32.totalorder %v4034_v55, %v4656_v42 }
 0x337   : > { %2963 = vmatmul.mubr.msk.f32.gmra.mrb[74].mxu1 %vm798_vm2, %v4680_v59  ;;  %vm830_vm2 = vcmp.eq.s32.totalorder %v4034_v55, %v4677_v45 }
 0x338   : > { %2964 = vmatprep.mubr.msk.f32.mxu1 %vm803_vm3, %v4663_v21  ;;  %vm835_vm3 = vcmp.eq.s32.totalorder %v4046_v61, %v4656_v42 }
 0x33b   : > { %2965 = vmatmul.mubr.msk.f32.gmra.mrb[76].mxu1 %vm802_vm4, %v4680_v59  ;;  %vm834_vm4 = vcmp.eq.s32.totalorder %v4046_v61, %v4677_v45 }
 0x33c   : > { %2966 = vmatprep.mubr.msk.f32.mxu1 %vm807_vm5, %v4663_v21  ;;  %vm839_vm5 = vcmp.eq.s32.totalorder %v4054_v4, %v4656_v42 }
 0x33f   : > { %2967 = vmatmul.mubr.msk.f32.gmra.mrb[78].mxu1 %vm806_vm7, %v4680_v59  ;;  %vm838_vm7 = vcmp.eq.s32.totalorder %v4054_v4, %v4677_v45 }
 0x340   : > { %2968 = vmatprep.mubr.msk.f32.mxu1 %vm811_vm8, %v4663_v21  ;;  %vm843_vm8 = vcmp.eq.s32.totalorder %v4067_v11, %v4656_v42 }
 0x343   : > { %2969 = vmatmul.mubr.msk.f32.gmra.mrb[80].mxu1 %vm810_vm6, %v4680_v59  ;;  %vm842_vm6 = vcmp.eq.s32.totalorder %v4067_v11, %v4677_v45 }
 0x344   : > { %2970 = vmatprep.mubr.msk.f32.mxu1 %vm815_vm9, %v4663_v21  ;;  %vm847_vm9 = vcmp.eq.s32.totalorder %v4084_v18, %v4656_v42 }
 0x347   : > { %2971 = vmatmul.mubr.msk.f32.gmra.mrb[82].mxu1 %vm814_vm10, %v4680_v59  ;;  %vm846_vm10 = vcmp.eq.s32.totalorder %v4084_v18, %v4677_v45 }
 0x348   : > { %2972 = vmatprep.mubr.msk.f32.mxu1 %vm819_vm11, %v4663_v21  ;;  %vm3671_vm11 = vmmov (!%p2988_p13), 0  }
 0x34b   : > { %2973 = vmatmul.mubr.msk.f32.gmra.mrb[84].mxu1 %vm818_vm12, %v4680_v59 }
 0x34c   : > { %2974 = vmatprep.mubr.msk.f32.mxu1 %vm823_vm13, %v4663_v21 }
 0x34f   : > { %2975 = vmatmul.mubr.msk.f32.gmra.mrb[86].mxu1 %vm822_vm14, %v4680_v59 }
 0x350   : > { %2976 = vmatprep.mubr.msk.f32.mxu1 %vm827_vm15, %v4663_v21 }
 0x353   : > { %2977 = vmatmul.mubr.msk.f32.gmra.mrb[88].mxu1 %vm826_vm0, %v4680_v59 }
 0x354   : > { %2978 = vmatprep.mubr.msk.f32.mxu1 %vm831_vm1, %v4663_v21 }
 0x357   : > { %2979 = vmatmul.mubr.msk.f32.gmra.mrb[90].mxu1 %vm830_vm2, %v4680_v59 }
 0x358   : > { %2980 = vmatprep.mubr.msk.f32.mxu1 %vm835_vm3, %v4663_v21 }
 0x35a   : > { %v4812_v28 = vpop.f32.mrb[0].mxu1 }
 0x35b   : > { %2981 = vmatmul.mubr.msk.f32.gmra.mrb[92].mxu1 %vm834_vm4, %v4680_v59  ;;  %v1916_v32 = vpop.f32.mrb[1].mxu1 }
 0x35c   : > { %2982 = vmatprep.mubr.msk.f32.mxu1 %vm839_vm5, %v4663_v21 }
 0x35e   : > { %v4820_v36 = vpop.f32.mrb[2].mxu1 }
 0x35f   : > { %2983 = vmatmul.mubr.msk.f32.gmra.mrb[94].mxu1 %vm838_vm7, %v4680_v59  ;;  %v1921_v37 = vpop.f32.mrb[3].mxu1 }
 0x360   : > { %2984 = vmatprep.mubr.msk.f32.mxu1 %vm843_vm8, %v4663_v21  ;;  %v1826_v37 = vld [vmem:[#allocation3 + $0x18] sm:$0xff] }
 0x362   : > { %v4828_v38 = vpop.f32.mrb[4].mxu1 }
 0x363   : > { %2985 = vmatmul.mubr.msk.f32.gmra.mrb[96].mxu1 %vm842_vm6, %v4680_v59  ;;  %v1926_v39 = vpop.f32.mrb[5].mxu1 }
 0x364   : > { %2986 = vmatprep.mubr.msk.f32.mxu1 %vm847_vm9, %v4663_v21 }
 0x366   : > { %v4834_v43 = vpop.f32.mrb[6].mxu1 }
 0x367   : > { %2987 = vmatmul.mubr.msk.f32.gmra.mrb[98].mxu1 %vm846_vm10, %v4680_v59  ;;  %v1931_v44 = vpop.f32.mrb[7].mxu1 }
 0x36a   : > { %v4837_v51 = vpop.f32.mrb[8].mxu1 }
 0x36b   : > { %v1936_v52 = vpop.f32.mrb[9].mxu1 }
 0x36e   : > { %v4839_v55 = vpop.f32.mrb[10].mxu1 }
 0x36f   : > { %v1941_v56 = vpop.f32.mrb[11].mxu1 }
 0x370   : > { %v1827_v56 = vld [vmem:[#allocation3 + $0x20] sm:$0xff] }
 0x372   : > { %v4841_v61 = vpop.f32.mrb[12].mxu1 }
 0x373   : > { %v1946_v62 = vpop.f32.mrb[13].mxu1 }
 0x376   : > { %v4843_v4 = vpop.f32.mrb[14].mxu1 }
 0x377   : > { %v1951_v5 = vpop.f32.mrb[15].mxu1 }
 0x37a   : > { %v4845_v11 = vpop.f32.mrb[16].mxu1 }
 0x37b   : > { %v1956_v12 = vpop.f32.mrb[17].mxu1 }
 0x37e   : > { %v4847_v18 = vpop.f32.mrb[18].mxu1 }
 0x37f   : > { %v1961_v19 = vpop.f32.mrb[19].mxu1 }
 0x380   : > { %v1828_v19 = vld [vmem:[#allocation3 + $0x28] sm:$0xff] }
 0x382   : > { %v4849_v25 = vpop.f32.mrb[20].mxu1 }
 0x383   : > { %v1966_v33 = vpop.f32.mrb[21].mxu1 }
 0x386   : > { %v4851_v47 = vpop.f32.mrb[22].mxu1 }
 0x387   : > { %v1971_v54 = vpop.f32.mrb[23].mxu1 }
 0x38a   : > { %v4853_v63 = vpop.f32.mrb[24].mxu1 }
 0x38b   : > { %v1976_v2 = vpop.f32.mrb[25].mxu1 }
 0x38e   : > { %v4855_v8 = vpop.f32.mrb[26].mxu1 }
 0x38f   : > { %v1981_v50 = vpop.f32.mrb[27].mxu1 }
 0x390   : > { %v1829_v50 = vld [vmem:[#allocation3 + $0x30] sm:$0xff] }
 0x392   : > { %v4857_v53 = vpop.f32.mrb[28].mxu1 }
 0x393   : > { %v1986_v58 = vpop.f32.mrb[29].mxu1 }
 0x396   : > { %v4859_v60 = vpop.f32.mrb[30].mxu1 }
 0x397   : > { %v1991_v0 = vpop.f32.mrb[31].mxu1 }
 0x39a   : > { %v4861_v6 = vpop.f32.mrb[32].mxu1 }
 0x39b   : > { %v1996_v10 = vpop.f32.mrb[33].mxu1 }
 0x39e   : > { %v4863_v13 = vpop.f32.mrb[34].mxu1 }
 0x39f   : > { %v2001_v14 = vpop.f32.mrb[35].mxu1 }
 0x3a0   : > { %v1830_v14 = vld [vmem:[#allocation3 + $0x38] sm:$0xff] }
 0x3a2   : > { %v4865_v3 = vpop.f32.mrb[36].mxu1 }
 0x3a3   : > { %v2006_v42 = vpop.f32.mrb[37].mxu1 }
 0x3a6   : > { %v4867_v16 = vpop.f32.mrb[38].mxu1 }
 0x3a7   : > { %v2011_v20 = vpop.f32.mrb[39].mxu1 }
 0x3aa   : > { %v4869_v21 = vpop.f32.mrb[40].mxu1 }
 0x3ab   : > { %v2016_v22 = vpop.f32.mrb[41].mxu1 }
 0x3ae   : > { %v4871_v17 = vpop.f32.mrb[42].mxu1 }
 0x3af   : > { %v2021_v1 = vpop.f32.mrb[43].mxu1 }
 0x3b0   : > { %v1831_v1 = vld [vmem:[#allocation3 + $0x40] sm:$0xff] }
 0x3b2   : > { %v4873_v24 = vpop.f32.mrb[44].mxu1 }
 0x3b3   : > { %v2026_v7 = vpop.f32.mrb[45].mxu1 }
 0x3b6   : > { %v4875_v26 = vpop.f32.mrb[46].mxu1 }
 0x3b7   : > { %v2031_v9 = vpop.f32.mrb[47].mxu1 }
 0x3ba   : > { %v4877_v27 = vpop.f32.mrb[48].mxu1 }
 0x3bb   : > { %v2036_v29 = vpop.f32.mrb[49].mxu1 }
 0x3da   : > { %v2104_v34 = vpop.f32.mrb[50].mxu1 }
 0x3db   : > { %v2105_v23 = vadd.f32 %v2104_v34, %v4812_v28  ;;  %v2106_v31 = vpop.f32.mrb[51].mxu1 }
 0x3dd   : > { %v2228_v15 = vadd.f32 %v2105_v23, %v1823_v30  ;;  %v1832_v30 = vld [vmem:[#allocation3 + $0x48] sm:$0xff] }
 0x3de   : > { %v2109_v40 = vpop.f32.mrb[52].mxu1 }
 0x3df   : > { %2253 = vst [vmem:[#allocation3] sm:$0xff] %v2228_v15  ;;  %v2110_v46 = vadd.f32 %v2109_v40, %v4820_v36  ;;  %v2111_v41 = vpop.f32.mrb[53].mxu1  ;;  %v1833_v15 = vld [vmem:[#allocation3 + $0x50] sm:$0xff] }
 0x3e0   : > { %v1834_v41 = vld [vmem:[#allocation3 + $0x58] sm:$0xff] }
 0x3e1   : > { %v2229_v45 = vadd.f32 %v2110_v46, %v1824_v35 }
 0x3e2   : > { %v2114_v48 = vpop.f32.mrb[54].mxu1 }
 0x3e3   : > { %2254 = vst [vmem:[#allocation3 + $0x8] sm:$0xff] %v2229_v45  ;;  %v2115_v49 = vadd.f32 %v2114_v48, %v4828_v38  ;;  %v2116_v59 = vpop.f32.mrb[55].mxu1 }
 0x3e5   : > { %v2230_v32 = vadd.f32 %v2115_v49, %v1825_v57  ;;  %v1835_v49 = vld [vmem:[#allocation3 + $0x60] sm:$0xff] }
 0x3e6   : > { %v2119_v39 = vpop.f32.mrb[56].mxu1 }
 0x3e7   : > { %2255 = vst [vmem:[#allocation3 + $0x10] sm:$0xff] %v2230_v32  ;;  %v2120_v28 = vadd.f32 %v2119_v39, %v4834_v43  ;;  %v2121_v44 = vpop.f32.mrb[57].mxu1  ;;  %v1836_v39 = vld [vmem:[#allocation3 + $0x68] sm:$0xff] }
 0x3e9   : > { %v2231_v52 = vadd.f32 %v2120_v28, %v1826_v37 }
 0x3ea   : > { %v2124_v62 = vpop.f32.mrb[58].mxu1 }
 0x3eb   : > { %2256 = vst [vmem:[#allocation3 + $0x18] sm:$0xff] %v2231_v52  ;;  %v2125_v36 = vadd.f32 %v2124_v62, %v4837_v51  ;;  %v2126_v5 = vpop.f32.mrb[59].mxu1 }
 0x3ed   : > { %v2232_v12 = vadd.f32 %v2125_v36, %v1827_v56  ;;  %v1837_v56 = vld [vmem:[#allocation3 + $0x70] sm:$0xff] }
 0x3ee   : > { %v2129_v33 = vpop.f32.mrb[60].mxu1 }
 0x3ef   : > { %2257 = vst [vmem:[#allocation3 + $0x20] sm:$0xff] %v2232_v12  ;;  %v2130_v38 = vadd.f32 %v2129_v33, %v4839_v55  ;;  %v2131_v54 = vpop.f32.mrb[61].mxu1  ;;  %v1838_v12 = vld [vmem:[#allocation3 + $0x78] sm:$0xff] }
 0x3f0   : > { %v1839_v54 = vld [vmem:[#allocation3 + $0x80] sm:$0xff] }
 0x3f1   : > { %v2233_v2 = vadd.f32 %v2130_v38, %v1828_v19 }
 0x3f2   : > { %v2134_v58 = vpop.f32.mrb[62].mxu1 }
 0x3f3   : > { %2258 = vst [vmem:[#allocation3 + $0x28] sm:$0xff] %v2233_v2  ;;  %v2135_v43 = vadd.f32 %v2134_v58, %v4841_v61  ;;  %v2136_v0 = vpop.f32.mrb[63].mxu1 }
 0x3f5   : > { %v2234_v10 = vadd.f32 %v2135_v43, %v1829_v50  ;;  %v1840_v43 = vld [vmem:[#allocation3 + $0x88] sm:$0xff] }
 0x3f6   : > { %v2139_v42 = vpop.f32.mrb[64].mxu1 }
 0x3f7   : > { %2259 = vst [vmem:[#allocation3 + $0x30] sm:$0xff] %v2234_v10  ;;  %v2140_v51 = vadd.f32 %v2139_v42, %v4843_v4  ;;  %v2141_v20 = vpop.f32.mrb[65].mxu1  ;;  %v1841_v42 = vld [vmem:[#allocation3 + $0x90] sm:$0xff] }
 0x3f9   : > { %v2235_v22 = vadd.f32 %v2140_v51, %v1830_v14 }
 0x3fa   : > { %v2144_v7 = vpop.f32.mrb[66].mxu1 }
 0x3fb   : > { %2260 = vst [vmem:[#allocation3 + $0x38] sm:$0xff] %v2235_v22  ;;  %v2145_v55 = vadd.f32 %v2144_v7, %v4845_v11  ;;  %v2146_v9 = vpop.f32.mrb[67].mxu1 }
 0x3fd   : > { %v2236_v29 = vadd.f32 %v2145_v55, %v1831_v1  ;;  %v1842_v1 = vld [vmem:[#allocation3 + $0x98] sm:$0xff] }
 0x3fe   : > { %v2149_v34 = vpop.f32.mrb[68].mxu1 }
 0x3ff   : > { %2261 = vst [vmem:[#allocation3 + $0x40] sm:$0xff] %v2236_v29  ;;  %v2150_v61 = vadd.f32 %v2149_v34, %v4847_v18  ;;  %v2151_v23 = vpop.f32.mrb[69].mxu1  ;;  %v1843_v29 = vld [vmem:[#allocation3 + $0xa0] sm:$0xff] }
 0x400   : > { %v1844_v23 = vld [vmem:[#allocation3 + $0xa8] sm:$0xff] }
 0x401   : > { %v2237_v31 = vadd.f32 %v2150_v61, %v1832_v30 }
 0x402   : > { %v2154_v35 = vpop.f32.mrb[70].mxu1 }
 0x403   : > { %2262 = vst [vmem:[#allocation3 + $0x48] sm:$0xff] %v2237_v31  ;;  %v2155_v4 = vadd.f32 %v2154_v35, %v4849_v25  ;;  %v2156_v40 = vpop.f32.mrb[71].mxu1 }
 0x405   : > { %v2238_v46 = vadd.f32 %v2155_v4, %v1833_v15  ;;  %v1845_v4 = vld [vmem:[#allocation3 + $0xb0] sm:$0xff] }
 0x406   : > { %v2159_v45 = vpop.f32.mrb[72].mxu1 }
 0x407   : > { %2263 = vst [vmem:[#allocation3 + $0x50] sm:$0xff] %v2238_v46  ;;  %v2160_v11 = vadd.f32 %v2159_v45, %v4851_v47  ;;  %v2161_v57 = vpop.f32.mrb[73].mxu1  ;;  %v1846_v45 = vld [vmem:[#allocation3 + $0xb8] sm:$0xff] }
 0x409   : > { %v2239_v48 = vadd.f32 %v2160_v11, %v1834_v41 }
 0x40a   : > { %v2164_v59 = vpop.f32.mrb[74].mxu1 }
 0x40b   : > { %2264 = vst [vmem:[#allocation3 + $0x58] sm:$0xff] %v2239_v48  ;;  %v2165_v18 = vadd.f32 %v2164_v59, %v4853_v63  ;;  %v2166_v32 = vpop.f32.mrb[75].mxu1 }
 0x40d   : > { %v2240_v37 = vadd.f32 %v2165_v18, %v1835_v49  ;;  %v1847_v49 = vld [vmem:[#allocation3 + $0xc0] sm:$0xff] }
 0x40e   : > { %v2169_v28 = vpop.f32.mrb[76].mxu1 }
 0x40f   : > { %2265 = vst [vmem:[#allocation3 + $0x60] sm:$0xff] %v2240_v37  ;;  %v2170_v25 = vadd.f32 %v2169_v28, %v4855_v8  ;;  %v2171_v44 = vpop.f32.mrb[77].mxu1  ;;  %v2308_v37 = vld [vmem:[%s3956_s29 + $0x8] sm:$0xff] (!%p2988_p13) }
 0x411   : > { %v2241_v52 = vadd.f32 %v2170_v25, %v1836_v39  ;;  %v3670_v39 = vmov (!%p2988_p13), 0.0|0.0   ;;  %v3672_v25 = vmov (!%p2988_p13), 0.0  }
 0x412   : > { %v2174_v62 = vpop.f32.mrb[78].mxu1  ;;  %3276 = vmatprep.subr.bf16.mxu0 (!%p2988_p13), %v3670_v39  ;;  %3300 = vmatprep.subr.bf16.mxu1 (!%p2988_p13), %v3670_v39 }
 0x413   : > { %2266 = vst [vmem:[#allocation3 + $0x68] sm:$0xff] %v2241_v52  ;;  %v2175_v47 = vadd.f32 %v2174_v62, %v4857_v53  ;;  %v2176_v36 = vpop.f32.mrb[79].mxu1  ;;  %3069 = vmatprep.mubr.msk.f32.mxu0 (!%p2988_p13), %vm3671_vm11, %v3672_v25  ;;  %3108 = vmatprep.mubr.msk.f32.mxu1 (!%p2988_p13), %vm3671_vm11, %v3672_v25  ;;  %v2311_v52 = vld [vmem:[%s3956_s29 + $0x20] sm:$0xff] (!%p2988_p13) }
 0x414   : > { %v2314_v36 = vld [vmem:[%s3956_s29 + $0x38] sm:$0xff] (!%p2988_p13) }
 0x415   : > { %v2242_v5 = vadd.f32 %v2175_v47, %v1837_v56  ;;  %v2312_v56 = vld [vmem:[%s3956_s29 + $0x28] sm:$0xff] (!%p2988_p13)  ;;  %v2313_v47 = vld [vmem:[%s3956_s29 + $0x30] sm:$0xff] (!%p2988_p13) }
 0x416   : > { %v2179_v19 = vpop.f32.mrb[80].mxu1  ;;  %v3283_v62 = vpack.c.bf16 (!%p2988_p13), %v2312_v56, %v2311_v52 }
 0x417   : > { %2267 = vst [vmem:[#allocation3 + $0x70] sm:$0xff] %v2242_v5  ;;  %v2180_v63 = vadd.f32 %v2179_v19, %v4859_v60  ;;  %v2181_v33 = vpop.f32.mrb[81].mxu1  ;;  %v3286_v5 = vpack.c.bf16 (!%p2988_p13), %v2314_v36, %v2313_v47  ;;  %v2316_v19 = vld [vmem:[%s3956_s29 + $0x48] sm:$0xff] (!%p2988_p13) }
 0x418   : > { %v2317_v33 = vld [vmem:[%s3956_s29 + $0x50] sm:$0xff] (!%p2988_p13) }
 0x419   : > { %v2243_v38 = vadd.f32 %v2180_v63, %v1838_v12  ;;  %v2315_v12 = vld [vmem:[%s3956_s29 + $0x40] sm:$0xff] (!%p2988_p13) }
 0x41a   : > { %v2184_v2 = vpop.f32.mrb[82].mxu1  ;;  %v3289_v63 = vpack.c.bf16 (!%p2988_p13), %v2316_v19, %v2315_v12 }
 0x41b   : > { %2268 = vst [vmem:[#allocation3 + $0x78] sm:$0xff] %v2243_v38  ;;  %v2185_v8 = vadd.f32 %v2184_v2, %v4861_v6  ;;  %v2186_v50 = vpop.f32.mrb[83].mxu1  ;;  %v2318_v38 = vld [vmem:[%s3956_s29 + $0x58] sm:$0xff] (!%p2988_p13)  ;;  %v2319_v2 = vld [vmem:[%s3956_s29 + $0x60] sm:$0xff] (!%p2988_p13) }
 0x41d   : > { %v2244_v58 = vadd.f32 %v2185_v8, %v1839_v54  ;;  %v3292_v54 = vpack.c.bf16 (!%p2988_p13), %v2318_v38, %v2317_v33  ;;  %v2320_v8 = vld [vmem:[%s3956_s29 + $0x68] sm:$0xff] (!%p2988_p13) }
 0x41e   : > { %v2189_v0 = vpop.f32.mrb[84].mxu1  ;;  %v3295_v50 = vpack.c.bf16 (!%p2988_p13), %v2320_v8, %v2319_v2 }
 0x41f   : > { %2269 = vst [vmem:[#allocation3 + $0x80] sm:$0xff] %v2244_v58  ;;  %v2190_v53 = vadd.f32 %v2189_v0, %v4863_v13  ;;  %v2191_v10 = vpop.f32.mrb[85].mxu1  ;;  %v2321_v58 = vld [vmem:[%s3956_s29 + $0x70] sm:$0xff] (!%p2988_p13) }
 0x420   : > { %v2295_v10 = vld [vmem:[#allocation3 + $0x68] sm:$0xff] (!%p2988_p13) }
 0x421   : > { %v2245_v14 = vadd.f32 %v2190_v53, %v1840_v43  ;;  %v2322_v43 = vld [vmem:[%s3956_s29 + $0x78] sm:$0xff] (!%p2988_p13)  ;;  %v2282_v53 = vld [vmem:[#allocation3] sm:$0xff] (!%p2988_p13) }
 0x422   : > { %v2194_v51 = vpop.f32.mrb[86].mxu1  ;;  %v3298_v0 = vpack.c.bf16 (!%p2988_p13), %v2322_v43, %v2321_v58 }
 0x423   : > { %2270 = vst [vmem:[#allocation3 + $0x88] sm:$0xff] %v2245_v14  ;;  %v2195_v60 = vadd.f32 %v2194_v51, %v4865_v3  ;;  %v2196_v20 = vpop.f32.mrb[87].mxu1  ;;  %v2283_v14 = vld [vmem:[#allocation3 + $0x8] sm:$0xff] (!%p2988_p13)  ;;  %v2284_v51 = vld [vmem:[#allocation3 + $0x10] sm:$0xff] (!%p2988_p13) }
 0x424   : > { %v2285_v20 = vld [vmem:[#allocation3 + $0x18] sm:$0xff] (!%p2988_p13) }
 0x425   : > { %v2246_v22 = vadd.f32 %v2195_v60, %v1841_v42  ;;  %v2296_v42 = vld [vmem:[#allocation3 + $0x70] sm:$0xff] (!%p2988_p13)  ;;  %v2297_v60 = vld [vmem:[#allocation3 + $0x78] sm:$0xff] (!%p2988_p13) }
 0x426   : > { %v2199_v7 = vpop.f32.mrb[88].mxu1 }
 0x427   : > { %2271 = vst [vmem:[#allocation3 + $0x90] sm:$0xff] %v2246_v22  ;;  %v2200_v6 = vadd.f32 %v2199_v7, %v4867_v16  ;;  %v2201_v55 = vpop.f32.mrb[89].mxu1  ;;  %v2298_v22 = vld [vmem:[#allocation3 + $0x80] sm:$0xff] (!%p2988_p13) }
 0x429   : > { %v2247_v9 = vadd.f32 %v2200_v6, %v1842_v1  ;;  %v2286_v1 = vld [vmem:[#allocation3 + $0x20] sm:$0xff] (!%p2988_p13)  ;;  %v2287_v6 = vld [vmem:[#allocation3 + $0x28] sm:$0xff] (!%p2988_p13) }
 0x42a   : > { %v2204_v30 = vpop.f32.mrb[90].mxu1  ;;  %v2299_v7 = vld [vmem:[#allocation3 + $0x88] sm:$0xff] (!%p2988_p13) }
 0x42b   : > { %2272 = vst [vmem:[#allocation3 + $0x98] sm:$0xff] %v2247_v9  ;;  %v2205_v13 = vadd.f32 %v2204_v30, %v4869_v21  ;;  %v2206_v34 = vpop.f32.mrb[91].mxu1  ;;  %v2288_v9 = vld [vmem:[#allocation3 + $0x30] sm:$0xff] (!%p2988_p13)  ;;  %v2289_v30 = vld [vmem:[#allocation3 + $0x38] sm:$0xff] (!%p2988_p13) }
 0x42c   : > { %v2290_v34 = vld [vmem:[#allocation3 + $0x40] sm:$0xff] (!%p2988_p13) }
 0x42d   : > { %v2248_v61 = vadd.f32 %v2205_v13, %v1843_v29 }
 0x42e   : > { %v2209_v31 = vpop.f32.mrb[92].mxu1  ;;  %v2300_v55 = vld [vmem:[#allocation3 + $0x90] sm:$0xff] (!%p2988_p13) }
 0x42f   : > { %2273 = vst [vmem:[#allocation3 + $0xa0] sm:$0xff] %v2248_v61  ;;  %v2210_v3 = vadd.f32 %v2209_v31, %v4871_v17  ;;  %v2211_v15 = vpop.f32.mrb[93].mxu1 }
 0x431   : > { %v2249_v35 = vadd.f32 %v2210_v3, %v1844_v23  ;;  %v2291_v23 = vld [vmem:[#allocation3 + $0x48] sm:$0xff] (!%p2988_p13)  ;;  %v2292_v3 = vld [vmem:[#allocation3 + $0x50] sm:$0xff] (!%p2988_p13) }
 0x432   : > { %v2214_v40 = vpop.f32.mrb[94].mxu1  ;;  %v2301_v29 = vld [vmem:[#allocation3 + $0x98] sm:$0xff] (!%p2988_p13) }
 0x433   : > { %2274 = vst [vmem:[#allocation3 + $0xa8] sm:$0xff] %v2249_v35  ;;  %v2215_v16 = vadd.f32 %v2214_v40, %v4873_v24  ;;  %v2216_v46 = vpop.f32.mrb[95].mxu1  ;;  %v2307_v24 = vld [vmem:[%s3956_s29] sm:$0xff] (!%p2988_p13)  ;;  %v2293_v35 = vld [vmem:[#allocation3 + $0x58] sm:$0xff] (!%p2988_p13)  ;;  %v2294_v40 = vld [vmem:[#allocation3 + $0x60] sm:$0xff] (!%p2988_p13) }
 0x434   : > { %v3277_v28 = vpack.c.bf16 (!%p2988_p13), %v2308_v37, %v2307_v24 }
 0x435   : > { %v2250_v41 = vadd.f32 %v2215_v16, %v1845_v4  ;;  %v4976_v16 = vld [vmem:[%s280_s23] ss:$0 sm:$0xff] (!%p2988_p13) }
 0x436   : > { %v2219_v11 = vpop.f32.mrb[96].mxu1  ;;  %3278 = vmatpush3.bf16.msra.mxu0 (!%p2988_p13), %v3277_v28  ;;  %3308 = vmatpush3.bf16.msra.mxu1 (!%p2988_p13), %v3277_v28  ;;  %v2302_v13 = vld [vmem:[#allocation3 + $0xa0] sm:$0xff] (!%p2988_p13) }
 0x437   : > { %2275 = vst [vmem:[#allocation3 + $0xb0] sm:$0xff] %v2250_v41  ;;  %v2220_v21 = vadd.f32 %v2219_v11, %v4875_v26  ;;  %v2221_v57 = vpop.f32.mrb[97].mxu1  ;;  %v2309_v26 = vld [vmem:[%s3956_s29 + $0x10] sm:$0xff] (!%p2988_p13)  ;;  %3279 = vmatprep.subr.bf16.mxu0 (!%p2988_p13), %v3670_v39  ;;  %3301 = vmatprep.subr.bf16.mxu1 (!%p2988_p13), %v3670_v39 }
 0x439   : > { %v2251_v48 = vadd.f32 %v2220_v21, %v1846_v45  ;;  %2281 = sbr.rel (%p2988_p13) target bundleno = 1378 (0x562), region = 60 }
 0x43a   : > { %v2224_v59 = vpop.f32.mrb[98].mxu1  ;;  %v2303_v61 = vld [vmem:[#allocation3 + $0xa8] sm:$0xff] (!%p2988_p13) }
 0x43b   : > { %2276 = vst [vmem:[#allocation3 + $0xb8] sm:$0xff] %v2251_v48  ;;  %v2225_v17 = vadd.f32 %v2224_v59, %v4877_v27  ;;  %v2226_v18 = vpop.f32.mrb[99].mxu1  ;;  %v2310_v27 = vld [vmem:[%s3956_s29 + $0x18] sm:$0xff] (!%p2988_p13) }
 0x43c   : > { %v3280_v44 = vpack.c.bf16 (!%p2988_p13), %v2310_v27, %v2309_v26 }
 0x43d   : > { %v2252_v32 = vadd.f32 %v2225_v17, %v1847_v49 }
 0x43e   : > { %3281 = vmatpush3.bf16.msra.mxu0 (!%p2988_p13), %v3280_v44  ;;  %3309 = vmatpush3.bf16.msra.mxu1 (!%p2988_p13), %v3280_v44  ;;  %v2304_v31 = vld [vmem:[#allocation3 + $0xb0] sm:$0xff] (!%p2988_p13) }
 0x43f   : > { %2277 = vst [vmem:[#allocation3 + $0xc0] sm:$0xff] %v2252_v32  ;;  %3282 = vmatprep.subr.bf16.mxu0 (!%p2988_p13), %v3670_v39  ;;  %3302 = vmatprep.subr.bf16.mxu1 (!%p2988_p13), %v3670_v39 }
 0x442   : > { %3284 = vmatpush3.bf16.msra.mxu0 %v3283_v62  ;;  %3310 = vmatpush3.bf16.msra.mxu1 %v3283_v62  ;;  %v2305_v15 = vld [vmem:[#allocation3 + $0xb8] sm:$0xff] }
 0x443   : > { %3285 = vmatprep.subr.bf16.mxu0 %v3670_v39  ;;  %3303 = vmatprep.subr.bf16.mxu1 %v3670_v39 }
 0x446   : > { %3287 = vmatpush3.bf16.msra.mxu0 %v3286_v5  ;;  %3311 = vmatpush3.bf16.msra.mxu1 %v3286_v5  ;;  %v2306_v4 = vld [vmem:[#allocation3 + $0xc0] sm:$0xff] }
 0x447   : > { %3288 = vmatprep.subr.bf16.mxu0 %v3670_v39  ;;  %3304 = vmatprep.subr.bf16.mxu1 %v3670_v39 }
 0x44a   : > { %3290 = vmatpush3.bf16.msra.mxu0 %v3289_v63  ;;  %3312 = vmatpush3.bf16.msra.mxu1 %v3289_v63 }
 0x44b   : > { %3291 = vmatprep.subr.bf16.mxu0 %v3670_v39  ;;  %3305 = vmatprep.subr.bf16.mxu1 %v3670_v39 }
 0x44e   : > { %3293 = vmatpush3.bf16.msra.mxu0 %v3292_v54  ;;  %3313 = vmatpush3.bf16.msra.mxu1 %v3292_v54 }
 0x44f   : > { %3294 = vmatprep.subr.bf16.mxu0 %v3670_v39  ;;  %3306 = vmatprep.subr.bf16.mxu1 %v3670_v39 }
 0x452   : > { %3296 = vmatpush3.bf16.msra.mxu0 %v3295_v50  ;;  %3314 = vmatpush3.bf16.msra.mxu1 %v3295_v50 }
 0x453   : > { %3297 = vmatprep.subr.bf16.mxu0 %v3670_v39  ;;  %3307 = vmatprep.subr.bf16.mxu1 %v3670_v39 }
 0x456   : > { %3299 = vmatpush3.bf16.msra.mxu0 %v3298_v0  ;;  %3315 = vmatpush3.bf16.msra.mxu1 %v3298_v0 }
 0x459   : > { %3070 = vmatmul.mubr.f32.vlgmr.msra.gmra.mrb[0].mxu0 %v2282_v53  ;;  %3109 = vmatmul.mubr.f32.vlgmr.msra.gmra.mrb[0].mxu1 %v2295_v10 }
 0x45a   : > { %3072 = vmatprep.mubr.msk.f32.mxu0 %vm3671_vm11, %v3672_v25  ;;  %3111 = vmatprep.mubr.msk.f32.mxu1 %vm3671_vm11, %v3672_v25 }
 0x45d   : > { %3073 = vmatmul.mubr.f32.gmra.mrb[2].mxu0 %v2283_v14  ;;  %3112 = vmatmul.mubr.f32.gmra.mrb[2].mxu1 %v2296_v42 }
 0x45e   : > { %3075 = vmatprep.mubr.msk.f32.mxu0 %vm3671_vm11, %v3672_v25  ;;  %3114 = vmatprep.mubr.msk.f32.mxu1 %vm3671_vm11, %v3672_v25 }
 0x461   : > { %3076 = vmatmul.mubr.f32.gmra.mrb[4].mxu0 %v2284_v51  ;;  %3115 = vmatmul.mubr.f32.gmra.mrb[4].mxu1 %v2297_v60 }
 0x462   : > { %3078 = vmatprep.mubr.msk.f32.mxu0 %vm3671_vm11, %v3672_v25  ;;  %3117 = vmatprep.mubr.msk.f32.mxu1 %vm3671_vm11, %v3672_v25 }
 0x465   : > { %3079 = vmatmul.mubr.f32.gmra.mrb[6].mxu0 %v2285_v20  ;;  %3118 = vmatmul.mubr.f32.gmra.mrb[6].mxu1 %v2298_v22 }
 0x466   : > { %3081 = vmatprep.mubr.msk.f32.mxu0 %vm3671_vm11, %v3672_v25  ;;  %3120 = vmatprep.mubr.msk.f32.mxu1 %vm3671_vm11, %v3672_v25 }
 0x469   : > { %3082 = vmatmul.mubr.f32.gmra.mrb[8].mxu0 %v2286_v1  ;;  %3121 = vmatmul.mubr.f32.gmra.mrb[8].mxu1 %v2299_v7 }
 0x46a   : > { %3084 = vmatprep.mubr.msk.f32.mxu0 %vm3671_vm11, %v3672_v25  ;;  %3123 = vmatprep.mubr.msk.f32.mxu1 %vm3671_vm11, %v3672_v25 }
 0x46d   : > { %3085 = vmatmul.mubr.f32.gmra.mrb[10].mxu0 %v2287_v6  ;;  %3124 = vmatmul.mubr.f32.gmra.mrb[10].mxu1 %v2300_v55 }
 0x46e   : > { %3087 = vmatprep.mubr.msk.f32.mxu0 %vm3671_vm11, %v3672_v25  ;;  %3126 = vmatprep.mubr.msk.f32.mxu1 %vm3671_vm11, %v3672_v25 }
 0x471   : > { %3088 = vmatmul.mubr.f32.gmra.mrb[12].mxu0 %v2288_v9  ;;  %3127 = vmatmul.mubr.f32.gmra.mrb[12].mxu1 %v2301_v29 }
 0x472   : > { %3090 = vmatprep.mubr.msk.f32.mxu0 %vm3671_vm11, %v3672_v25  ;;  %3129 = vmatprep.mubr.msk.f32.mxu1 %vm3671_vm11, %v3672_v25 }
 0x475   : > { %3091 = vmatmul.mubr.f32.gmra.mrb[14].mxu0 %v2289_v30  ;;  %3130 = vmatmul.mubr.f32.gmra.mrb[14].mxu1 %v2302_v13 }
 0x476   : > { %3093 = vmatprep.mubr.msk.f32.mxu0 %vm3671_vm11, %v3672_v25  ;;  %3132 = vmatprep.mubr.msk.f32.mxu1 %vm3671_vm11, %v3672_v25 }
 0x479   : > { %3094 = vmatmul.mubr.f32.gmra.mrb[16].mxu0 %v2290_v34  ;;  %3133 = vmatmul.mubr.f32.gmra.mrb[16].mxu1 %v2303_v61 }
 0x47a   : > { %3096 = vmatprep.mubr.msk.f32.mxu0 %vm3671_vm11, %v3672_v25  ;;  %3135 = vmatprep.mubr.msk.f32.mxu1 %vm3671_vm11, %v3672_v25 }
 0x47d   : > { %3097 = vmatmul.mubr.f32.gmra.mrb[18].mxu0 %v2291_v23  ;;  %3136 = vmatmul.mubr.f32.gmra.mrb[18].mxu1 %v2304_v31 }
 0x47e   : > { %3099 = vmatprep.mubr.msk.f32.mxu0 %vm3671_vm11, %v3672_v25  ;;  %3138 = vmatprep.mubr.msk.f32.mxu1 %vm3671_vm11, %v3672_v25 }
 0x481   : > { %3100 = vmatmul.mubr.f32.gmra.mrb[20].mxu0 %v2292_v3  ;;  %3139 = vmatmul.mubr.f32.gmra.mrb[20].mxu1 %v2305_v15 }
 0x482   : > { %3102 = vmatprep.mubr.msk.f32.mxu0 %vm3671_vm11, %v3672_v25  ;;  %3141 = vmatprep.mubr.msk.f32.mxu1 %vm3671_vm11, %v3672_v25 }
 0x485   : > { %3103 = vmatmul.mubr.f32.gmra.mrb[22].mxu0 %v2293_v35  ;;  %3142 = vmatmul.mubr.f32.gmra.mrb[22].mxu1 %v2306_v4 }
 0x486   : > { %3105 = vmatprep.mubr.msk.f32.mxu0 %vm3671_vm11, %v3672_v25 }
 0x489   : > { %3106 = vmatmul.mubr.f32.gmra.mrb[24].mxu0 %v2294_v40 }
 0x52c   : > { %v2396_v46 = vpop.f32.mrb[0].mxu0  ;;  %v2461_v41 = vpop.f32.mrb[0].mxu1 }
 0x52d   : > { %v2397_v45 = vadd.f32 %v4976_v16, %v2396_v46  ;;  %v3071_v11 = vpop.f32.mrb[1].mxu0  ;;  %v2462_v21 = vadd.f32 %v4976_v16, %v2461_v41  ;;  %v3110_v57 = vpop.f32.mrb[1].mxu1 }
 0x52f   : > { %v2520_v48 = vmax.f32 %v2397_v45, 0.0  ;;  %v2533_v49 = vmax.f32 %v2462_v21, 0.0 }
 0x530   : > { %v2401_v59 = vpop.f32.mrb[2].mxu0  ;;  %v2466_v17 = vpop.f32.mrb[2].mxu1 }
 0x531   : > { %2545 = vst [vmem:[#allocation2] sm:$0xff] %v2520_v48  ;;  %2570 = vst [vmem:[#allocation10] sm:$0xff] %v2520_v48  ;;  %v2402_v18 = vadd.f32 %v4976_v16, %v2401_v59  ;;  %v3074_v32 = vpop.f32.mrb[3].mxu0  ;;  %v2467_v24 = vadd.f32 %v4976_v16, %v2466_v17  ;;  %v3113_v37 = vpop.f32.mrb[3].mxu1 }
 0x532   : > { %2558 = vst [vmem:[#allocation2 + $0x68] sm:$0xff] %v2533_v49  ;;  %2583 = vst [vmem:[#allocation10 + $0x68] sm:$0xff] %v2533_v49 }
 0x533   : > { %v2521_v26 = vmax.f32 %v2402_v18, 0.0  ;;  %v2534_v39 = vmax.f32 %v2467_v24, 0.0 }
 0x534   : > { %v2406_v28 = vpop.f32.mrb[4].mxu0  ;;  %v2471_v27 = vpop.f32.mrb[4].mxu1 }
 0x535   : > { %2546 = vst [vmem:[#allocation2 + $0x8] sm:$0xff] %v2521_v26  ;;  %2571 = vst [vmem:[#allocation10 + $0x8] sm:$0xff] %v2521_v26  ;;  %v2407_v25 = vadd.f32 %v4976_v16, %v2406_v28  ;;  %v3077_v44 = vpop.f32.mrb[5].mxu0  ;;  %v2472_v52 = vadd.f32 %v4976_v16, %v2471_v27  ;;  %v3116_v56 = vpop.f32.mrb[5].mxu1 }
 0x536   : > { %2559 = vst [vmem:[#allocation2 + $0x70] sm:$0xff] %v2534_v39  ;;  %2584 = vst [vmem:[#allocation10 + $0x70] sm:$0xff] %v2534_v39 }
 0x537   : > { %v2522_v62 = vmax.f32 %v2407_v25, 0.0  ;;  %v2535_v47 = vmax.f32 %v2472_v52, 0.0 }
 0x538   : > { %v2411_v36 = vpop.f32.mrb[6].mxu0  ;;  %v2476_v5 = vpop.f32.mrb[6].mxu1 }
 0x539   : > { %2547 = vst [vmem:[#allocation2 + $0x10] sm:$0xff] %v2522_v62  ;;  %2572 = vst [vmem:[#allocation10 + $0x10] sm:$0xff] %v2522_v62  ;;  %v2412_v12 = vadd.f32 %v4976_v16, %v2411_v36  ;;  %v3080_v19 = vpop.f32.mrb[7].mxu0  ;;  %v2477_v63 = vadd.f32 %v4976_v16, %v2476_v5  ;;  %v3119_v33 = vpop.f32.mrb[7].mxu1 }
 0x53a   : > { %2560 = vst [vmem:[#allocation2 + $0x78] sm:$0xff] %v2535_v47  ;;  %2585 = vst [vmem:[#allocation10 + $0x78] sm:$0xff] %v2535_v47 }
 0x53b   : > { %v2523_v38 = vmax.f32 %v2412_v12, 0.0  ;;  %v2536_v54 = vmax.f32 %v2477_v63, 0.0 }
 0x53c   : > { %v2416_v2 = vpop.f32.mrb[8].mxu0  ;;  %v2481_v8 = vpop.f32.mrb[8].mxu1 }
 0x53d   : > { %2548 = vst [vmem:[#allocation2 + $0x18] sm:$0xff] %v2523_v38  ;;  %2573 = vst [vmem:[#allocation10 + $0x18] sm:$0xff] %v2523_v38  ;;  %v2417_v50 = vadd.f32 %v4976_v16, %v2416_v2  ;;  %v3083_v58 = vpop.f32.mrb[9].mxu0  ;;  %v2482_v43 = vadd.f32 %v4976_v16, %v2481_v8  ;;  %v3122_v0 = vpop.f32.mrb[9].mxu1 }
 0x53e   : > { %2561 = vst [vmem:[#allocation2 + $0x80] sm:$0xff] %v2536_v54  ;;  %2586 = vst [vmem:[#allocation10 + $0x80] sm:$0xff] %v2536_v54 }
 0x53f   : > { %v2524_v53 = vmax.f32 %v2417_v50, 0.0  ;;  %v2537_v10 = vmax.f32 %v2482_v43, 0.0 }
 0x540   : > { %v2421_v14 = vpop.f32.mrb[10].mxu0  ;;  %v2486_v42 = vpop.f32.mrb[10].mxu1 }
 0x541   : > { %2549 = vst [vmem:[#allocation2 + $0x20] sm:$0xff] %v2524_v53  ;;  %2574 = vst [vmem:[#allocation10 + $0x20] sm:$0xff] %v2524_v53  ;;  %v2422_v51 = vadd.f32 %v4976_v16, %v2421_v14  ;;  %v3086_v60 = vpop.f32.mrb[11].mxu0  ;;  %v2487_v20 = vadd.f32 %v4976_v16, %v2486_v42  ;;  %v3125_v22 = vpop.f32.mrb[11].mxu1 }
 0x542   : > { %2562 = vst [vmem:[#allocation2 + $0x88] sm:$0xff] %v2537_v10  ;;  %2587 = vst [vmem:[#allocation10 + $0x88] sm:$0xff] %v2537_v10 }
 0x543   : > { %v2525_v1 = vmax.f32 %v2422_v51, 0.0  ;;  %v2538_v7 = vmax.f32 %v2487_v20, 0.0 }
 0x544   : > { %v2426_v6 = vpop.f32.mrb[12].mxu0  ;;  %v2491_v55 = vpop.f32.mrb[12].mxu1 }
 0x545   : > { %2550 = vst [vmem:[#allocation2 + $0x28] sm:$0xff] %v2525_v1  ;;  %2575 = vst [vmem:[#allocation10 + $0x28] sm:$0xff] %v2525_v1  ;;  %v2427_v9 = vadd.f32 %v4976_v16, %v2426_v6  ;;  %v3089_v29 = vpop.f32.mrb[13].mxu0  ;;  %v2492_v30 = vadd.f32 %v4976_v16, %v2491_v55  ;;  %v3128_v13 = vpop.f32.mrb[13].mxu1 }
 0x546   : > { %2563 = vst [vmem:[#allocation2 + $0x90] sm:$0xff] %v2538_v7  ;;  %2588 = vst [vmem:[#allocation10 + $0x90] sm:$0xff] %v2538_v7 }
 0x547   : > { %v2526_v34 = vmax.f32 %v2427_v9, 0.0  ;;  %v2539_v61 = vmax.f32 %v2492_v30, 0.0 }
 0x548   : > { %v2431_v23 = vpop.f32.mrb[14].mxu0  ;;  %v2496_v31 = vpop.f32.mrb[14].mxu1 }
 0x549   : > { %2551 = vst [vmem:[#allocation2 + $0x30] sm:$0xff] %v2526_v34  ;;  %2576 = vst [vmem:[#allocation10 + $0x30] sm:$0xff] %v2526_v34  ;;  %v2432_v3 = vadd.f32 %v4976_v16, %v2431_v23  ;;  %v3092_v15 = vpop.f32.mrb[15].mxu0  ;;  %v2497_v35 = vadd.f32 %v4976_v16, %v2496_v31  ;;  %v3131_v4 = vpop.f32.mrb[15].mxu1 }
 0x54a   : > { %2564 = vst [vmem:[#allocation2 + $0x98] sm:$0xff] %v2539_v61  ;;  %2589 = vst [vmem:[#allocation10 + $0x98] sm:$0xff] %v2539_v61 }
 0x54b   : > { %v2527_v40 = vmax.f32 %v2432_v3, 0.0  ;;  %v2540_v46 = vmax.f32 %v2497_v35, 0.0 }
 0x54c   : > { %v2436_v41 = vpop.f32.mrb[16].mxu0  ;;  %v2501_v45 = vpop.f32.mrb[16].mxu1 }
 0x54d   : > { %2552 = vst [vmem:[#allocation2 + $0x38] sm:$0xff] %v2527_v40  ;;  %2577 = vst [vmem:[#allocation10 + $0x38] sm:$0xff] %v2527_v40  ;;  %v2437_v11 = vadd.f32 %v4976_v16, %v2436_v41  ;;  %v3095_v21 = vpop.f32.mrb[17].mxu0  ;;  %v2502_v57 = vadd.f32 %v4976_v16, %v2501_v45  ;;  %v3134_v48 = vpop.f32.mrb[17].mxu1 }
 0x54e   : > { %2565 = vst [vmem:[#allocation2 + $0xa0] sm:$0xff] %v2540_v46  ;;  %2590 = vst [vmem:[#allocation10 + $0xa0] sm:$0xff] %v2540_v46 }
 0x54f   : > { %v2528_v49 = vmax.f32 %v2437_v11, 0.0  ;;  %v2541_v59 = vmax.f32 %v2502_v57, 0.0 }
 0x550   : > { %v2441_v17 = vpop.f32.mrb[18].mxu0  ;;  %v2506_v18 = vpop.f32.mrb[18].mxu1 }
 0x551   : > { %2553 = vst [vmem:[#allocation2 + $0x40] sm:$0xff] %v2528_v49  ;;  %2578 = vst [vmem:[#allocation10 + $0x40] sm:$0xff] %v2528_v49  ;;  %v2442_v32 = vadd.f32 %v4976_v16, %v2441_v17  ;;  %v3098_v24 = vpop.f32.mrb[19].mxu0  ;;  %v2507_v37 = vadd.f32 %v4976_v16, %v2506_v18  ;;  %v3137_v26 = vpop.f32.mrb[19].mxu1 }
 0x552   : > { %2566 = vst [vmem:[#allocation2 + $0xa8] sm:$0xff] %v2541_v59  ;;  %2591 = vst [vmem:[#allocation10 + $0xa8] sm:$0xff] %v2541_v59 }
 0x553   : > { %v2529_v39 = vmax.f32 %v2442_v32, 0.0  ;;  %v2542_v28 = vmax.f32 %v2507_v37, 0.0 }
 0x554   : > { %v2446_v27 = vpop.f32.mrb[20].mxu0  ;;  %v2511_v25 = vpop.f32.mrb[20].mxu1 }
 0x555   : > { %2554 = vst [vmem:[#allocation2 + $0x48] sm:$0xff] %v2529_v39  ;;  %2579 = vst [vmem:[#allocation10 + $0x48] sm:$0xff] %v2529_v39  ;;  %v2447_v44 = vadd.f32 %v4976_v16, %v2446_v27  ;;  %v3101_v52 = vpop.f32.mrb[21].mxu0  ;;  %v2512_v56 = vadd.f32 %v4976_v16, %v2511_v25  ;;  %v3140_v62 = vpop.f32.mrb[21].mxu1 }
 0x556   : > { %2567 = vst [vmem:[#allocation2 + $0xb0] sm:$0xff] %v2542_v28  ;;  %2592 = vst [vmem:[#allocation10 + $0xb0] sm:$0xff] %v2542_v28 }
 0x557   : > { %v2530_v47 = vmax.f32 %v2447_v44, 0.0  ;;  %v2543_v36 = vmax.f32 %v2512_v56, 0.0 }
 0x558   : > { %v2451_v5 = vpop.f32.mrb[22].mxu0  ;;  %v2516_v12 = vpop.f32.mrb[22].mxu1 }
 0x559   : > { %2555 = vst [vmem:[#allocation2 + $0x50] sm:$0xff] %v2530_v47  ;;  %2580 = vst [vmem:[#allocation10 + $0x50] sm:$0xff] %v2530_v47  ;;  %v2452_v19 = vadd.f32 %v4976_v16, %v2451_v5  ;;  %v3104_v63 = vpop.f32.mrb[23].mxu0  ;;  %v2517_v33 = vadd.f32 %v4976_v16, %v2516_v12  ;;  %v3143_v38 = vpop.f32.mrb[23].mxu1 }
 0x55a   : > { %2568 = vst [vmem:[#allocation2 + $0xb8] sm:$0xff] %v2543_v36  ;;  %2593 = vst [vmem:[#allocation10 + $0xb8] sm:$0xff] %v2543_v36 }
 0x55b   : > { %v2531_v54 = vmax.f32 %v2452_v19, 0.0  ;;  %v2544_v2 = vmax.f32 %v2517_v33, 0.0 }
 0x55c   : > { %v2456_v8 = vpop.f32.mrb[24].mxu0 }
 0x55d   : > { %2556 = vst [vmem:[#allocation2 + $0x58] sm:$0xff] %v2531_v54  ;;  %2581 = vst [vmem:[#allocation10 + $0x58] sm:$0xff] %v2531_v54  ;;  %v2457_v50 = vadd.f32 %v4976_v16, %v2456_v8  ;;  %v3107_v58 = vpop.f32.mrb[25].mxu0 }
 0x55e   : > { %2569 = vst [vmem:[#allocation2 + $0xc0] sm:$0xff] %v2544_v2  ;;  %2594 = vst [vmem:[#allocation10 + $0xc0] sm:$0xff] %v2544_v2 }
 0x55f   : > { %v2532_v43 = vmax.f32 %v2457_v50, 0.0 }
 0x561   : > { %2557 = vst [vmem:[#allocation2 + $0x60] sm:$0xff] %v2532_v43  ;;  %2582 = vst [vmem:[#allocation10 + $0x60] sm:$0xff] %v2532_v43 }
 0x562 PF: > { %p3342_p11 = scmp.eq.s32.totalorder %s3842_s13, 3  ;;  %s3673_s22 = smov [#allocation10]  }
 0x563   : > { %s2601_s17 = sshll.u32 %s3673_s22, 4  ;;  %s2602_s17 = int_to_ptr.vmem [resolvable:$true] %s2601_s17 }
 0x564   : > { %s3532_s9 = scalar_lea.vmem %s2602_s17, 3200  ;;  %p3539_p12 = scmp.lt.s32.totalorder %s2602_s17, %s2602_s17 }
 0x565   : > { %p3533_p4 = scmp.ne.s32.totalorder %s2602_s17, %s3532_s9  ;;  %p3540_p2 = scmp.lt.s32.totalorder %s3532_s9, %s3532_s9 }
 0x567   : > { %p3534_p5 = pnand %p3533_p4, %p3342_p11  ;;  %p3541_p7 = por %p3540_p2, %p3539_p12 }
 0x569   : > { %p3535_p8 = pneg %p3534_p5 }
 0x56b   : > { %p3542_p9 = pnand %p3541_p7, %p3535_p8 }
 0x56d   : > { %3545 = shalt.err (!%p3542_p9)
}
 0x56e   : > { %s3546_s11 = scalar_lea.hbm %s5063_s4, 3200 }
 0x56f   : > { %p3547_p6 = scmp.ne.s32.totalorder %s5063_s4, %s3546_s11  ;;  %p3552_p10 = scmp.lt.u32.totalorder %s3546_s11, %s5063_s4 }
 0x571   : > { %p3548_p1 = pnand %p3547_p6, %p3342_p11 }
 0x573   : > { %p3549_p3 = pneg %p3548_p1 }
 0x575   : > { %p3554_p0 = pnand %p3552_p10, %p3549_p3 }
 0x577   : > { %3557 = shalt.err (!%p3554_p0)
}
 0x578   : > { %s3674_s10 = smov 128   ;;  %s3675_s20 = smov 8  }
 0x579   : > { %3325 = dma.vmem_to_hbm [thread:$0]  (%p3342_p11), %s2602_s17, 3200, %s5063_s4, [#allocation6], %s3674_s10, %s3674_s10, %s3675_s20  }
 0x57a   : > { %3615 = dma.done.wait (%p3342_p11), [#allocation6], 3200  }
 0x57b   : > { %3617 = vsyncadd (%p3342_p11), [#allocation6], 4294964096 }
 0x57c PF: > { %s19_s25 = sadd.s32 1, %s3660_s25   ;;  %s5100_s8 = sld [smem:[#allocation15_spill]] }
 0x57d   : > { %p16_p13 = scmp.ge.s32.totalorder %s19_s25, 6   ;;  %s5101_s17 = sld [smem:[#allocation22_spill]] }
 0x57e   : > { %s5102_s1 = sld [smem:[#allocation16_spill]]  ;;  %s5103_s20 = sld [smem:[#allocation21_spill]] }
 0x57f   : > { %s5104_s21 = sld [smem:[#allocation17_spill]]  ;;  %s5105_s22 = sld [smem:[#allocation18_spill]] }
 0x580   : > { %s5106_s23 = sld [smem:[#allocation19_spill]]  ;;  %s5107_s24 = sld [smem:[#allocation20_spill]] }
 0x581   : > { %s5108_s15 = smov %s3624_s16  ;;  %s5110_s18 = smov %s3636_s19 }
 0x582   : > { %s5109_s16 = smov %s5100_s8  ;;  %18 = sbr.rel (!%p16_p13) target bundleno = 11 (0xb), region = 106 }
 0x584   : > { %s5111_s19 = smov %s5102_s1 }
 0x589   :  { %2617 = vsyncpa [#allocation5], 1 }
 0x58a   :  { %2619 = vsyncpa [#allocation5 + $0x1], 1 }
 0x58b   :  { %2620 = vsyncpa [#allocation8], 1 }
 0x58c   :  { %2622 = vsyncpa [#allocation8 + $0x1], 1 }
 0x58d   :  { %2623 = vsyncpa [#allocation6], 1 }
 0x58e   :  { %2625 = vsyncpa [#allocation6 + $0x1], 1 }

</bundles_post_ra>
